<compile_context>
chip_gen: v6e
topology: v6e:2x2x1
jax: 0.10.0
libtpu: 0.0.40
codegen_flags: <defaults>
</compile_context>

<pallas_src>
import jax
import jax.numpy as jnp
from jax.experimental import pallas as pl
from jax.experimental.pallas import tpu as pltpu


def se_gate_kernel(s_ref, b_ref, w_ref, x_ref, o_ref):
    # s: (Cin, 1) resident   b: (Cout, 1) resident
    # w: (tile, Cin)         x/o: (tile, HW)
    tile = w_ref.shape[0]
    row0 = pl.multiple_of(pl.program_id(0) * tile, 8)

    logits = jnp.dot(w_ref[...], s_ref[...], preferred_element_type=jnp.float32)
    logits = logits + b_ref[pl.ds(row0, tile), :].astype(jnp.float32)
    gate = jax.nn.sigmoid(logits)                      # (tile, 1), f32

    # Cast the tiny (tile, 1) gate once to the feature-map dtype; the large
    # (tile, HW) tensor stays in its native dtype for the broadcast multiply.
    o_ref[...] = (gate.astype(x_ref.dtype) * x_ref[...]).astype(o_ref.dtype)


def _grid_steps(cout):
    """One step per TensorCore: 2 on v7x (2 TCs/chip), 1 on v5e/v6e."""
    try:
        kind = jax.devices()[0].device_kind.lower()
        n_tc = 2 if "v7" in kind else 1
    except Exception:  # pragma: no cover - defensive, e.g. no device visible
        n_tc = 1
    if n_tc > 1 and cout % (n_tc * 8) == 0:
        return n_tc
    return 1


def se_gate(x442, x439, weight, bias):
    """x442: (1, Cin, 1, 1), x439: (1, Cout, H, W),
    weight: (Cout, Cin, 1, 1), bias: (Cout,)"""
    _, cin, _, _ = x442.shape
    n, cout, h, w = x439.shape
    assert n == 1
    hw = h * w

    # Pure reshapes of contiguous NCHW buffers -> no data movement, no casts.
    s = x442.reshape(cin, 1)
    x = x439.reshape(cout, hw)
    wm = weight.reshape(cout, cin)
    b = bias.reshape(cout, 1)

    steps = _grid_steps(cout)
    tile = cout // steps
    grid = (steps,)

    itemsize = jnp.dtype(x.dtype).itemsize
    bytes_accessed = (
        s.size * jnp.dtype(s.dtype).itemsize
        + wm.size * jnp.dtype(wm.dtype).itemsize
        + b.size * jnp.dtype(b.dtype).itemsize
        + 2 * x.size * itemsize  # x read + o write
    )
    cost = pl.CostEstimate(
        flops=2 * cout * cin + cout + cout * hw,
        transcendentals=cout,
        bytes_accessed=bytes_accessed,
    )

    out = pl.pallas_call(
        se_gate_kernel,
        out_shape=jax.ShapeDtypeStruct((cout, hw), x.dtype),
        grid=grid,
        in_specs=[
            pl.BlockSpec((cin, 1), lambda i: (0, 0)),     # s: resident, untiled
            pl.BlockSpec((cout, 1), lambda i: (0, 0)),    # bias: resident, untiled
            pl.BlockSpec((tile, cin), lambda i: (i, 0)),  # w tile
            pl.BlockSpec((tile, hw), lambda i: (i, 0)),   # x tile
        ],
        out_specs=pl.BlockSpec((tile, hw), lambda i: (i, 0)),
        compiler_params=pltpu.CompilerParams(
            dimension_semantics=("parallel",),
        ),
        cost_estimate=cost,
    )(s, b, wm, x)

    return out.reshape(1, cout, h, w)


if __name__ == "__main__":
    key = jax.random.PRNGKey(0)
    k1, k2, k3, k4 = jax.random.split(key, 4)

    CIN, COUT, H, W = 68, 1632, 7, 7

    # Module inputs (match the PyTorch shapes / dtypes)
    x442 = jax.random.normal(k1, (1, CIN, 1, 1), dtype=jnp.float32)
    x439 = jax.random.normal(k2, (1, COUT, H, W), dtype=jnp.float32)

    # Deterministic parameter init for Conv2d(68, 1632, kernel_size=1)
    fan_in = CIN  # kernel is 1x1
    bound = 1.0 / jnp.sqrt(fan_in)
    weight = jax.random.uniform(k3, (COUT, CIN, 1, 1), jnp.float32, -bound, bound)
    bias = jax.random.uniform(k4, (COUT,), jnp.float32, -bound, bound)

    out = se_gate(x442, x439, weight, bias)
    out = jax.block_until_ready(out)

    # Reference check in plain JAX
    logits_ref = (weight.reshape(COUT, CIN) @ x442.reshape(CIN, 1)) + bias.reshape(COUT, 1)
    ref = jax.nn.sigmoid(logits_ref).reshape(1, COUT, 1, 1) * x439
    assert out.shape == (1, COUT, H, W)
    assert out.dtype == x439.dtype
    assert jnp.allclose(out, ref, atol=1e-5, rtol=1e-5)

    print("KERNEL_OK")
</pallas_src>

<mosaic_0001>
module attributes {stable_mosaic.version = 11 : i64} {
  func.func @se_gate_kernel(%arg0: i32, %arg1: memref<68x1xf32, #tpu.memory_space<vmem>>, %arg2: memref<1632x1xf32, #tpu.memory_space<vmem>>, %arg3: memref<1632x68xf32, #tpu.memory_space<vmem>>, %arg4: memref<1632x49xf32, #tpu.memory_space<vmem>>, %arg5: memref<1632x49xf32, #tpu.memory_space<vmem>>) attributes {dimension_semantics = [#tpu.dimension_semantics<parallel>], iteration_bounds = array<i64: 1>, scalar_prefetch = 0 : i64, scratch_operands = 0 : i64, tpu.core_type = #tpu.core_type<tc>, window_params = [{pipeline_mode = #tpu.pipeline_mode<synchronous>, transform_indices = @transform_0, window_bounds = array<i64: 68, 1>}, {pipeline_mode = #tpu.pipeline_mode<synchronous>, transform_indices = @transform_1, window_bounds = array<i64: 1632, 1>}, {transform_indices = @transform_2, window_bounds = array<i64: 1632, 68>}, {transform_indices = @transform_3, window_bounds = array<i64: 1632, 49>}, {transform_indices = @transform_4, window_bounds = array<i64: 1632, 49>}]} {
    %c1632_i32 = arith.constant 1632 : i32
    %0 = arith.muli %arg0, %c1632_i32 : i32
    %1 = tpu.assume_multiple %0, 8 : i32
    %c0 = arith.constant 0 : index
    %c0_0 = arith.constant 0 : index
    %2 = vector.load %arg3[%c0, %c0_0] : memref<1632x68xf32, #tpu.memory_space<vmem>>, vector<1632x68xf32>
    %c0_1 = arith.constant 0 : index
    %c0_2 = arith.constant 0 : index
    %3 = vector.load %arg1[%c0_1, %c0_2] : memref<68x1xf32, #tpu.memory_space<vmem>>, vector<68x1xf32>
    %cst = arith.constant dense<0.000000e+00> : vector<1632x1xf32>
    %4 = tpu.matmul %2, %3, %cst {dimension_numbers = #tpu.dot_dimension_numbers<[1], [0], [0], [1], [0, 0, 1, 1], [], []>} : vector<1632x68xf32>, vector<68x1xf32>, vector<1632x1xf32> -> vector<1632x1xf32>
    %5 = arith.index_cast %1 : i32 to index
    %c0_3 = arith.constant 0 : index
    %6 = vector.load %arg2[%5, %c0_3] : memref<1632x1xf32, #tpu.memory_space<vmem>>, vector<1632x1xf32>
    %7 = arith.addf %4, %6 : vector<1632x1xf32>
    %8 = arith.negf %7 : vector<1632x1xf32>
    %9 = math.exp %8 : vector<1632x1xf32>
    %cst_4 = arith.constant 1.000000e+00 : f32
    %10 = vector.broadcast %cst_4 : f32 to vector<1632x1xf32>
    %11 = arith.addf %10, %9 : vector<1632x1xf32>
    %12 = arith.divf %10, %11 : vector<1632x1xf32>
    %c0_5 = arith.constant 0 : index
    %c0_6 = arith.constant 0 : index
    %13 = vector.load %arg4[%c0_5, %c0_6] : memref<1632x49xf32, #tpu.memory_space<vmem>>, vector<1632x49xf32>
    %14 = vector.broadcast %12 : vector<1632x1xf32> to vector<1632x49xf32>
    %15 = arith.mulf %14, %13 : vector<1632x49xf32>
    %c0_7 = arith.constant 0 : index
    %c0_8 = arith.constant 0 : index
    %16 = vector.load %arg5[%c0_7, %c0_8] : memref<1632x49xf32, #tpu.memory_space<vmem>>, vector<1632x49xf32>
    tpu.vector_store %arg5[%c0_7, %c0_8], %15 {strides = array<i32>} : memref<1632x49xf32, #tpu.memory_space<vmem>>, vector<1632x49xf32>,
    return
  }
  func.func @transform_0(%arg0: i32) -> (i32, i32) {
    %c0_i32 = arith.constant 0 : i32
    %c0_i32_0 = arith.constant 0 : i32
    %c0_i32_1 = arith.constant 0 : i32
    return %c0_i32, %c0_i32_0 : i32, i32
  }
  func.func @transform_1(%arg0: i32) -> (i32, i32) {
    %c0_i32 = arith.constant 0 : i32
    %c0_i32_0 = arith.constant 0 : i32
    %c0_i32_1 = arith.constant 0 : i32
    return %c0_i32, %c0_i32_0 : i32, i32
  }
  func.func @transform_2(%arg0: i32) -> (i32, i32) {
    %c0_i32 = arith.constant 0 : i32
    %c0_i32_0 = arith.constant 0 : i32
    return %arg0, %c0_i32 : i32, i32
  }
  func.func @transform_3(%arg0: i32) -> (i32, i32) {
    %c0_i32 = arith.constant 0 : i32
    %c0_i32_0 = arith.constant 0 : i32
    return %arg0, %c0_i32 : i32, i32
  }
  func.func @transform_4(%arg0: i32) -> (i32, i32) {
    %c0_i32 = arith.constant 0 : i32
    %c0_i32_0 = arith.constant 0 : i32
    return %arg0, %c0_i32 : i32, i32
  }
}

</mosaic_0001>

<bundles_post_ra>
// kernel: tpu_custom_call.1
= control target key start
LH: loop header
LB: loop body
LE: loop exit
PB: predicated region body
PF: predicated region fallthrough
CT: control target
= control target key end

     0   :  { %vm1049_vm0 = vcmask 1043456   ;;  %vm436_vm1 = vcmask 556032   ;;  %vm4790_vm2 = vcmask 400384   ;;  %s10024_s0 = inlined_call_operand.vmem [shape: f32[68,1], index: 0, kind: input, shape index: {}]   ;;  %s10025_s2 = inlined_call_operand.vmem [shape: f32[1632,68], index: 2, kind: input, shape index: {}]   ;;  %s10026_s1 = inlined_call_operand.vmem [shape: f32[1632,1], index: 1, kind: input, shape index: {}]   ;;  %s10027_s3 = inlined_call_operand.vmem [shape: f32[1632,49], index: 3, kind: input, shape index: {}]   ;;  %s10028_s4 = inlined_call_operand.vmem [shape: f32[1632,49], index: 4, kind: output, shape index: {}]  }
   0x1   :  { %v230_v0 = vld [vmem:[%s10024_s0 + $0x40] sm:$0xf]  ;;  %v229_v1 = vld [vmem:[%s10024_s0 + $0x38] sm:$0xff]  ;;  %v228_v2 = vld [vmem:[%s10024_s0 + $0x30] sm:$0xff] }
   0x2   :  { %5621 = vmatprep.subr.msk.mxu0 %vm1049_vm0, %v230_v0  ;;  %5945 = vmatprep.subr.msk.mxu1 %vm1049_vm0, %v230_v0  ;;  %v227_v3 = vld [vmem:[%s10024_s0 + $0x28] sm:$0xff]  ;;  %v226_v4 = vld [vmem:[%s10024_s0 + $0x20] sm:$0xff]  ;;  %v225_v5 = vld [vmem:[%s10024_s0 + $0x18] sm:$0xff] }
   0x3   :  { %5622 = vmatpush3.msk.msra.mxu0 %vm1049_vm0, %v230_v0  ;;  %5954 = vmatpush3.msk.msra.mxu1 %vm1049_vm0, %v230_v0  ;;  %v224_v6 = vld [vmem:[%s10024_s0 + $0x10] sm:$0xff]  ;;  %v223_v7 = vld [vmem:[%s10024_s0 + $0x8] sm:$0xff]  ;;  %v222_v8 = vld [vmem:[%s10024_s0] sm:$0xff] }
   0x4   :  { %5623 = vmatprep.subr.mxu0 %v229_v1  ;;  %5946 = vmatprep.subr.mxu1 %v229_v1  ;;  %v18_v9 = vld [vmem:[%s10025_s2] sm:$0xff]  ;;  %v120_v10 = vld [vmem:[%s10025_s2 + $0x330] sm:$0xff]  ;;  %v19_v11 = vld [vmem:[%s10025_s2 + $0x8] sm:$0xff] }
   0x5   :  { %5624 = vmatpush3.msra.mxu0 %v229_v1  ;;  %5955 = vmatpush3.msra.mxu1 %v229_v1  ;;  %v121_v12 = vld [vmem:[%s10025_s2 + $0x338] sm:$0xff]  ;;  %v20_v13 = vld [vmem:[%s10025_s2 + $0x10] sm:$0xff]  ;;  %v122_v14 = vld [vmem:[%s10025_s2 + $0x340] sm:$0xff] }
   0x6   :  { %5625 = vmatprep.subr.mxu0 %v228_v2  ;;  %5947 = vmatprep.subr.mxu1 %v228_v2  ;;  %v21_v15 = vld [vmem:[%s10025_s2 + $0x18] sm:$0xff]  ;;  %v123_v16 = vld [vmem:[%s10025_s2 + $0x348] sm:$0xff]  ;;  %v22_v17 = vld [vmem:[%s10025_s2 + $0x20] sm:$0xff] }
   0x7   :  { %5626 = vmatpush3.msra.mxu0 %v228_v2  ;;  %5956 = vmatpush3.msra.mxu1 %v228_v2  ;;  %v124_v18 = vld [vmem:[%s10025_s2 + $0x350] sm:$0xff]  ;;  %v23_v19 = vld [vmem:[%s10025_s2 + $0x28] sm:$0xff]  ;;  %v125_v20 = vld [vmem:[%s10025_s2 + $0x358] sm:$0xff] }
   0x8   :  { %5627 = vmatprep.subr.mxu0 %v227_v3  ;;  %5948 = vmatprep.subr.mxu1 %v227_v3  ;;  %v24_v21 = vld [vmem:[%s10025_s2 + $0x30] sm:$0xff]  ;;  %v126_v22 = vld [vmem:[%s10025_s2 + $0x360] sm:$0xff]  ;;  %v25_v23 = vld [vmem:[%s10025_s2 + $0x38] sm:$0xff] }
   0x9   :  { %5628 = vmatpush3.msra.mxu0 %v227_v3  ;;  %5957 = vmatpush3.msra.mxu1 %v227_v3  ;;  %v127_v24 = vld [vmem:[%s10025_s2 + $0x368] sm:$0xff]  ;;  %v26_v25 = vld [vmem:[%s10025_s2 + $0x40] sm:$0xff]  ;;  %v128_v26 = vld [vmem:[%s10025_s2 + $0x370] sm:$0xff] }
   0xa   :  { %5629 = vmatprep.subr.mxu0 %v226_v4  ;;  %5949 = vmatprep.subr.mxu1 %v226_v4  ;;  %v27_v27 = vld [vmem:[%s10025_s2 + $0x48] sm:$0xff]  ;;  %v129_v28 = vld [vmem:[%s10025_s2 + $0x378] sm:$0xff]  ;;  %v28_v29 = vld [vmem:[%s10025_s2 + $0x50] sm:$0xff] }
   0xb   :  { %5630 = vmatpush3.msra.mxu0 %v226_v4  ;;  %5958 = vmatpush3.msra.mxu1 %v226_v4  ;;  %v130_v30 = vld [vmem:[%s10025_s2 + $0x380] sm:$0xff]  ;;  %v29_v31 = vld [vmem:[%s10025_s2 + $0x58] sm:$0xff]  ;;  %v131_v32 = vld [vmem:[%s10025_s2 + $0x388] sm:$0xff] }
   0xc   :  { %5631 = vmatprep.subr.mxu0 %v225_v5  ;;  %5950 = vmatprep.subr.mxu1 %v225_v5  ;;  %v30_v33 = vld [vmem:[%s10025_s2 + $0x60] sm:$0xff]  ;;  %v132_v34 = vld [vmem:[%s10025_s2 + $0x390] sm:$0xff]  ;;  %v31_v35 = vld [vmem:[%s10025_s2 + $0x68] sm:$0xff] }
   0xd   :  { %5632 = vmatpush3.msra.mxu0 %v225_v5  ;;  %5959 = vmatpush3.msra.mxu1 %v225_v5  ;;  %v133_v36 = vld [vmem:[%s10025_s2 + $0x398] sm:$0xff]  ;;  %v32_v37 = vld [vmem:[%s10025_s2 + $0x70] sm:$0xff]  ;;  %v134_v38 = vld [vmem:[%s10025_s2 + $0x3a0] sm:$0xff] }
   0xe   :  { %5633 = vmatprep.subr.mxu0 %v224_v6  ;;  %5951 = vmatprep.subr.mxu1 %v224_v6  ;;  %v33_v39 = vld [vmem:[%s10025_s2 + $0x78] sm:$0xff]  ;;  %v135_v40 = vld [vmem:[%s10025_s2 + $0x3a8] sm:$0xff]  ;;  %v34_v41 = vld [vmem:[%s10025_s2 + $0x80] sm:$0xff] }
   0xf   :  { %5634 = vmatpush3.msra.mxu0 %v224_v6  ;;  %5960 = vmatpush3.msra.mxu1 %v224_v6  ;;  %v136_v42 = vld [vmem:[%s10025_s2 + $0x3b0] sm:$0xff]  ;;  %v35_v43 = vld [vmem:[%s10025_s2 + $0x88] sm:$0xff]  ;;  %v137_v44 = vld [vmem:[%s10025_s2 + $0x3b8] sm:$0xff] }
  0x10   :  { %5635 = vmatprep.subr.mxu0 %v223_v7  ;;  %5952 = vmatprep.subr.mxu1 %v223_v7  ;;  %v36_v45 = vld [vmem:[%s10025_s2 + $0x90] sm:$0xff]  ;;  %v138_v46 = vld [vmem:[%s10025_s2 + $0x3c0] sm:$0xff]  ;;  %v37_v47 = vld [vmem:[%s10025_s2 + $0x98] sm:$0xff] }
  0x11   :  { %5636 = vmatpush3.msra.mxu0 %v223_v7  ;;  %5961 = vmatpush3.msra.mxu1 %v223_v7  ;;  %v139_v48 = vld [vmem:[%s10025_s2 + $0x3c8] sm:$0xff]  ;;  %v38_v49 = vld [vmem:[%s10025_s2 + $0xa0] sm:$0xff]  ;;  %v140_v50 = vld [vmem:[%s10025_s2 + $0x3d0] sm:$0xff] }
  0x12   :  { %5637 = vmatprep.subr.mxu0 %v222_v8  ;;  %5953 = vmatprep.subr.mxu1 %v222_v8  ;;  %v39_v51 = vld [vmem:[%s10025_s2 + $0xa8] sm:$0xff]  ;;  %v141_v52 = vld [vmem:[%s10025_s2 + $0x3d8] sm:$0xff]  ;;  %v40_v53 = vld [vmem:[%s10025_s2 + $0xb0] sm:$0xff] }
  0x13   :  { %5638 = vmatpush3.msra.mxu0 %v222_v8  ;;  %5962 = vmatpush3.msra.mxu1 %v222_v8  ;;  %v142_v54 = vld [vmem:[%s10025_s2 + $0x3e0] sm:$0xff]  ;;  %v41_v55 = vld [vmem:[%s10025_s2 + $0xb8] sm:$0xff]  ;;  %v143_v56 = vld [vmem:[%s10025_s2 + $0x3e8] sm:$0xff] }
  0x14   :  { %5639 = vmatprep.mubr.msk.f32.mxu0 %vm436_vm1, %v18_v9  ;;  %5792 = vmatprep.mubr.msk.f32.mxu1 %vm436_vm1, %v120_v10  ;;  %v42_v57 = vld [vmem:[%s10025_s2 + $0xc0] sm:$0xff]  ;;  %v144_v58 = vld [vmem:[%s10025_s2 + $0x3f0] sm:$0xff]  ;;  %v43_v59 = vld [vmem:[%s10025_s2 + $0xc8] sm:$0xff] }
  0x15   :  { %5640 = vmatmul.mubr.msk.f32.vlgmr.msra.gmra.mxu0 %vm436_vm1, %v19_v11  ;;  %5793 = vmatmul.mubr.msk.f32.vlgmr.msra.gmra.mxu1 %vm436_vm1, %v121_v12  ;;  %v145_v60 = vld [vmem:[%s10025_s2 + $0x3f8] sm:$0xff]  ;;  %v44_v61 = vld [vmem:[%s10025_s2 + $0xd0] sm:$0xff]  ;;  %v146_v62 = vld [vmem:[%s10025_s2 + $0x400] sm:$0xff] }
  0x16   :  { %5642 = vmatprep.mubr.msk.f32.mxu0 %vm436_vm1, %v20_v13  ;;  %5795 = vmatprep.mubr.msk.f32.mxu1 %vm436_vm1, %v122_v14  ;;  %v45_v63 = vld [vmem:[%s10025_s2 + $0xd8] sm:$0xff]  ;;  %v147_v0 = vld [vmem:[%s10025_s2 + $0x408] sm:$0xff]  ;;  %v46_v1 = vld [vmem:[%s10025_s2 + $0xe0] sm:$0xff] }
  0x17   :  { %v148_v2 = vld [vmem:[%s10025_s2 + $0x410] sm:$0xff]  ;;  %v47_v3 = vld [vmem:[%s10025_s2 + $0xe8] sm:$0xff]  ;;  %v149_v4 = vld [vmem:[%s10025_s2 + $0x418] sm:$0xff] }
  0x18   :  { %v48_v5 = vld [vmem:[%s10025_s2 + $0xf0] sm:$0xff]  ;;  %v150_v6 = vld [vmem:[%s10025_s2 + $0x420] sm:$0xff]  ;;  %v49_v7 = vld [vmem:[%s10025_s2 + $0xf8] sm:$0xff] }
  0x19   :  { %5643 = vmatmul.mubr.msk.f32.gmra.mxu0 %vm436_vm1, %v21_v15  ;;  %5796 = vmatmul.mubr.msk.f32.gmra.mxu1 %vm436_vm1, %v123_v16  ;;  %v151_v8 = vld [vmem:[%s10025_s2 + $0x428] sm:$0xff]  ;;  %v50_v9 = vld [vmem:[%s10025_s2 + $0x100] sm:$0xff]  ;;  %v152_v10 = vld [vmem:[%s10025_s2 + $0x430] sm:$0xff] }
  0x1a   :  { %5645 = vmatprep.mubr.msk.f32.mxu0 %vm436_vm1, %v22_v17  ;;  %5798 = vmatprep.mubr.msk.f32.mxu1 %vm436_vm1, %v124_v18  ;;  %v51_v11 = vld [vmem:[%s10025_s2 + $0x108] sm:$0xff]  ;;  %v153_v12 = vld [vmem:[%s10025_s2 + $0x438] sm:$0xff]  ;;  %v52_v13 = vld [vmem:[%s10025_s2 + $0x110] sm:$0xff] }
  0x1b   :  { %v154_v14 = vld [vmem:[%s10025_s2 + $0x440] sm:$0xff]  ;;  %v53_v15 = vld [vmem:[%s10025_s2 + $0x118] sm:$0xff]  ;;  %v155_v16 = vld [vmem:[%s10025_s2 + $0x448] sm:$0xff] }
  0x1c   :  { %v54_v17 = vld [vmem:[%s10025_s2 + $0x120] sm:$0xff]  ;;  %v156_v18 = vld [vmem:[%s10025_s2 + $0x450] sm:$0xff] }
  0x1d   :  { %5646 = vmatmul.mubr.msk.f32.gmra.mxu0 %vm436_vm1, %v23_v19  ;;  %5799 = vmatmul.mubr.msk.f32.gmra.mxu1 %vm436_vm1, %v125_v20  ;;  %v55_v19 = vld [vmem:[%s10025_s2 + $0x128] sm:$0xff]  ;;  %v157_v20 = vld [vmem:[%s10025_s2 + $0x458] sm:$0xff] }
  0x1e   :  { %5648 = vmatprep.mubr.msk.f32.mxu0 %vm436_vm1, %v24_v21  ;;  %5801 = vmatprep.mubr.msk.f32.mxu1 %vm436_vm1, %v126_v22  ;;  %v56_v21 = vld [vmem:[%s10025_s2 + $0x130] sm:$0xff]  ;;  %v158_v22 = vld [vmem:[%s10025_s2 + $0x460] sm:$0xff] }
  0x21   :  { %5649 = vmatmul.mubr.msk.f32.gmra.mxu0 %vm436_vm1, %v25_v23  ;;  %5802 = vmatmul.mubr.msk.f32.gmra.mxu1 %vm436_vm1, %v127_v24  ;;  %v57_v23 = vld [vmem:[%s10025_s2 + $0x138] sm:$0xff]  ;;  %v159_v24 = vld [vmem:[%s10025_s2 + $0x468] sm:$0xff] }
  0x22   :  { %5651 = vmatprep.mubr.msk.f32.mxu0 %vm436_vm1, %v26_v25  ;;  %5804 = vmatprep.mubr.msk.f32.mxu1 %vm436_vm1, %v128_v26  ;;  %v58_v25 = vld [vmem:[%s10025_s2 + $0x140] sm:$0xff]  ;;  %v160_v26 = vld [vmem:[%s10025_s2 + $0x470] sm:$0xff] }
  0x25   :  { %5652 = vmatmul.mubr.msk.f32.gmra.mxu0 %vm436_vm1, %v27_v27  ;;  %5805 = vmatmul.mubr.msk.f32.gmra.mxu1 %vm436_vm1, %v129_v28  ;;  %v59_v27 = vld [vmem:[%s10025_s2 + $0x148] sm:$0xff]  ;;  %v161_v28 = vld [vmem:[%s10025_s2 + $0x478] sm:$0xff] }
  0x26   :  { %5654 = vmatprep.mubr.msk.f32.mxu0 %vm436_vm1, %v28_v29  ;;  %5807 = vmatprep.mubr.msk.f32.mxu1 %vm436_vm1, %v130_v30  ;;  %v60_v29 = vld [vmem:[%s10025_s2 + $0x150] sm:$0xff]  ;;  %v162_v30 = vld [vmem:[%s10025_s2 + $0x480] sm:$0xff] }
  0x29   :  { %5655 = vmatmul.mubr.msk.f32.gmra.mxu0 %vm436_vm1, %v29_v31  ;;  %5808 = vmatmul.mubr.msk.f32.gmra.mxu1 %vm436_vm1, %v131_v32  ;;  %v61_v31 = vld [vmem:[%s10025_s2 + $0x158] sm:$0xff]  ;;  %v163_v32 = vld [vmem:[%s10025_s2 + $0x488] sm:$0xff] }
  0x2a   :  { %5657 = vmatprep.mubr.msk.f32.mxu0 %vm436_vm1, %v30_v33  ;;  %5810 = vmatprep.mubr.msk.f32.mxu1 %vm436_vm1, %v132_v34  ;;  %v62_v33 = vld [vmem:[%s10025_s2 + $0x160] sm:$0xff]  ;;  %v164_v34 = vld [vmem:[%s10025_s2 + $0x490] sm:$0xff] }
  0x2d   :  { %5658 = vmatmul.mubr.msk.f32.gmra.mxu0 %vm436_vm1, %v31_v35  ;;  %5811 = vmatmul.mubr.msk.f32.gmra.mxu1 %vm436_vm1, %v133_v36  ;;  %v63_v35 = vld [vmem:[%s10025_s2 + $0x168] sm:$0xff]  ;;  %v165_v36 = vld [vmem:[%s10025_s2 + $0x498] sm:$0xff] }
  0x2e   :  { %5660 = vmatprep.mubr.msk.f32.mxu0 %vm436_vm1, %v32_v37  ;;  %5813 = vmatprep.mubr.msk.f32.mxu1 %vm436_vm1, %v134_v38  ;;  %v64_v37 = vld [vmem:[%s10025_s2 + $0x170] sm:$0xff]  ;;  %v166_v38 = vld [vmem:[%s10025_s2 + $0x4a0] sm:$0xff] }
  0x31   :  { %5661 = vmatmul.mubr.msk.f32.gmra.mxu0 %vm436_vm1, %v33_v39  ;;  %5814 = vmatmul.mubr.msk.f32.gmra.mxu1 %vm436_vm1, %v135_v40  ;;  %v65_v39 = vld [vmem:[%s10025_s2 + $0x178] sm:$0xff]  ;;  %v167_v40 = vld [vmem:[%s10025_s2 + $0x4a8] sm:$0xff] }
  0x32   :  { %5663 = vmatprep.mubr.msk.f32.mxu0 %vm436_vm1, %v34_v41  ;;  %5816 = vmatprep.mubr.msk.f32.mxu1 %vm436_vm1, %v136_v42  ;;  %v66_v41 = vld [vmem:[%s10025_s2 + $0x180] sm:$0xff]  ;;  %v168_v42 = vld [vmem:[%s10025_s2 + $0x4b0] sm:$0xff] }
  0x35   :  { %5664 = vmatmul.mubr.msk.f32.gmra.mxu0 %vm436_vm1, %v35_v43  ;;  %5817 = vmatmul.mubr.msk.f32.gmra.mxu1 %vm436_vm1, %v137_v44  ;;  %v67_v43 = vld [vmem:[%s10025_s2 + $0x188] sm:$0xff]  ;;  %v169_v44 = vld [vmem:[%s10025_s2 + $0x4b8] sm:$0xff] }
  0x36   :  { %5666 = vmatprep.mubr.msk.f32.mxu0 %vm436_vm1, %v36_v45  ;;  %5819 = vmatprep.mubr.msk.f32.mxu1 %vm436_vm1, %v138_v46  ;;  %v68_v45 = vld [vmem:[%s10025_s2 + $0x190] sm:$0xff]  ;;  %v170_v46 = vld [vmem:[%s10025_s2 + $0x4c0] sm:$0xff] }
  0x39   :  { %5667 = vmatmul.mubr.msk.f32.gmra.mxu0 %vm436_vm1, %v37_v47  ;;  %5820 = vmatmul.mubr.msk.f32.gmra.mxu1 %vm436_vm1, %v139_v48  ;;  %v69_v47 = vld [vmem:[%s10025_s2 + $0x198] sm:$0xff]  ;;  %v171_v48 = vld [vmem:[%s10025_s2 + $0x4c8] sm:$0xff] }
  0x3a   :  { %5669 = vmatprep.mubr.msk.f32.mxu0 %vm436_vm1, %v38_v49  ;;  %5822 = vmatprep.mubr.msk.f32.mxu1 %vm436_vm1, %v140_v50  ;;  %v70_v49 = vld [vmem:[%s10025_s2 + $0x1a0] sm:$0xff]  ;;  %v172_v50 = vld [vmem:[%s10025_s2 + $0x4d0] sm:$0xff] }
  0x3d   :  { %5670 = vmatmul.mubr.msk.f32.gmra.mxu0 %vm436_vm1, %v39_v51  ;;  %5823 = vmatmul.mubr.msk.f32.gmra.mxu1 %vm436_vm1, %v141_v52  ;;  %v71_v51 = vld [vmem:[%s10025_s2 + $0x1a8] sm:$0xff]  ;;  %v173_v52 = vld [vmem:[%s10025_s2 + $0x4d8] sm:$0xff] }
  0x3e   :  { %5672 = vmatprep.mubr.msk.f32.mxu0 %vm436_vm1, %v40_v53  ;;  %5825 = vmatprep.mubr.msk.f32.mxu1 %vm436_vm1, %v142_v54  ;;  %v72_v53 = vld [vmem:[%s10025_s2 + $0x1b0] sm:$0xff]  ;;  %v174_v54 = vld [vmem:[%s10025_s2 + $0x4e0] sm:$0xff] }
  0x41   :  { %5673 = vmatmul.mubr.msk.f32.gmra.mxu0 %vm436_vm1, %v41_v55  ;;  %5826 = vmatmul.mubr.msk.f32.gmra.mxu1 %vm436_vm1, %v143_v56  ;;  %v6782_v55 = vmov 0   ;;  %v73_v56 = vld [vmem:[%s10025_s2 + $0x1b8] sm:$0xff] }
  0x42   :  { %5675 = vmatprep.mubr.msk.f32.mxu0 %vm436_vm1, %v42_v57  ;;  %5828 = vmatprep.mubr.msk.f32.mxu1 %vm436_vm1, %v144_v58  ;;  %v175_v57 = vld [vmem:[%s10025_s2 + $0x4e8] sm:$0xff]  ;;  %v74_v58 = vld [vmem:[%s10025_s2 + $0x1c0] sm:$0xff] }
  0x43   :  { %5965 = vset.pattern.permute.xlu1 %v6782_v55  ;;  %5964 = vset.pattern.permute.xlu0 %v6782_v55  ;;  %v235_v55 = vld [vmem:[%s10026_s1 + $0x18] sm:$0xff] }
  0x45   :  { %5676 = vmatmul.mubr.msk.f32.gmra.mxu0 %vm436_vm1, %v43_v59  ;;  %5829 = vmatmul.mubr.msk.f32.gmra.mxu1 %vm436_vm1, %v145_v60  ;;  %v176_v59 = vld [vmem:[%s10025_s2 + $0x4f0] sm:$0xff]  ;;  %v75_v60 = vld [vmem:[%s10025_s2 + $0x1c8] sm:$0xff] }
  0x46   :  { %5678 = vmatprep.mubr.msk.f32.mxu0 %vm436_vm1, %v44_v61  ;;  %5831 = vmatprep.mubr.msk.f32.mxu1 %vm436_vm1, %v146_v62  ;;  %v177_v61 = vld [vmem:[%s10025_s2 + $0x4f8] sm:$0xff]  ;;  %v76_v62 = vld [vmem:[%s10025_s2 + $0x1d0] sm:$0xff] }
  0x49   :  { %5679 = vmatmul.mubr.msk.f32.gmra.mxu0 %vm436_vm1, %v45_v63  ;;  %5832 = vmatmul.mubr.msk.f32.gmra.mxu1 %vm436_vm1, %v147_v0  ;;  %v178_v63 = vld [vmem:[%s10025_s2 + $0x500] sm:$0xff]  ;;  %v77_v0 = vld [vmem:[%s10025_s2 + $0x1d8] sm:$0xff] }
  0x4a   :  { %5681 = vmatprep.mubr.msk.f32.mxu0 %vm436_vm1, %v46_v1  ;;  %5834 = vmatprep.mubr.msk.f32.mxu1 %vm436_vm1, %v148_v2  ;;  %v179_v1 = vld [vmem:[%s10025_s2 + $0x508] sm:$0xff]  ;;  %v78_v2 = vld [vmem:[%s10025_s2 + $0x1e0] sm:$0xff] }
  0x4d   :  { %5682 = vmatmul.mubr.msk.f32.gmra.mxu0 %vm436_vm1, %v47_v3  ;;  %5835 = vmatmul.mubr.msk.f32.gmra.mxu1 %vm436_vm1, %v149_v4  ;;  %v180_v3 = vld [vmem:[%s10025_s2 + $0x510] sm:$0xff]  ;;  %v79_v4 = vld [vmem:[%s10025_s2 + $0x1e8] sm:$0xff] }
  0x4e   :  { %5684 = vmatprep.mubr.msk.f32.mxu0 %vm436_vm1, %v48_v5  ;;  %5837 = vmatprep.mubr.msk.f32.mxu1 %vm436_vm1, %v150_v6  ;;  %v181_v5 = vld [vmem:[%s10025_s2 + $0x518] sm:$0xff]  ;;  %v80_v6 = vld [vmem:[%s10025_s2 + $0x1f0] sm:$0xff] }
  0x51   :  { %5685 = vmatmul.mubr.msk.f32.gmra.mxu0 %vm436_vm1, %v49_v7  ;;  %5838 = vmatmul.mubr.msk.f32.gmra.mxu1 %vm436_vm1, %v151_v8  ;;  %v81_v7 = vld [vmem:[%s10025_s2 + $0x1f8] sm:$0xff]  ;;  %v182_v8 = vld [vmem:[%s10025_s2 + $0x520] sm:$0xff] }
  0x52   :  { %5687 = vmatprep.mubr.msk.f32.mxu0 %vm436_vm1, %v50_v9  ;;  %5840 = vmatprep.mubr.msk.f32.mxu1 %vm436_vm1, %v152_v10  ;;  %v183_v9 = vld [vmem:[%s10025_s2 + $0x528] sm:$0xff]  ;;  %v82_v10 = vld [vmem:[%s10025_s2 + $0x200] sm:$0xff] }
  0x55   :  { %5688 = vmatmul.mubr.msk.f32.gmra.mxu0 %vm436_vm1, %v51_v11  ;;  %5841 = vmatmul.mubr.msk.f32.gmra.mxu1 %vm436_vm1, %v153_v12  ;;  %v83_v11 = vld [vmem:[%s10025_s2 + $0x208] sm:$0xff]  ;;  %v184_v12 = vld [vmem:[%s10025_s2 + $0x530] sm:$0xff] }
  0x56   :  { %5690 = vmatprep.mubr.msk.f32.mxu0 %vm436_vm1, %v52_v13  ;;  %5843 = vmatprep.mubr.msk.f32.mxu1 %vm436_vm1, %v154_v14  ;;  %v185_v13 = vld [vmem:[%s10025_s2 + $0x538] sm:$0xff]  ;;  %v84_v14 = vld [vmem:[%s10025_s2 + $0x210] sm:$0xff] }
  0x59   :  { %5691 = vmatmul.mubr.msk.f32.gmra.mxu0 %vm436_vm1, %v53_v15  ;;  %5844 = vmatmul.mubr.msk.f32.gmra.mxu1 %vm436_vm1, %v155_v16  ;;  %v85_v15 = vld [vmem:[%s10025_s2 + $0x218] sm:$0xff]  ;;  %v186_v16 = vld [vmem:[%s10025_s2 + $0x540] sm:$0xff] }
  0x5a   :  { %5693 = vmatprep.mubr.msk.f32.mxu0 %vm436_vm1, %v54_v17  ;;  %5846 = vmatprep.mubr.msk.f32.mxu1 %vm436_vm1, %v156_v18  ;;  %v187_v17 = vld [vmem:[%s10025_s2 + $0x548] sm:$0xff]  ;;  %v86_v18 = vld [vmem:[%s10025_s2 + $0x220] sm:$0xff] }
  0x5d   :  { %5694 = vmatmul.mubr.msk.f32.gmra.mxu0 %vm436_vm1, %v55_v19  ;;  %5847 = vmatmul.mubr.msk.f32.gmra.mxu1 %vm436_vm1, %v157_v20  ;;  %v87_v19 = vld [vmem:[%s10025_s2 + $0x228] sm:$0xff]  ;;  %v188_v20 = vld [vmem:[%s10025_s2 + $0x550] sm:$0xff] }
  0x5e   :  { %5696 = vmatprep.mubr.msk.f32.mxu0 %vm436_vm1, %v56_v21  ;;  %5849 = vmatprep.mubr.msk.f32.mxu1 %vm436_vm1, %v158_v22  ;;  %v189_v21 = vld [vmem:[%s10025_s2 + $0x558] sm:$0xff]  ;;  %v88_v22 = vld [vmem:[%s10025_s2 + $0x230] sm:$0xff] }
  0x61   :  { %5697 = vmatmul.mubr.msk.f32.gmra.mxu0 %vm436_vm1, %v57_v23  ;;  %5850 = vmatmul.mubr.msk.f32.gmra.mxu1 %vm436_vm1, %v159_v24  ;;  %v89_v23 = vld [vmem:[%s10025_s2 + $0x238] sm:$0xff]  ;;  %v190_v24 = vld [vmem:[%s10025_s2 + $0x560] sm:$0xff] }
  0x62   :  { %5699 = vmatprep.mubr.msk.f32.mxu0 %vm436_vm1, %v58_v25  ;;  %5852 = vmatprep.mubr.msk.f32.mxu1 %vm436_vm1, %v160_v26  ;;  %v191_v25 = vld [vmem:[%s10025_s2 + $0x568] sm:$0xff]  ;;  %v90_v26 = vld [vmem:[%s10025_s2 + $0x240] sm:$0xff] }
  0x65   :  { %5700 = vmatmul.mubr.msk.f32.gmra.mxu0 %vm436_vm1, %v59_v27  ;;  %5853 = vmatmul.mubr.msk.f32.gmra.mxu1 %vm436_vm1, %v161_v28  ;;  %v91_v27 = vld [vmem:[%s10025_s2 + $0x248] sm:$0xff]  ;;  %v192_v28 = vld [vmem:[%s10025_s2 + $0x570] sm:$0xff] }
  0x66   :  { %5702 = vmatprep.mubr.msk.f32.mxu0 %vm436_vm1, %v60_v29  ;;  %5855 = vmatprep.mubr.msk.f32.mxu1 %vm436_vm1, %v162_v30  ;;  %v193_v29 = vld [vmem:[%s10025_s2 + $0x578] sm:$0xff]  ;;  %v92_v30 = vld [vmem:[%s10025_s2 + $0x250] sm:$0xff] }
  0x69   :  { %5703 = vmatmul.mubr.msk.f32.gmra.mxu0 %vm436_vm1, %v61_v31  ;;  %5856 = vmatmul.mubr.msk.f32.gmra.mxu1 %vm436_vm1, %v163_v32  ;;  %v93_v31 = vld [vmem:[%s10025_s2 + $0x258] sm:$0xff]  ;;  %v194_v32 = vld [vmem:[%s10025_s2 + $0x580] sm:$0xff] }
  0x6a   :  { %5705 = vmatprep.mubr.msk.f32.mxu0 %vm436_vm1, %v62_v33  ;;  %5858 = vmatprep.mubr.msk.f32.mxu1 %vm436_vm1, %v164_v34  ;;  %v195_v33 = vld [vmem:[%s10025_s2 + $0x588] sm:$0xff]  ;;  %v94_v34 = vld [vmem:[%s10025_s2 + $0x260] sm:$0xff] }
  0x6d   :  { %5706 = vmatmul.mubr.msk.f32.gmra.mxu0 %vm436_vm1, %v63_v35  ;;  %5859 = vmatmul.mubr.msk.f32.gmra.mxu1 %vm436_vm1, %v165_v36  ;;  %v95_v35 = vld [vmem:[%s10025_s2 + $0x268] sm:$0xff]  ;;  %v196_v36 = vld [vmem:[%s10025_s2 + $0x590] sm:$0xff] }
  0x6e   :  { %5708 = vmatprep.mubr.msk.f32.mxu0 %vm436_vm1, %v64_v37  ;;  %5861 = vmatprep.mubr.msk.f32.mxu1 %vm436_vm1, %v166_v38  ;;  %v197_v37 = vld [vmem:[%s10025_s2 + $0x598] sm:$0xff]  ;;  %v96_v38 = vld [vmem:[%s10025_s2 + $0x270] sm:$0xff] }
  0x71   :  { %5709 = vmatmul.mubr.msk.f32.gmra.mxu0 %vm436_vm1, %v65_v39  ;;  %5862 = vmatmul.mubr.msk.f32.gmra.mxu1 %vm436_vm1, %v167_v40  ;;  %v97_v39 = vld [vmem:[%s10025_s2 + $0x278] sm:$0xff]  ;;  %v198_v40 = vld [vmem:[%s10025_s2 + $0x5a0] sm:$0xff] }
  0x72   :  { %5711 = vmatprep.mubr.msk.f32.mxu0 %vm436_vm1, %v66_v41  ;;  %5864 = vmatprep.mubr.msk.f32.mxu1 %vm436_vm1, %v168_v42  ;;  %v199_v41 = vld [vmem:[%s10025_s2 + $0x5a8] sm:$0xff]  ;;  %v98_v42 = vld [vmem:[%s10025_s2 + $0x280] sm:$0xff] }
  0x75   :  { %5712 = vmatmul.mubr.msk.f32.gmra.mxu0 %vm436_vm1, %v67_v43  ;;  %5865 = vmatmul.mubr.msk.f32.gmra.mxu1 %vm436_vm1, %v169_v44  ;;  %v233_v43 = vld [vmem:[%s10026_s1 + $0x8] sm:$0xff]  ;;  %v335_v44 = vld [vmem:[%s10026_s1 + $0x338] sm:$0xff] }
  0x76   :  { %5714 = vmatprep.mubr.msk.f32.mxu0 %vm436_vm1, %v68_v45  ;;  %5867 = vmatprep.mubr.msk.f32.mxu1 %vm436_vm1, %v170_v46  ;;  %v99_v45 = vld [vmem:[%s10025_s2 + $0x288] sm:$0xff] }
  0x79   :  { %5715 = vmatmul.mubr.msk.f32.gmra.mxu0 %vm436_vm1, %v69_v47  ;;  %5868 = vmatmul.mubr.msk.f32.gmra.mxu1 %vm436_vm1, %v171_v48  ;;  %v232_v48 = vld [vmem:[%s10026_s1] sm:$0xff] }
  0x7a   :  { %5717 = vmatprep.mubr.msk.f32.mxu0 %vm436_vm1, %v70_v49  ;;  %5870 = vmatprep.mubr.msk.f32.mxu1 %vm436_vm1, %v172_v50  ;;  %v334_v49 = vld [vmem:[%s10026_s1 + $0x330] sm:$0xff] }
  0x7d   :  { %5718 = vmatmul.mubr.msk.f32.gmra.mxu0 %vm436_vm1, %v71_v51  ;;  %5871 = vmatmul.mubr.msk.f32.gmra.mxu1 %vm436_vm1, %v173_v52  ;;  %v200_v52 = vld [vmem:[%s10025_s2 + $0x5b0] sm:$0xff] }
  0x7e   :  { %5720 = vmatprep.mubr.msk.f32.mxu0 %vm436_vm1, %v72_v53  ;;  %5873 = vmatprep.mubr.msk.f32.mxu1 %vm436_vm1, %v174_v54 }
  0x81   :  { %5721 = vmatmul.mubr.msk.f32.gmra.mxu0 %vm436_vm1, %v73_v56  ;;  %5874 = vmatmul.mubr.msk.f32.gmra.mxu1 %vm436_vm1, %v175_v57  ;;  %v201_v56 = vld [vmem:[%s10025_s2 + $0x5b8] sm:$0xff] }
  0x82   :  { %5723 = vmatprep.mubr.msk.f32.mxu0 %vm436_vm1, %v74_v58  ;;  %5876 = vmatprep.mubr.msk.f32.mxu1 %vm436_vm1, %v176_v59 }
  0x85   :  { %5724 = vmatmul.mubr.msk.f32.gmra.mxu0 %vm436_vm1, %v75_v60  ;;  %5877 = vmatmul.mubr.msk.f32.gmra.mxu1 %vm436_vm1, %v177_v61  ;;  %v337_v61 = vld [vmem:[%s10026_s1 + $0x348] sm:$0xff] }
  0x86   :  { %5726 = vmatprep.mubr.msk.f32.mxu0 %vm436_vm1, %v76_v62  ;;  %5879 = vmatprep.mubr.msk.f32.mxu1 %vm436_vm1, %v178_v63  ;;  %v234_v63 = vld [vmem:[%s10026_s1 + $0x10] sm:$0xff] }
  0x89   :  { %5727 = vmatmul.mubr.msk.f32.gmra.mxu0 %vm436_vm1, %v77_v0  ;;  %5880 = vmatmul.mubr.msk.f32.gmra.mxu1 %vm436_vm1, %v179_v1  ;;  %v336_v1 = vld [vmem:[%s10026_s1 + $0x340] sm:$0xff] }
  0x8a   :  { %5729 = vmatprep.mubr.msk.f32.mxu0 %vm436_vm1, %v78_v2  ;;  %5882 = vmatprep.mubr.msk.f32.mxu1 %vm436_vm1, %v180_v3 }
  0x8d   :  { %5730 = vmatmul.mubr.msk.f32.gmra.mxu0 %vm436_vm1, %v79_v4  ;;  %5883 = vmatmul.mubr.msk.f32.gmra.mxu1 %vm436_vm1, %v181_v5 }
  0x8e   :  { %5732 = vmatprep.mubr.msk.f32.mxu0 %vm436_vm1, %v80_v6  ;;  %5885 = vmatprep.mubr.msk.f32.mxu1 %vm436_vm1, %v182_v8  ;;  %v237_v8 = vld [vmem:[%s10026_s1 + $0x28] sm:$0xff] }
  0x91   :  { %5733 = vmatmul.mubr.msk.f32.gmra.mxu0 %vm436_vm1, %v81_v7  ;;  %5886 = vmatmul.mubr.msk.f32.gmra.mxu1 %vm436_vm1, %v183_v9  ;;  %v100_v9 = vld [vmem:[%s10025_s2 + $0x290] sm:$0xff] }
  0x92   :  { %5735 = vmatprep.mubr.msk.f32.mxu0 %vm436_vm1, %v82_v10  ;;  %5888 = vmatprep.mubr.msk.f32.mxu1 %vm436_vm1, %v184_v12  ;;  %v101_v10 = vld [vmem:[%s10025_s2 + $0x298] sm:$0xff] }
  0x95   :  { %5736 = vmatmul.mubr.msk.f32.gmra.mxu0 %vm436_vm1, %v83_v11  ;;  %5889 = vmatmul.mubr.msk.f32.gmra.mxu1 %vm436_vm1, %v185_v13 }
  0x96   :  { %5738 = vmatprep.mubr.msk.f32.mxu0 %vm436_vm1, %v84_v14  ;;  %5891 = vmatprep.mubr.msk.f32.mxu1 %vm436_vm1, %v186_v16  ;;  %v339_v14 = vld [vmem:[%s10026_s1 + $0x358] sm:$0xff] }
  0x99   :  { %5739 = vmatmul.mubr.msk.f32.gmra.mxu0 %vm436_vm1, %v85_v15  ;;  %5892 = vmatmul.mubr.msk.f32.gmra.mxu1 %vm436_vm1, %v187_v17  ;;  %v236_v17 = vld [vmem:[%s10026_s1 + $0x20] sm:$0xff] }
  0x9a   :  { %5741 = vmatprep.mubr.msk.f32.mxu0 %vm436_vm1, %v86_v18  ;;  %5894 = vmatprep.mubr.msk.f32.mxu1 %vm436_vm1, %v188_v20 }
  0x9d   :  { %5742 = vmatmul.mubr.msk.f32.gmra.mxu0 %vm436_vm1, %v87_v19  ;;  %5895 = vmatmul.mubr.msk.f32.gmra.mxu1 %vm436_vm1, %v189_v21  ;;  %v338_v19 = vld [vmem:[%s10026_s1 + $0x350] sm:$0xff] }
  0x9e   :  { %5744 = vmatprep.mubr.msk.f32.mxu0 %vm436_vm1, %v88_v22  ;;  %5897 = vmatprep.mubr.msk.f32.mxu1 %vm436_vm1, %v190_v24 }
  0xa1   :  { %5745 = vmatmul.mubr.msk.f32.gmra.mxu0 %vm436_vm1, %v89_v23  ;;  %5898 = vmatmul.mubr.msk.f32.gmra.mxu1 %vm436_vm1, %v191_v25 }
  0xa2   :  { %5747 = vmatprep.mubr.msk.f32.mxu0 %vm436_vm1, %v90_v26  ;;  %5900 = vmatprep.mubr.msk.f32.mxu1 %vm436_vm1, %v192_v28  ;;  %v239_v26 = vld [vmem:[%s10026_s1 + $0x38] sm:$0xff]  ;;  %v203_v28 = vld [vmem:[%s10025_s2 + $0x5c8] sm:$0xff] }
  0xa5   :  { %5748 = vmatmul.mubr.msk.f32.gmra.mxu0 %vm436_vm1, %v91_v27  ;;  %5901 = vmatmul.mubr.msk.f32.gmra.mxu1 %vm436_vm1, %v193_v29  ;;  %v202_v27 = vld [vmem:[%s10025_s2 + $0x5c0] sm:$0xff] }
  0xa6   :  { %5750 = vmatprep.mubr.msk.f32.mxu0 %vm436_vm1, %v92_v30  ;;  %5903 = vmatprep.mubr.msk.f32.mxu1 %vm436_vm1, %v194_v32  ;;  %v341_v32 = vld [vmem:[%s10026_s1 + $0x368] sm:$0xff] }
  0xa9   :  { %5751 = vmatmul.mubr.msk.f32.gmra.mxu0 %vm436_vm1, %v93_v31  ;;  %5904 = vmatmul.mubr.msk.f32.gmra.mxu1 %vm436_vm1, %v195_v33 }
  0xaa   :  { %5753 = vmatprep.mubr.msk.f32.mxu0 %vm436_vm1, %v94_v34  ;;  %5906 = vmatprep.mubr.msk.f32.mxu1 %vm436_vm1, %v196_v36 }
  0xad   :  { %5754 = vmatmul.mubr.msk.f32.gmra.mxu0 %vm436_vm1, %v95_v35  ;;  %5907 = vmatmul.mubr.msk.f32.gmra.mxu1 %vm436_vm1, %v197_v37  ;;  %v238_v35 = vld [vmem:[%s10026_s1 + $0x30] sm:$0xff]  ;;  %v340_v37 = vld [vmem:[%s10026_s1 + $0x360] sm:$0xff] }
  0xae   :  { %5756 = vmatprep.mubr.msk.f32.mxu0 %vm436_vm1, %v96_v38  ;;  %5909 = vmatprep.mubr.msk.f32.mxu1 %vm436_vm1, %v198_v40 }
  0xb1   :  { %5757 = vmatmul.mubr.msk.f32.gmra.mxu0 %vm436_vm1, %v97_v39  ;;  %5910 = vmatmul.mubr.msk.f32.gmra.mxu1 %vm436_vm1, %v199_v41 }
  0xb2   :  { %5759 = vmatprep.mubr.msk.f32.mxu0 %vm436_vm1, %v98_v42  ;;  %5912 = vmatprep.mubr.msk.f32.mxu1 %vm436_vm1, %v200_v52 }
  0xb5   :  { %5760 = vmatmul.mubr.msk.f32.gmra.mxu0 %vm436_vm1, %v99_v45  ;;  %5913 = vmatmul.mubr.msk.f32.gmra.mxu1 %vm436_vm1, %v201_v56  ;;  %v103_v45 = vld [vmem:[%s10025_s2 + $0x2a8] sm:$0xff] }
  0xb6   :  { %5762 = vmatprep.mubr.msk.f32.mxu0 %vm436_vm1, %v100_v9  ;;  %5915 = vmatprep.mubr.msk.f32.mxu1 %vm436_vm1, %v202_v27 }
  0xb9   :  { %5763 = vmatmul.mubr.msk.f32.gmra.mxu0 %vm436_vm1, %v101_v10  ;;  %5916 = vmatmul.mubr.msk.f32.gmra.mxu1 %vm436_vm1, %v203_v28  ;;  %v342_v28 = vld [vmem:[%s10026_s1 + $0x370] sm:$0xff] }
  0xd5   :  { %v5641_v46 = vpop.f32.mrf.mxu0  ;;  %v5794_v47 = vpop.f32.mrf.mxu1 }
  0xd6   :  { %v1125_v50 = vadd.f32 %v5641_v46, %v233_v43  ;;  %v1635_v51 = vadd.f32 %v5794_v47, %v335_v44  ;;  %v102_v44 = vld [vmem:[%s10025_s2 + $0x2a0] sm:$0xff] }
  0xd7   :  { %v1119_v53 = vpop.f32.mrf.mxu0  ;;  %v1629_v54 = vpop.f32.mrf.mxu1  ;;  %5765 = vmatprep.mubr.msk.f32.mxu0 %vm436_vm1, %v102_v44 }
  0xd8   :  { %v5205_v57 = vmul.f32 -1.442695, %v1125_v50  ;;  %v5307_v58 = vmul.f32 -1.442695, %v1635_v51  ;;  %v1120_v59 = vadd.f32 %v1119_v53, %v232_v48  ;;  %v1630_v60 = vadd.f32 %v1629_v54, %v334_v49  ;;  %5766 = vmatmul.mubr.msk.f32.gmra.mxu0 %vm436_vm1, %v103_v45  ;;  %v204_v54 = vld [vmem:[%s10025_s2 + $0x5d0] sm:$0xff]  ;;  %v345_v45 = vld [vmem:[%s10026_s1 + $0x388] sm:$0xff] }
  0xd9   :  { %v5644_v62 = vpop.f32.mrf.mxu0  ;;  %v5797_v0 = vpop.f32.mrf.mxu1  ;;  %5918 = vmatprep.mubr.msk.f32.mxu1 %vm436_vm1, %v204_v54 }
  0xda   :  { %5966 = vpow2.f32 %v5205_v57  ;;  %v5204_v2 = vmul.f32 -1.442695, %v1120_v59  ;;  %v5306_v3 = vmul.f32 -1.442695, %v1630_v60  ;;  %v1135_v4 = vadd.f32 %v5644_v62, %v235_v55  ;;  %v205_v55 = vld [vmem:[%s10025_s2 + $0x5d8] sm:$0xff] }
  0xdb   :  { %5968 = vpow2.f32 %v5307_v58  ;;  %v1129_v5 = vpop.f32.mrf.mxu0  ;;  %v1645_v6 = vadd.f32 %v5797_v0, %v337_v61  ;;  %v1639_v7 = vpop.f32.mrf.mxu1  ;;  %5919 = vmatmul.mubr.msk.f32.gmra.mxu1 %vm436_vm1, %v205_v55  ;;  %v104_v0 = vld [vmem:[%s10025_s2 + $0x2b0] sm:$0xff] }
  0xdc   :  { %5970 = vpow2.f32 %v5204_v2  ;;  %v5207_v11 = vmul.f32 -1.442695, %v1135_v4  ;;  %v1130_v12 = vadd.f32 %v1129_v5, %v234_v63  ;;  %v1640_v13 = vadd.f32 %v1639_v7, %v336_v1  ;;  %5768 = vmatprep.mubr.msk.f32.mxu0 %vm436_vm1, %v104_v0 }
  0xdd   :  { %5972 = vpow2.f32 %v5306_v3  ;;  %v5309_v15 = vmul.f32 -1.442695, %v1645_v6  ;;  %v5647_v16 = vpop.f32.mrf.mxu0  ;;  %v5800_v18 = vpop.f32.mrf.mxu1  ;;  %v105_v3 = vld [vmem:[%s10025_s2 + $0x2b8] sm:$0xff] }
  0xde   :  { %5974 = vpow2.f32 %v5207_v11  ;;  %v5206_v20 = vmul.f32 -1.442695, %v1130_v12  ;;  %v5308_v21 = vmul.f32 -1.442695, %v1640_v13  ;;  %v1145_v22 = vadd.f32 %v5647_v16, %v237_v8  ;;  %5769 = vmatmul.mubr.msk.f32.gmra.mxu0 %vm436_vm1, %v105_v3  ;;  %v206_v13 = vld [vmem:[%s10025_s2 + $0x5e0] sm:$0xff]  ;;  %v241_v16 = vld [vmem:[%s10026_s1 + $0x48] sm:$0xff] }
  0xdf   :  { %5976 = vpow2.f32 %v5309_v15  ;;  %v1139_v23 = vpop.f32.mrf.mxu0  ;;  %v1655_v24 = vadd.f32 %v5800_v18, %v339_v14  ;;  %v1649_v25 = vpop.f32.mrf.mxu1  ;;  %5921 = vmatprep.mubr.msk.f32.mxu1 %vm436_vm1, %v206_v13  ;;  %v247_v13 = vld [vmem:[%s10026_s1 + $0x78] sm:$0xff] }
  0xe0   :  { %5978 = vpow2.f32 %v5206_v20  ;;  %v5209_v29 = vmul.f32 -1.442695, %v1145_v22  ;;  %v1140_v30 = vadd.f32 %v1139_v23, %v236_v17  ;;  %v1650_v31 = vadd.f32 %v1649_v25, %v338_v19  ;;  %v207_v17 = vld [vmem:[%s10025_s2 + $0x5e8] sm:$0xff]  ;;  %v240_v20 = vld [vmem:[%s10026_s1 + $0x40] sm:$0xff] }
  0xe1   :  { %5980 = vpow2.f32 %v5308_v21  ;;  %v5311_v33 = vmul.f32 -1.442695, %v1655_v24  ;;  %v5650_v34 = vpop.f32.mrf.mxu0  ;;  %v5803_v36 = vpop.f32.mrf.mxu1  ;;  %5922 = vmatmul.mubr.msk.f32.gmra.mxu1 %vm436_vm1, %v207_v17  ;;  %v343_v24 = vld [vmem:[%s10026_s1 + $0x378] sm:$0xff] }
  0xe2   :  { %5982 = vpow2.f32 %v5209_v29  ;;  %v5208_v38 = vmul.f32 -1.442695, %v1140_v30  ;;  %v5310_v39 = vmul.f32 -1.442695, %v1650_v31  ;;  %v1155_v40 = vadd.f32 %v5650_v34, %v239_v26  ;;  %v106_v31 = vld [vmem:[%s10025_s2 + $0x2c0] sm:$0xff] }
  0xe3   :  { %5984 = vpow2.f32 %v5311_v33  ;;  %v1149_v41 = vpop.f32.mrf.mxu0  ;;  %v1665_v42 = vadd.f32 %v5803_v36, %v341_v32  ;;  %v1659_v43 = vpop.f32.mrf.mxu1  ;;  %5771 = vmatprep.mubr.msk.f32.mxu0 %vm436_vm1, %v106_v31  ;;  %v107_v36 = vld [vmem:[%s10025_s2 + $0x2c8] sm:$0xff] }
  0xe4   :  { %5986 = vpow2.f32 %v5208_v38  ;;  %v5211_v46 = vmul.f32 -1.442695, %v1155_v40  ;;  %v1150_v47 = vadd.f32 %v1149_v41, %v238_v35  ;;  %v1660_v48 = vadd.f32 %v1659_v43, %v340_v37  ;;  %v243_v35 = vld [vmem:[%s10026_s1 + $0x58] sm:$0xff]  ;;  %v242_v40 = vld [vmem:[%s10026_s1 + $0x50] sm:$0xff]  ;;  %5772 = vmatmul.mubr.msk.f32.gmra.mxu0 %vm436_vm1, %v107_v36 }
  0xe5   :  { %5988 = vpow2.f32 %v5310_v39  ;;  %v5313_v49 = vmul.f32 -1.442695, %v1665_v42  ;;  %v5653_v52 = vpop.f32.mrf.mxu0  ;;  %v7569_v58 = vpop.f32.mrf.mxu1 }
  0xe6   :  { %5990 = vpow2.f32 %v5211_v46  ;;  %v5210_v50 = vmul.f32 -1.442695, %v1150_v47  ;;  %v5312_v51 = vmul.f32 -1.442695, %v1660_v48  ;;  %v1165_v27 = vadd.f32 %v5653_v52, %v241_v16 }
  0xe7   :  { %v5967_v53 = vpop.eup %5966  ;;  %5992 = vpow2.f32 %v5313_v49  ;;  %v1159_v63 = vpop.f32.mrf.mxu0  ;;  %v1675_v39 = vadd.f32 %v7569_v58, %v343_v24  ;;  %v209_v58 = vld [vmem:[%s10025_s2 + $0x5f8] sm:$0xff]  ;;  %v349_v24 = vld [vmem:[%s10026_s1 + $0x3a8] sm:$0xff] }
  0xe8   :  { %v5969_v56 = vpop.eup %5968  ;;  %v2751_v57 = vadd.f32 1.0, %v5967_v53  ;;  %5994 = vpow2.f32 %v5210_v50  ;;  %v1669_v6 = vpop.f32.mrf.mxu1  ;;  %v1160_v34 = vadd.f32 %v1159_v63, %v240_v20  ;;  %v5213_v48 = vmul.f32 -1.442695, %v1165_v27  ;;  %v344_v50 = vld [vmem:[%s10026_s1 + $0x380] sm:$0xff]  ;;  %v109_v20 = vld [vmem:[%s10025_s2 + $0x2d8] sm:$0xff] }
  0xe9   :  { %v5971_v59 = vpop.eup %5970  ;;  %v2853_v60 = vadd.f32 1.0, %v5969_v56  ;;  %5996 = vpow2.f32 %v5312_v51  ;;  %v5656_v7 = vpop.f32.mrf.mxu0  ;;  %v1670_v44 = vadd.f32 %v1669_v6, %v342_v28  ;;  %v245_v56 = vld [vmem:[%s10026_s1 + $0x68] sm:$0xff] }
  0xea   :  { %v5973_v61 = vpop.eup %5972  ;;  %5998 = vrcp.f32 %v2751_v57  ;;  %v2750_v62 = vadd.f32 1.0, %v5971_v59  ;;  %v7581_v12 = vpop.f32.mrf.mxu1  ;;  %v1175_v49 = vadd.f32 %v5656_v7, %v243_v35  ;;  %v5212_v54 = vmul.f32 -1.442695, %v1160_v34  ;;  %v208_v57 = vld [vmem:[%s10025_s2 + $0x5f0] sm:$0xff] }
  0xeb   :  { %v5975_v1 = vpop.eup %5974  ;;  %6000 = vrcp.f32 %v2853_v60  ;;  %v2852_v2 = vadd.f32 1.0, %v5973_v61  ;;  %v1169_v21 = vpop.f32.mrf.mxu0  ;;  %v5315_v60 = vmul.f32 -1.442695, %v1675_v39  ;;  %v1685_v61 = vadd.f32 %v7581_v12, %v345_v45  ;;  %5924 = vmatprep.mubr.msk.f32.mxu1 %vm436_vm1, %v208_v57  ;;  %v110_v45 = vld [vmem:[%s10025_s2 + $0x2e0] sm:$0xff] }
  0xec   :  { %v5977_v4 = vpop.eup %5976  ;;  %6002 = vrcp.f32 %v2750_v62  ;;  %v2753_v5 = vadd.f32 1.0, %v5975_v1  ;;  %v1679_v29 = vpop.f32.mrf.mxu1  ;;  %v1170_v55 = vadd.f32 %v1169_v21, %v242_v40  ;;  %v244_v62 = vld [vmem:[%s10026_s1 + $0x60] sm:$0xff]  ;;  %5925 = vmatmul.mubr.msk.f32.gmra.mxu1 %vm436_vm1, %v209_v58  ;;  %v5215_v6 = vmul.f32 -1.442695, %v1175_v49  ;;  %v213_v58 = vld [vmem:[%s10025_s2 + $0x618] sm:$0xff] }
  0xed   :  { %v5979_v8 = vpop.eup %5978  ;;  %6004 = vrcp.f32 %v2852_v2  ;;  %v2855_v9 = vadd.f32 1.0, %v5977_v4  ;;  %v5659_v30 = vpop.f32.mrf.mxu0  ;;  %v5314_v2 = vmul.f32 -1.442695, %v1670_v44  ;;  %v1680_v3 = vadd.f32 %v1679_v29, %v344_v50  ;;  %v347_v4 = vld [vmem:[%s10026_s1 + $0x398] sm:$0xff]  ;;  %v348_v29 = vld [vmem:[%s10026_s1 + $0x3a0] sm:$0xff] }
  0xee   :  { %v5981_v10 = vpop.eup %5980  ;;  %6006 = vrcp.f32 %v2753_v5  ;;  %v2752_v11 = vadd.f32 1.0, %v5979_v8  ;;  %v5812_v41 = vpop.f32.mrf.mxu1  ;;  %v1185_v7 = vadd.f32 %v5659_v30, %v245_v56  ;;  %v346_v8 = vld [vmem:[%s10026_s1 + $0x390] sm:$0xff]  ;;  %v5317_v16 = vmul.f32 -1.442695, %v1685_v61 }
  0xef   :  { %v5983_v14 = vpop.eup %5982  ;;  %6008 = vrcp.f32 %v2855_v9  ;;  %v2854_v15 = vadd.f32 1.0, %v5981_v10  ;;  %v1179_v51 = vpop.f32.mrf.mxu0  ;;  %v1695_v17 = vadd.f32 %v5812_v41, %v347_v4 }
  0xf0   :  { %v5985_v18 = vpop.eup %5984  ;;  %6010 = vrcp.f32 %v2752_v11  ;;  %v2755_v19 = vadd.f32 1.0, %v5983_v14  ;;  %v1689_v63 = vpop.f32.mrf.mxu1  ;;  %v5214_v11 = vmul.f32 -1.442695, %v1170_v55  ;;  %v1180_v12 = vadd.f32 %v1179_v51, %v244_v62  ;;  %v108_v14 = vld [vmem:[%s10025_s2 + $0x2d0] sm:$0xff] }
  0xf1   :  { %v5987_v22 = vpop.eup %5986  ;;  %6012 = vrcp.f32 %v2854_v15  ;;  %v2857_v23 = vadd.f32 1.0, %v5985_v18  ;;  %v5662_v0 = vpop.f32.mrf.mxu0  ;;  %5774 = vmatprep.mubr.msk.f32.mxu0 %vm436_vm1, %v108_v14  ;;  %v5319_v35 = vmul.f32 -1.442695, %v1695_v17  ;;  %v215_v17 = vld [vmem:[%s10025_s2 + $0x628] sm:$0xff] }
  0xf2   :  { %v5989_v25 = vpop.eup %5988  ;;  %6014 = vrcp.f32 %v2755_v19  ;;  %v2754_v26 = vadd.f32 1.0, %v5987_v22  ;;  %v5815_v9 = vpop.f32.mrf.mxu1  ;;  %v246_v19 = vld [vmem:[%s10026_s1 + $0x70] sm:$0xff]  ;;  %v5316_v22 = vmul.f32 -1.442695, %v1680_v3  ;;  %5775 = vmatmul.mubr.msk.f32.gmra.mxu0 %vm436_vm1, %v109_v20  ;;  %v1195_v27 = vadd.f32 %v5662_v0, %v247_v13  ;;  %v113_v3 = vld [vmem:[%s10025_s2 + $0x2f8] sm:$0xff]  ;;  %v248_v20 = vld [vmem:[%s10026_s1 + $0x80] sm:$0xff] }
  0xf3   :  { %v5991_v32 = vpop.eup %5990  ;;  %6016 = vrcp.f32 %v2857_v23  ;;  %v2856_v33 = vadd.f32 1.0, %v5989_v25  ;;  %v1189_v18 = vpop.f32.mrf.mxu0  ;;  %v1690_v23 = vadd.f32 %v1689_v63, %v346_v8  ;;  %v5216_v31 = vmul.f32 -1.442695, %v1180_v12  ;;  %5777 = vmatprep.mubr.msk.f32.mxu0 %vm436_vm1, %v110_v45  ;;  %v353_v45 = vld [vmem:[%s10026_s1 + $0x3c8] sm:$0xff] }
  0xf4   :  { %v5993_v37 = vpop.eup %5992  ;;  %6018 = vrcp.f32 %v2754_v26  ;;  %v2757_v38 = vadd.f32 1.0, %v5991_v32  ;;  %v5217_v26 = vmul.f32 -1.442695, %v1185_v7  ;;  %v1699_v28 = vpop.f32.mrf.mxu1  ;;  %v1190_v32 = vadd.f32 %v1189_v18, %v246_v19 }
  0xf5   :  { %v5995_v42 = vpop.eup %5994  ;;  %6020 = vrcp.f32 %v2856_v33  ;;  %v2859_v43 = vadd.f32 1.0, %v5993_v37  ;;  %v210_v33 = vld [vmem:[%s10025_s2 + $0x600] sm:$0xff]  ;;  %v1705_v36 = vadd.f32 %v5815_v9, %v349_v24  ;;  %v211_v37 = vld [vmem:[%s10025_s2 + $0x608] sm:$0xff]  ;;  %v5318_v39 = vmul.f32 -1.442695, %v1690_v23  ;;  %v351_v24 = vld [vmem:[%s10026_s1 + $0x3b8] sm:$0xff] }
  0xf6   :  { %v5997_v46 = vpop.eup %5996  ;;  %6022 = vrcp.f32 %v2757_v38  ;;  %v2756_v47 = vadd.f32 1.0, %v5995_v42  ;;  %5927 = vmatprep.mubr.msk.f32.mxu1 %vm436_vm1, %v210_v33  ;;  %v1700_v40 = vadd.f32 %v1699_v28, %v348_v29  ;;  %v5219_v42 = vmul.f32 -1.442695, %v1195_v27  ;;  %v7694_v57 = vpop.f32.mrf.mxu1  ;;  %v350_v28 = vld [vmem:[%s10026_s1 + $0x3b0] sm:$0xff] }
  0xf7   :  { %v5999_v52 = vpop.eup %5998  ;;  %6024 = vrcp.f32 %v2859_v43  ;;  %v2858_v53 = vadd.f32 1.0, %v5997_v46  ;;  %5928 = vmatmul.mubr.msk.f32.gmra.mxu1 %vm436_vm1, %v211_v37  ;;  %v5218_v44 = vmul.f32 -1.442695, %v1190_v32 }
  0xf8   :  { %v6001_v59 = vpop.eup %6000  ;;  %6026 = vrcp.f32 %v2756_v47  ;;  %3573 = vperm.xlu0 %5964, %v5999_v52   ;;  %v5321_v47 = vmul.f32 -1.442695, %v1705_v36  ;;  %v5320_v50 = vmul.f32 -1.442695, %v1700_v40  ;;  %v7689_v52 = vpop.f32.mrf.mxu0  ;;  %v115_v36 = vld [vmem:[%s10025_s2 + $0x308] sm:$0xff]  ;;  %v250_v40 = vld [vmem:[%s10026_s1 + $0x90] sm:$0xff] }
  0xf9   :  { %v6003_v1 = vpop.eup %6002  ;;  %6028 = vrcp.f32 %v2858_v53  ;;  %4083 = vperm.xlu1 %5965, %v6001_v59  }
  0xfa   :  { %v6005_v5 = vpop.eup %6004  ;;  %6030 = vpow2.f32 %v5213_v48  ;;  %v111_v48 = vld [vmem:[%s10025_s2 + $0x2e8] sm:$0xff]  ;;  %v1199_v63 = vpop.f32.mrf.mxu0 }
  0xfb   :  { %v6007_v10 = vpop.eup %6006  ;;  %6032 = vpow2.f32 %v5212_v54  ;;  %5778 = vmatmul.mubr.msk.f32.gmra.mxu0 %vm436_vm1, %v111_v48  ;;  %v212_v54 = vld [vmem:[%s10025_s2 + $0x610] sm:$0xff]  ;;  %v1200_v33 = vadd.f32 %v1199_v63, %v248_v20  ;;  %v117_v20 = vld [vmem:[%s10025_s2 + $0x318] sm:$0xff] }
  0xfc   :  { %v6009_v15 = vpop.eup %6008  ;;  %6034 = vpow2.f32 %v5315_v60  ;;  %3568 = vperm.xlu0 %5964, %v6003_v1   ;;  %5930 = vmatprep.mubr.msk.f32.mxu1 %vm436_vm1, %v212_v54  ;;  %v7707_v7 = vpop.f32.mrf.mxu0 }
  0xfd   :  { %v6011_v21 = vpop.eup %6010  ;;  %6036 = vpow2.f32 %v5314_v2  ;;  %3583 = vperm.xlu1 %5965, %v6007_v10   ;;  %5931 = vmatmul.mubr.msk.f32.gmra.mxu1 %vm436_vm1, %v213_v58  ;;  %v112_v2 = vld [vmem:[%s10025_s2 + $0x2f0] sm:$0xff]  ;;  %v5220_v54 = vmul.f32 -1.442695, %v1200_v33  ;;  %v217_v58 = vld [vmem:[%s10025_s2 + $0x638] sm:$0xff]  ;;  %v218_v33 = vld [vmem:[%s10025_s2 + $0x640] sm:$0xff] }
  0xfe   :  { %v6013_v25 = vpop.eup %6012  ;;  %6038 = vpow2.f32 %v5215_v6  ;;  %v1709_v6 = vpop.f32.mrf.mxu1  ;;  %5780 = vmatprep.mubr.msk.f32.mxu0 %vm436_vm1, %v112_v2 }
  0xff   :  { %v6015_v30 = vpop.eup %6014  ;;  %6040 = vpow2.f32 %v5214_v11  ;;  %5781 = vmatmul.mubr.msk.f32.gmra.mxu0 %vm436_vm1, %v113_v3 }
 0x100   :  { %v7668_v34 = vpop.eup %6016  ;;  %6042 = vpow2.f32 %v5317_v16  ;;  %4078 = vperm.xlu0 %5964, %v6005_v5   ;;  %v7712_v12 = vpop.f32.mrf.mxu1  ;;  %v214_v16 = vld [vmem:[%s10025_s2 + $0x620] sm:$0xff] }
 0x101   :  { %v6019_v38 = vpop.eup %6018  ;;  %6044 = vpow2.f32 %v5316_v22  ;;  %4093 = vperm.xlu1 %5965, %v6009_v15   ;;  %v249_v15 = vld [vmem:[%s10026_s1 + $0x88] sm:$0xff]  ;;  %5933 = vmatprep.mubr.msk.f32.mxu1 %vm436_vm1, %v214_v16 }
 0x102   :  { %v6021_v41 = vpop.eup %6020  ;;  %6046 = vpow2.f32 %v5217_v26  ;;  %5934 = vmatmul.mubr.msk.f32.gmra.mxu1 %vm436_vm1, %v215_v17  ;;  %v1205_v27 = vadd.f32 %v7689_v52, %v249_v15  ;;  %v1719_v29 = vpop.f32.mrf.mxu1 }
 0x103   :  { %v7675_v43 = vpop.eup %6022  ;;  %6048 = vpow2.f32 %v5216_v31 }
 0x104   :  { %v7680_v46 = vpop.eup %6024  ;;  %4088 = vperm.xlu0 %5964, %v6013_v25   ;;  %6050 = vpow2.f32 %v5319_v35  ;;  %v114_v35 = vld [vmem:[%s10025_s2 + $0x300] sm:$0xff] }
 0x105   :  { %v6027_v49 = vpop.eup %6026  ;;  %3578 = vperm.xlu1 %5965, %v6011_v21   ;;  %6052 = vpow2.f32 %v5318_v39  ;;  %v1209_v21 = vpop.f32.mrf.mxu0  ;;  %v1715_v39 = vadd.f32 %v7694_v57, %v351_v24  ;;  %5783 = vmatprep.mubr.msk.f32.mxu0 %vm436_vm1, %v114_v35  ;;  %v216_v57 = vld [vmem:[%s10025_s2 + $0x630] sm:$0xff]  ;;  %v357_v24 = vld [vmem:[%s10026_s1 + $0x3e8] sm:$0xff] }
 0x106   :  { %v7687_v51 = vpop.eup %6028  ;;  %6054 = vpow2.f32 %v5219_v42  ;;  %5784 = vmatmul.mubr.msk.f32.gmra.mxu0 %vm436_vm1, %v115_v36  ;;  %5936 = vmatprep.mubr.msk.f32.mxu1 %vm436_vm1, %v216_v57 }
 0x107   :  { %v6031_v53 = vpop.eup %6030  ;;  %6056 = vpow2.f32 %v5218_v44  ;;  %v1710_v44 = vadd.f32 %v1709_v6, %v350_v28  ;;  %5937 = vmatmul.mubr.msk.f32.gmra.mxu1 %vm436_vm1, %v217_v58  ;;  %v221_v58 = vld [vmem:[%s10025_s2 + $0x658] sm:$0xff] }
 0x108   :  { %v6033_v55 = vpop.eup %6032  ;;  %v2759_v56 = vadd.f32 1.0, %v6031_v53  ;;  %3588 = vperm.xlu0 %5964, %v6019_v38   ;;  %6058 = vpow2.f32 %v5321_v47  ;;  %5939 = vmatprep.mubr.msk.f32.mxu1 %vm436_vm1, %v218_v33 }
 0x109   :  { %v6035_v59 = vpop.eup %6034  ;;  %v2758_v60 = vadd.f32 1.0, %v6033_v55  ;;  %3593 = vperm.xlu1 %5965, %v6015_v30   ;;  %6060 = vpow2.f32 %v5320_v50  ;;  %v5671_v30 = vpop.f32.mrf.mxu0  ;;  %v1210_v55 = vadd.f32 %v1209_v21, %v250_v40  ;;  %v5322_v2 = vmul.f32 -1.442695, %v1710_v44 }
 0x10a   :  { %v6037_v61 = vpop.eup %6036  ;;  %6062 = vrcp.f32 %v2759_v56  ;;  %v2861_v62 = vadd.f32 1.0, %v6035_v59  ;;  %v253_v56 = vld [vmem:[%s10026_s1 + $0xa8] sm:$0xff] }
 0x10b   :  { %v6039_v0 = vpop.eup %6038  ;;  %6064 = vrcp.f32 %v2758_v60  ;;  %v2860_v1 = vadd.f32 1.0, %v6037_v61  ;;  %v1219_v52 = vpop.f32.mrf.mxu0  ;;  %v5323_v60 = vmul.f32 -1.442695, %v1715_v39  ;;  %v1725_v61 = vadd.f32 %v7712_v12, %v353_v45  ;;  %v118_v45 = vld [vmem:[%s10025_s2 + $0x320] sm:$0xff] }
 0x10c   :  { %v6041_v4 = vpop.eup %6040  ;;  %6066 = vrcp.f32 %v2861_v62  ;;  %v2761_v5 = vadd.f32 1.0, %v6039_v0  ;;  %4098 = vperm.xlu0 %5964, %v6021_v41   ;;  %v5824_v41 = vpop.f32.mrf.mxu1  ;;  %v252_v62 = vld [vmem:[%s10026_s1 + $0xa0] sm:$0xff] }
 0x10d   :  { %v6043_v8 = vpop.eup %6042  ;;  %6068 = vrcp.f32 %v2860_v1  ;;  %v2760_v9 = vadd.f32 1.0, %v6041_v4  ;;  %4103 = vperm.xlu1 %5965, %v7668_v34   ;;  %v251_v34 = vld [vmem:[%s10026_s1 + $0x98] sm:$0xff]  ;;  %v5674_v0 = vpop.f32.mrf.mxu0  ;;  %v1220_v12 = vadd.f32 %v1219_v52, %v252_v62  ;;  %v5325_v16 = vmul.f32 -1.442695, %v1725_v61 }
 0x10e   :  { %v6045_v10 = vpop.eup %6044  ;;  %6070 = vrcp.f32 %v2761_v5  ;;  %v2863_v11 = vadd.f32 1.0, %v6043_v8  ;;  %v1215_v50 = vadd.f32 %v7707_v7, %v251_v34  ;;  %v1729_v63 = vpop.f32.mrf.mxu1  ;;  %v355_v4 = vld [vmem:[%s10026_s1 + $0x3d8] sm:$0xff]  ;;  %v1225_v7 = vadd.f32 %v5671_v30, %v253_v56  ;;  %v354_v8 = vld [vmem:[%s10026_s1 + $0x3d0] sm:$0xff] }
 0x10f   :  { %v6047_v13 = vpop.eup %6046  ;;  %6072 = vrcp.f32 %v2760_v9  ;;  %v2862_v14 = vadd.f32 1.0, %v6045_v10  ;;  %v1735_v17 = vadd.f32 %v5824_v41, %v355_v4 }
 0x110   :  { %v6049_v18 = vpop.eup %6048  ;;  %6074 = vrcp.f32 %v2863_v11  ;;  %v2763_v19 = vadd.f32 1.0, %v6047_v13  ;;  %3598 = vperm.xlu0 %5964, %v6027_v49   ;;  %v5221_v49 = vmul.f32 -1.442695, %v1205_v27  ;;  %v5223_v6 = vmul.f32 -1.442695, %v1215_v50  ;;  %v5827_v9 = vpop.f32.mrf.mxu1  ;;  %v255_v13 = vld [vmem:[%s10026_s1 + $0xb8] sm:$0xff] }
 0x111   :  { %v6051_v22 = vpop.eup %6050  ;;  %6076 = vrcp.f32 %v2862_v14  ;;  %v2762_v23 = vadd.f32 1.0, %v6049_v18  ;;  %3603 = vperm.xlu1 %5965, %v7675_v43   ;;  %v5222_v11 = vmul.f32 -1.442695, %v1210_v55  ;;  %v116_v14 = vld [vmem:[%s10025_s2 + $0x310] sm:$0xff]  ;;  %v1229_v18 = vpop.f32.mrf.mxu0  ;;  %v1235_v27 = vadd.f32 %v5674_v0, %v255_v13  ;;  %v257_v13 = vld [vmem:[%s10026_s1 + $0xc8] sm:$0xff] }
 0x112   :  { %v6053_v25 = vpop.eup %6052  ;;  %6078 = vrcp.f32 %v2763_v19  ;;  %v2865_v26 = vadd.f32 1.0, %v6051_v22  ;;  %v254_v19 = vld [vmem:[%s10026_s1 + $0xb0] sm:$0xff]  ;;  %5786 = vmatprep.mubr.msk.f32.mxu0 %vm436_vm1, %v116_v14  ;;  %v1739_v28 = vpop.f32.mrf.mxu1  ;;  %v5327_v35 = vmul.f32 -1.442695, %v1735_v17  ;;  %v1745_v36 = vadd.f32 %v5827_v9, %v357_v24 }
 0x113   :  { %v6055_v31 = vpop.eup %6054  ;;  %6080 = vrcp.f32 %v2762_v23  ;;  %v2864_v32 = vadd.f32 1.0, %v6053_v25  ;;  %v1730_v23 = vadd.f32 %v1729_v63, %v354_v8  ;;  %5787 = vmatmul.mubr.msk.f32.gmra.mxu0 %vm436_vm1, %v117_v20  ;;  %v359_v20 = vld [vmem:[%s10026_s1 + $0x3f8] sm:$0xff]  ;;  %v358_v24 = vld [vmem:[%s10026_s1 + $0x3f0] sm:$0xff] }
 0x114   :  { %v6057_v37 = vpop.eup %6056  ;;  %6082 = vrcp.f32 %v2865_v26  ;;  %v2765_v38 = vadd.f32 1.0, %v6055_v31  ;;  %4108 = vperm.xlu0 %5964, %v7687_v51   ;;  %v352_v51 = vld [vmem:[%s10026_s1 + $0x3c0] sm:$0xff]  ;;  %v5225_v26 = vmul.f32 -1.442695, %v1225_v7  ;;  %v5224_v31 = vmul.f32 -1.442695, %v1220_v12  ;;  %5789 = vmatprep.mubr.msk.f32.mxu0 %vm436_vm1, %v118_v45  ;;  %v5830_v57 = vpop.f32.mrf.mxu1 }
 0x115   :  { %v6059_v42 = vpop.eup %6058  ;;  %6084 = vrcp.f32 %v2864_v32  ;;  %v2764_v43 = vadd.f32 1.0, %v6057_v37  ;;  %4113 = vperm.xlu1 %5965, %v7680_v46   ;;  %v1720_v3 = vadd.f32 %v1719_v29, %v352_v51  ;;  %v356_v29 = vld [vmem:[%s10026_s1 + $0x3e0] sm:$0xff]  ;;  %v1230_v32 = vadd.f32 %v1229_v18, %v254_v19  ;;  %v219_v37 = vld [vmem:[%s10025_s2 + $0x648] sm:$0xff] }
 0x116   :  { %v6061_v47 = vpop.eup %6060  ;;  %6086 = vrcp.f32 %v2765_v38  ;;  %v2867_v48 = vadd.f32 1.0, %v6059_v42  ;;  %v5326_v39 = vmul.f32 -1.442695, %v1730_v23  ;;  %v1740_v40 = vadd.f32 %v1739_v28, %v356_v29  ;;  %5940 = vmatmul.mubr.msk.f32.gmra.mxu1 %vm436_vm1, %v219_v37  ;;  %v1749_v4 = vpop.f32.mrf.mxu1 }
 0x117   :  { %v6063_v53 = vpop.eup %6062  ;;  %6088 = vrcp.f32 %v2764_v43  ;;  %v2866_v46 = vadd.f32 1.0, %v6061_v47  ;;  %v5324_v22 = vmul.f32 -1.442695, %v1720_v3  ;;  %v5227_v42 = vmul.f32 -1.442695, %v1235_v27 }
 0x118   :  { %v6065_v59 = vpop.eup %6064  ;;  %6090 = vrcp.f32 %v2867_v48  ;;  %v5226_v44 = vmul.f32 -1.442695, %v1230_v32  ;;  %v5329_v48 = vmul.f32 -1.442695, %v1745_v36  ;;  %v5328_v51 = vmul.f32 -1.442695, %v1740_v40 }
 0x119   :  { %v6067_v1 = vpop.eup %6066  ;;  %6092 = vrcp.f32 %v2866_v46  ;;  %3613 = vperm.xlu1 %5965, %v6063_v53   ;;  %3608 = vperm.xlu0 %5964, %v6065_v59   ;;  %v5677_v53 = vpop.f32.mrf.mxu0  ;;  %v1755_v33 = vadd.f32 %v5830_v57, %v359_v20 }
 0x11a   :  { %v6069_v5 = vpop.eup %6068  ;;  %6094 = vpow2.f32 %v5221_v49  ;;  %v119_v49 = vld [vmem:[%s10025_s2 + $0x328] sm:$0xff]  ;;  %v1245_v23 = vadd.f32 %v5677_v53, %v257_v13 }
 0x11b   :  { %v6071_v10 = vpop.eup %6070  ;;  %6096 = vpow2.f32 %v5220_v54  ;;  %5790 = vmatmul.mubr.msk.f32.gmra.mxu0 %vm436_vm1, %v119_v49  ;;  %v220_v54 = vld [vmem:[%s10025_s2 + $0x650] sm:$0xff]  ;;  %v1239_v63 = vpop.f32.mrf.mxu0  ;;  %v5331_v53 = vmul.f32 -1.442695, %v1755_v33 }
 0x11c   :  { %v6073_v15 = vpop.eup %6072  ;;  %6098 = vpow2.f32 %v5323_v60  ;;  %5942 = vmatprep.mubr.msk.f32.mxu1 %vm436_vm1, %v220_v54  ;;  %v260_v54 = vld [vmem:[%s10026_s1 + $0xe0] sm:$0xff] }
 0x11d   :  { %v6075_v21 = vpop.eup %6074  ;;  %6100 = vpow2.f32 %v5322_v2  ;;  %4123 = vperm.xlu1 %5965, %v6067_v1   ;;  %4118 = vperm.xlu0 %5964, %v6069_v5   ;;  %v5680_v5 = vpop.f32.mrf.mxu0 }
 0x11e   :  { %v6077_v25 = vpop.eup %6076  ;;  %6102 = vpow2.f32 %v5223_v6  ;;  %5943 = vmatmul.mubr.msk.f32.gmra.mxu1 %vm436_vm1, %v221_v58 }
 0x11f   :  { %v6079_v30 = vpop.eup %6078  ;;  %6104 = vpow2.f32 %v5222_v11  ;;  %v1249_v17 = vpop.f32.mrf.mxu0 }
 0x120   :  { %v6081_v34 = vpop.eup %6080  ;;  %6106 = vpow2.f32 %v5325_v16  ;;  %v256_v16 = vld [vmem:[%s10026_s1 + $0xc0] sm:$0xff] }
 0x121   :  { %v6083_v38 = vpop.eup %6082  ;;  %6108 = vpow2.f32 %v5324_v22  ;;  %3623 = vperm.xlu1 %5965, %v6071_v10   ;;  %3618 = vperm.xlu0 %5964, %v6073_v15   ;;  %v5833_v10 = vpop.f32.mrf.mxu1  ;;  %v1240_v29 = vadd.f32 %v1239_v63, %v256_v16 }
 0x122   :  { %v6085_v41 = vpop.eup %6084  ;;  %6110 = vpow2.f32 %v5225_v26  ;;  %v5683_v26 = vpop.f32.mrf.mxu0 }
 0x123   :  { %v7809_v43 = vpop.eup %6086  ;;  %6112 = vpow2.f32 %v5224_v31  ;;  %v5228_v49 = vmul.f32 -1.442695, %v1240_v29 }
 0x124   :  { %v6089_v47 = vpop.eup %6088  ;;  %6114 = vpow2.f32 %v5327_v35  ;;  %v1259_v45 = vpop.f32.mrf.mxu0 }
 0x125   :  { %v7818_v50 = vpop.eup %6090  ;;  %4133 = vperm.xlu1 %5965, %v6075_v21   ;;  %4128 = vperm.xlu0 %5964, %v6077_v25   ;;  %6116 = vpow2.f32 %v5326_v39  ;;  %v1759_v25 = vpop.f32.mrf.mxu1  ;;  %v361_v39 = vld [vmem:[%s10026_s1 + $0x408] sm:$0xff] }
 0x126   :  { %v7820_v52 = vpop.eup %6092  ;;  %6118 = vpow2.f32 %v5227_v42  ;;  %v5229_v42 = vmul.f32 -1.442695, %v1245_v23 }
 0x127   :  { %v6095_v46 = vpop.eup %6094  ;;  %6120 = vpow2.f32 %v5226_v44  ;;  %v5836_v35 = vpop.f32.mrf.mxu1  ;;  %v360_v44 = vld [vmem:[%s10026_s1 + $0x400] sm:$0xff] }
 0x128   :  { %v6097_v55 = vpop.eup %6096  ;;  %v2767_v56 = vadd.f32 1.0, %v6095_v46  ;;  %6122 = vpow2.f32 %v5329_v48  ;;  %v1765_v46 = vadd.f32 %v5833_v10, %v361_v39  ;;  %v262_v10 = vld [vmem:[%s10026_s1 + $0xf0] sm:$0xff] }
 0x129   :  { %v6099_v59 = vpop.eup %6098  ;;  %v2766_v60 = vadd.f32 1.0, %v6097_v55  ;;  %3633 = vperm.xlu1 %5965, %v6079_v30   ;;  %3628 = vperm.xlu0 %5964, %v6081_v34   ;;  %6124 = vpow2.f32 %v5328_v51  ;;  %v259_v30 = vld [vmem:[%s10026_s1 + $0xd8] sm:$0xff]  ;;  %v258_v34 = vld [vmem:[%s10026_s1 + $0xd0] sm:$0xff]  ;;  %v261_v51 = vld [vmem:[%s10026_s1 + $0xe8] sm:$0xff]  ;;  %v1769_v55 = vpop.f32.mrf.mxu1 }
 0x12a   :  { %v6101_v61 = vpop.eup %6100  ;;  %6126 = vrcp.f32 %v2767_v56  ;;  %v2869_v62 = vadd.f32 1.0, %v6099_v59  ;;  %v5686_v56 = vpop.f32.mrf.mxu0  ;;  %v1760_v59 = vadd.f32 %v1759_v25, %v360_v44  ;;  %v1265_v63 = vadd.f32 %v5683_v26, %v261_v51 }
 0x12b   :  { %v6103_v0 = vpop.eup %6102  ;;  %6128 = vrcp.f32 %v2766_v60  ;;  %v2868_v1 = vadd.f32 1.0, %v6101_v61  ;;  %v363_v60 = vld [vmem:[%s10026_s1 + $0x418] sm:$0xff] }
 0x12c   :  { %v6105_v2 = vpop.eup %6104  ;;  %6130 = vrcp.f32 %v2869_v62  ;;  %v2769_v3 = vadd.f32 1.0, %v6103_v0  ;;  %v362_v0 = vld [vmem:[%s10026_s1 + $0x410] sm:$0xff]  ;;  %v5233_v16 = vmul.f32 -1.442695, %v1265_v63 }
 0x12d   :  { %v6107_v6 = vpop.eup %6106  ;;  %6132 = vrcp.f32 %v2868_v1  ;;  %v2768_v7 = vadd.f32 1.0, %v6105_v2  ;;  %4143 = vperm.xlu1 %5965, %v6083_v38   ;;  %4138 = vperm.xlu0 %5964, %v6085_v41   ;;  %v1750_v38 = vadd.f32 %v1749_v4, %v358_v24  ;;  %v5839_v1 = vpop.f32.mrf.mxu1  ;;  %v1260_v4 = vadd.f32 %v1259_v45, %v260_v54 }
 0x12e   :  { %v6109_v8 = vpop.eup %6108  ;;  %6134 = vrcp.f32 %v2769_v3  ;;  %v2871_v9 = vadd.f32 1.0, %v6107_v6  ;;  %v1770_v13 = vadd.f32 %v1769_v55, %v362_v0  ;;  %v264_v0 = vld [vmem:[%s10026_s1 + $0x100] sm:$0xff] }
 0x12f   :  { %v6111_v11 = vpop.eup %6110  ;;  %6136 = vrcp.f32 %v2768_v7  ;;  %v2870_v12 = vadd.f32 1.0, %v6109_v8  ;;  %v5330_v58 = vmul.f32 -1.442695, %v1750_v38  ;;  %v5333_v7 = vmul.f32 -1.442695, %v1765_v46 }
 0x130   :  { %v6113_v14 = vpop.eup %6112  ;;  %6138 = vrcp.f32 %v2871_v9  ;;  %v2771_v15 = vadd.f32 1.0, %v6111_v11  ;;  %v1775_v8 = vadd.f32 %v5836_v35, %v363_v60  ;;  %v1269_v9 = vpop.f32.mrf.mxu0 }
 0x131   :  { %v6115_v18 = vpop.eup %6114  ;;  %6140 = vrcp.f32 %v2870_v12  ;;  %v2770_v19 = vadd.f32 1.0, %v6113_v14  ;;  %3643 = vperm.xlu1 %5965, %v7809_v43   ;;  %3638 = vperm.xlu0 %5964, %v6089_v47   ;;  %v1255_v43 = vadd.f32 %v5680_v5, %v259_v30  ;;  %v263_v5 = vld [vmem:[%s10026_s1 + $0xf8] sm:$0xff]  ;;  %v5332_v12 = vmul.f32 -1.442695, %v1760_v59  ;;  %v365_v14 = vld [vmem:[%s10026_s1 + $0x428] sm:$0xff] }
 0x132   :  { %v6117_v21 = vpop.eup %6116  ;;  %6142 = vrcp.f32 %v2771_v15  ;;  %v2873_v22 = vadd.f32 1.0, %v6115_v18  ;;  %v1779_v18 = vpop.f32.mrf.mxu1  ;;  %v5335_v24 = vmul.f32 -1.442695, %v1775_v8  ;;  %v1785_v25 = vadd.f32 %v5839_v1, %v365_v14  ;;  %v366_v8 = vld [vmem:[%s10026_s1 + $0x430] sm:$0xff]  ;;  %v267_v14 = vld [vmem:[%s10026_s1 + $0x118] sm:$0xff] }
 0x133   :  { %v6119_v27 = vpop.eup %6118  ;;  %6144 = vrcp.f32 %v2770_v19  ;;  %v2872_v28 = vadd.f32 1.0, %v6117_v21  ;;  %v5231_v62 = vmul.f32 -1.442695, %v1255_v43  ;;  %v364_v19 = vld [vmem:[%s10026_s1 + $0x420] sm:$0xff]  ;;  %v5232_v21 = vmul.f32 -1.442695, %v1260_v4  ;;  %v5689_v38 = vpop.f32.mrf.mxu0 }
 0x134   :  { %v6121_v31 = vpop.eup %6120  ;;  %6146 = vrcp.f32 %v2873_v22  ;;  %v2773_v32 = vadd.f32 1.0, %v6119_v27  ;;  %v1270_v22 = vadd.f32 %v1269_v9, %v262_v10  ;;  %v5334_v27 = vmul.f32 -1.442695, %v1770_v13  ;;  %v367_v4 = vld [vmem:[%s10026_s1 + $0x438] sm:$0xff] }
 0x135   :  { %v6123_v36 = vpop.eup %6122  ;;  %6148 = vrcp.f32 %v2872_v28  ;;  %v2772_v37 = vadd.f32 1.0, %v6121_v31  ;;  %4153 = vperm.xlu1 %5965, %v7818_v50   ;;  %4148 = vperm.xlu0 %5964, %v7820_v52   ;;  %v1250_v50 = vadd.f32 %v1249_v17, %v258_v34  ;;  %v1275_v17 = vadd.f32 %v5686_v56, %v263_v5 }
 0x136   :  { %v6125_v40 = vpop.eup %6124  ;;  %6150 = vrcp.f32 %v2773_v32  ;;  %v2875_v41 = vadd.f32 1.0, %v6123_v36  ;;  %v1780_v28 = vadd.f32 %v1779_v18, %v364_v19  ;;  %v5234_v32 = vmul.f32 -1.442695, %v1270_v22  ;;  %v266_v18 = vld [vmem:[%s10026_s1 + $0x110] sm:$0xff] }
 0x137   :  { %v6127_v47 = vpop.eup %6126  ;;  %6152 = vrcp.f32 %v2772_v37  ;;  %v2874_v48 = vadd.f32 1.0, %v6125_v40  ;;  %v5230_v3 = vmul.f32 -1.442695, %v1250_v50  ;;  %v5235_v30 = vmul.f32 -1.442695, %v1275_v17 }
 0x138   :  { %v6129_v52 = vpop.eup %6128  ;;  %6154 = vrcp.f32 %v2875_v41  ;;  %v5337_v34 = vmul.f32 -1.442695, %v1785_v25  ;;  %v5336_v36 = vmul.f32 -1.442695, %v1780_v28  ;;  %v368_v28 = vld [vmem:[%s10026_s1 + $0x440] sm:$0xff] }
 0x139   :  { %v6131_v57 = vpop.eup %6130  ;;  %6156 = vrcp.f32 %v2874_v48  ;;  %3653 = vperm.xlu1 %5965, %v6127_v47   ;;  %3648 = vperm.xlu0 %5964, %v6129_v52   ;;  %v1279_v48 = vpop.f32.mrf.mxu0 }
 0x13a   :  { %v6133_v61 = vpop.eup %6132  ;;  %6158 = vpow2.f32 %v5229_v42  ;;  %v5842_v42 = vpop.f32.mrf.mxu1  ;;  %v1280_v13 = vadd.f32 %v1279_v48, %v264_v0 }
 0x13b   :  { %v6135_v2 = vpop.eup %6134  ;;  %6160 = vpow2.f32 %v5228_v49  ;;  %v5692_v46 = vpop.f32.mrf.mxu0  ;;  %v1795_v17 = vadd.f32 %v5842_v42, %v367_v4 }
 0x13c   :  { %v6137_v6 = vpop.eup %6136  ;;  %6162 = vpow2.f32 %v5331_v53  ;;  %v1789_v53 = vpop.f32.mrf.mxu1 }
 0x13d   :  { %v6139_v11 = vpop.eup %6138  ;;  %6164 = vpow2.f32 %v5330_v58  ;;  %4163 = vperm.xlu1 %5965, %v6131_v57   ;;  %4158 = vperm.xlu0 %5964, %v6133_v61   ;;  %v265_v61 = vld [vmem:[%s10026_s1 + $0x108] sm:$0xff]  ;;  %v1289_v1 = vpop.f32.mrf.mxu0  ;;  %v1790_v22 = vadd.f32 %v1789_v53, %v366_v8 }
 0x13e   :  { %v6141_v15 = vpop.eup %6140  ;;  %6166 = vpow2.f32 %v5231_v62  ;;  %v5845_v58 = vpop.f32.mrf.mxu1 }
 0x13f   :  { %v6143_v20 = vpop.eup %6142  ;;  %6168 = vpow2.f32 %v5230_v3  ;;  %v5695_v10 = vpop.f32.mrf.mxu0  ;;  %v5338_v42 = vmul.f32 -1.442695, %v1790_v22 }
 0x140   :  { %v6145_v23 = vpop.eup %6144  ;;  %6170 = vpow2.f32 %v5333_v7  ;;  %v1285_v7 = vadd.f32 %v5689_v38, %v265_v61  ;;  %v1799_v9 = vpop.f32.mrf.mxu1  ;;  %v268_v38 = vld [vmem:[%s10026_s1 + $0x120] sm:$0xff] }
 0x141   :  { %v6147_v26 = vpop.eup %6146  ;;  %6172 = vpow2.f32 %v5332_v12  ;;  %3663 = vperm.xlu1 %5965, %v6135_v2   ;;  %3658 = vperm.xlu0 %5964, %v6137_v6  }
 0x142   :  { %v6149_v29 = vpop.eup %6148  ;;  %6174 = vpow2.f32 %v5233_v16  ;;  %v5848_v19 = vpop.f32.mrf.mxu1 }
 0x143   :  { %v6151_v31 = vpop.eup %6150  ;;  %6176 = vpow2.f32 %v5232_v21 }
 0x144   :  { %v6153_v33 = vpop.eup %6152  ;;  %6178 = vpow2.f32 %v5335_v24 }
 0x145   :  { %v7882_v35 = vpop.eup %6154  ;;  %4173 = vperm.xlu1 %5965, %v6139_v11   ;;  %4168 = vperm.xlu0 %5964, %v6141_v15   ;;  %6180 = vpow2.f32 %v5334_v27  ;;  %v1295_v27 = vadd.f32 %v5692_v46, %v267_v14  ;;  %v271_v46 = vld [vmem:[%s10026_s1 + $0x138] sm:$0xff] }
 0x146   :  { %v7884_v37 = vpop.eup %6156  ;;  %6182 = vpow2.f32 %v5235_v30 }
 0x147   :  { %v6159_v39 = vpop.eup %6158  ;;  %6184 = vpow2.f32 %v5234_v32  ;;  %v5236_v32 = vmul.f32 -1.442695, %v1280_v13 }
 0x148   :  { %v6161_v40 = vpop.eup %6160  ;;  %v2775_v41 = vadd.f32 1.0, %v6159_v39  ;;  %6186 = vpow2.f32 %v5337_v34  ;;  %v269_v34 = vld [vmem:[%s10026_s1 + $0x128] sm:$0xff]  ;;  %v1809_v39 = vpop.f32.mrf.mxu1 }
 0x149   :  { %v6163_v43 = vpop.eup %6162  ;;  %v2774_v44 = vadd.f32 1.0, %v6161_v40  ;;  %3673 = vperm.xlu1 %5965, %v6143_v20   ;;  %3668 = vperm.xlu0 %5964, %v6145_v23   ;;  %6188 = vpow2.f32 %v5336_v36  ;;  %v369_v23 = vld [vmem:[%s10026_s1 + $0x448] sm:$0xff]  ;;  %v5339_v36 = vmul.f32 -1.442695, %v1795_v17  ;;  %v1305_v48 = vadd.f32 %v5695_v10, %v269_v34 }
 0x14a   :  { %v6165_v45 = vpop.eup %6164  ;;  %6190 = vrcp.f32 %v2775_v41  ;;  %v2877_v47 = vadd.f32 1.0, %v6163_v43  ;;  %v1800_v43 = vadd.f32 %v1799_v9, %v368_v28 }
 0x14b   :  { %v6167_v49 = vpop.eup %6166  ;;  %6192 = vrcp.f32 %v2774_v44  ;;  %v2876_v50 = vadd.f32 1.0, %v6165_v45  ;;  %v371_v44 = vld [vmem:[%s10026_s1 + $0x458] sm:$0xff]  ;;  %v5241_v0 = vmul.f32 -1.442695, %v1305_v48 }
 0x14c   :  { %v6169_v51 = vpop.eup %6168  ;;  %6194 = vrcp.f32 %v2877_v47  ;;  %v2777_v52 = vadd.f32 1.0, %v6167_v49  ;;  %v5239_v47 = vmul.f32 -1.442695, %v1295_v27  ;;  %v370_v49 = vld [vmem:[%s10026_s1 + $0x450] sm:$0xff] }
 0x14d   :  { %v6171_v54 = vpop.eup %6170  ;;  %6196 = vrcp.f32 %v2876_v50  ;;  %v2776_v55 = vadd.f32 1.0, %v6169_v51  ;;  %4183 = vperm.xlu1 %5965, %v6147_v26   ;;  %4178 = vperm.xlu0 %5964, %v6149_v29   ;;  %v5237_v26 = vmul.f32 -1.442695, %v1285_v7  ;;  %v1299_v29 = vpop.f32.mrf.mxu0  ;;  %v1810_v61 = vadd.f32 %v1809_v39, %v370_v49  ;;  %v272_v49 = vld [vmem:[%s10026_s1 + $0x140] sm:$0xff] }
 0x14e   :  { %v6173_v56 = vpop.eup %6172  ;;  %6198 = vrcp.f32 %v2777_v52  ;;  %v2879_v57 = vadd.f32 1.0, %v6171_v54  ;;  %v5851_v50 = vpop.f32.mrf.mxu1  ;;  %v1300_v53 = vadd.f32 %v1299_v29, %v268_v38 }
 0x14f   :  { %v6175_v59 = vpop.eup %6174  ;;  %6200 = vrcp.f32 %v2776_v55  ;;  %v2878_v60 = vadd.f32 1.0, %v6173_v56  ;;  %v5698_v40 = vpop.f32.mrf.mxu0  ;;  %v1815_v56 = vadd.f32 %v5848_v19, %v371_v44 }
 0x150   :  { %v6177_v62 = vpop.eup %6176  ;;  %6202 = vrcp.f32 %v2879_v57  ;;  %v2779_v63 = vadd.f32 1.0, %v6175_v59 }
 0x151   :  { %v6179_v2 = vpop.eup %6178  ;;  %6204 = vrcp.f32 %v2878_v60  ;;  %v2778_v3 = vadd.f32 1.0, %v6177_v62  ;;  %3683 = vperm.xlu1 %5965, %v6151_v31   ;;  %3678 = vperm.xlu0 %5964, %v6153_v33   ;;  %v1290_v33 = vadd.f32 %v1289_v1, %v266_v18  ;;  %v1309_v57 = vpop.f32.mrf.mxu0  ;;  %v5340_v60 = vmul.f32 -1.442695, %v1800_v43  ;;  %v373_v62 = vld [vmem:[%s10026_s1 + $0x468] sm:$0xff] }
 0x152   :  { %v6181_v5 = vpop.eup %6180  ;;  %6206 = vrcp.f32 %v2779_v63  ;;  %v2881_v6 = vadd.f32 1.0, %v6179_v2  ;;  %v1315_v1 = vadd.f32 %v5698_v40, %v271_v46  ;;  %v1819_v2 = vpop.f32.mrf.mxu1  ;;  %v5343_v8 = vmul.f32 -1.442695, %v1815_v56  ;;  %v375_v46 = vld [vmem:[%s10026_s1 + $0x478] sm:$0xff] }
 0x153   :  { %v6183_v11 = vpop.eup %6182  ;;  %6208 = vrcp.f32 %v2778_v3  ;;  %v2880_v12 = vadd.f32 1.0, %v6181_v5  ;;  %v5238_v52 = vmul.f32 -1.442695, %v1290_v33  ;;  %v372_v3 = vld [vmem:[%s10026_s1 + $0x460] sm:$0xff]  ;;  %v5240_v5 = vmul.f32 -1.442695, %v1300_v53  ;;  %v5701_v22 = vpop.f32.mrf.mxu0 }
 0x154   :  { %v6185_v15 = vpop.eup %6184  ;;  %6210 = vrcp.f32 %v2881_v6  ;;  %v2781_v16 = vadd.f32 1.0, %v6183_v11  ;;  %v1825_v9 = vadd.f32 %v5851_v50, %v373_v62  ;;  %v5342_v11 = vmul.f32 -1.442695, %v1810_v61  ;;  %v3363_v53 = vld [vmem:[%s10027_s3 + $0x8] sm:$0xff] }
 0x155   :  { %v6187_v20 = vpop.eup %6186  ;;  %6212 = vrcp.f32 %v2880_v12  ;;  %v2780_v21 = vadd.f32 1.0, %v6185_v15  ;;  %4193 = vperm.xlu1 %5965, %v7882_v35   ;;  %4188 = vperm.xlu0 %5964, %v7884_v37   ;;  %v1805_v37 = vadd.f32 %v5845_v58, %v369_v23  ;;  %v270_v58 = vld [vmem:[%s10026_s1 + $0x130] sm:$0xff]  ;;  %v1820_v12 = vadd.f32 %v1819_v2, %v372_v3 }
 0x156   :  { %v6189_v24 = vpop.eup %6188  ;;  %6214 = vrcp.f32 %v2781_v16  ;;  %v2883_v25 = vadd.f32 1.0, %v6187_v20  ;;  %v1310_v6 = vadd.f32 %v1309_v57, %v270_v58  ;;  %v5243_v14 = vmul.f32 -1.442695, %v1315_v1  ;;  %v3465_v58 = vld [vmem:[%s10027_s3 + $0x338] sm:$0xff] }
 0x157   :  { %v6191_v30 = vpop.eup %6190  ;;  %6216 = vrcp.f32 %v2780_v21  ;;  %v2882_v31 = vadd.f32 1.0, %v6189_v24  ;;  %v5341_v55 = vmul.f32 -1.442695, %v1805_v37  ;;  %v5345_v18 = vmul.f32 -1.442695, %v1825_v9  ;;  %v7940_v24 = vpop.f32.mrf.mxu1  ;;  %v275_v1 = vld [vmem:[%s10026_s1 + $0x158] sm:$0xff] }
 0x158   :  { %v6193_v35 = vpop.eup %6192  ;;  %6218 = vrcp.f32 %v2883_v25  ;;  %v5242_v16 = vmul.f32 -1.442695, %v1310_v6  ;;  %v5344_v20 = vmul.f32 -1.442695, %v1820_v12 }
 0x159   :  { %v6195_v41 = vpop.eup %6194  ;;  %6220 = vrcp.f32 %v2882_v31  ;;  %3693 = vperm.xlu1 %5965, %v6191_v30   ;;  %3688 = vperm.xlu0 %5964, %v6193_v35   ;;  %v1319_v31 = vpop.f32.mrf.mxu0 }
 0x15a   :  { %v6197_v45 = vpop.eup %6196  ;;  %6222 = vpow2.f32 %v5237_v26  ;;  %v1829_v34 = vpop.f32.mrf.mxu1 }
 0x15b   :  { %v6199_v51 = vpop.eup %6198  ;;  %6224 = vpow2.f32 %v5236_v32  ;;  %v7942_v37 = vpop.f32.mrf.mxu0 }
 0x15c   :  { %v6201_v54 = vpop.eup %6200  ;;  %6226 = vpow2.f32 %v5339_v36  ;;  %v7944_v40 = vpop.f32.mrf.mxu1 }
 0x15d   :  { %v6203_v59 = vpop.eup %6202  ;;  %6228 = vpow2.f32 %v5338_v42  ;;  %4203 = vperm.xlu1 %5965, %v6195_v41   ;;  %4198 = vperm.xlu0 %5964, %v6197_v45   ;;  %v273_v45 = vld [vmem:[%s10026_s1 + $0x148] sm:$0xff]  ;;  %v1329_v50 = vpop.f32.mrf.mxu0 }
 0x15e   :  { %v6205_v63 = vpop.eup %6204  ;;  %6230 = vpow2.f32 %v5239_v47  ;;  %v1325_v57 = vadd.f32 %v5701_v22, %v273_v45 }
 0x15f   :  { %v6207_v4 = vpop.eup %6206  ;;  %6232 = vpow2.f32 %v5238_v52 }
 0x160   :  { %v6209_v7 = vpop.eup %6208  ;;  %6234 = vpow2.f32 %v5341_v55 }
 0x161   :  { %v6211_v10 = vpop.eup %6210  ;;  %6236 = vpow2.f32 %v5340_v60  ;;  %3703 = vperm.xlu1 %5965, %v6199_v51   ;;  %3698 = vperm.xlu0 %5964, %v6201_v54   ;;  %v7958_v54 = vpop.f32.mrf.mxu1 }
 0x162   :  { %v6213_v13 = vpop.eup %6212  ;;  %6238 = vpow2.f32 %v5241_v0  ;;  %v7966_v60 = vpop.f32.mrf.mxu0  ;;  %v1320_v0 = vadd.f32 %v1319_v31, %v272_v49 }
 0x163   :  { %v6215_v15 = vpop.eup %6214  ;;  %6240 = vpow2.f32 %v5240_v5  ;;  %v7971_v2 = vpop.f32.mrf.mxu1 }
 0x164   :  { %v6217_v17 = vpop.eup %6216  ;;  %6242 = vpow2.f32 %v5343_v8  ;;  %v274_v8 = vld [vmem:[%s10026_s1 + $0x150] sm:$0xff] }
 0x165   :  { %v7936_v19 = vpop.eup %6218  ;;  %4213 = vperm.xlu1 %5965, %v6203_v59   ;;  %4208 = vperm.xlu0 %5964, %v6205_v63   ;;  %6244 = vpow2.f32 %v5342_v11  ;;  %v374_v59 = vld [vmem:[%s10026_s1 + $0x470] sm:$0xff] }
 0x166   :  { %v7938_v21 = vpop.eup %6220  ;;  %6246 = vpow2.f32 %v5243_v14  ;;  %v1830_v12 = vadd.f32 %v1829_v34, %v374_v59  ;;  %v377_v14 = vld [vmem:[%s10026_s1 + $0x488] sm:$0xff]  ;;  %v276_v34 = vld [vmem:[%s10026_s1 + $0x160] sm:$0xff]  ;;  %v278_v59 = vld [vmem:[%s10026_s1 + $0x170] sm:$0xff] }
 0x167   :  { %v6223_v23 = vpop.eup %6222  ;;  %6248 = vpow2.f32 %v5242_v16 }
 0x168   :  { %v6225_v25 = vpop.eup %6224  ;;  %v2783_v26 = vadd.f32 1.0, %v6223_v23  ;;  %6250 = vpow2.f32 %v5345_v18  ;;  %v3365_v18 = vld [vmem:[%s10027_s3 + $0x18] sm:$0xff] }
 0x169   :  { %v6227_v27 = vpop.eup %6226  ;;  %v2782_v28 = vadd.f32 1.0, %v6225_v25  ;;  %3713 = vperm.xlu1 %5965, %v6207_v4   ;;  %3708 = vperm.xlu0 %5964, %v6209_v7   ;;  %6252 = vpow2.f32 %v5344_v20  ;;  %v1835_v7 = vadd.f32 %v7940_v24, %v375_v46  ;;  %v376_v20 = vld [vmem:[%s10026_s1 + $0x480] sm:$0xff]  ;;  %v5244_v24 = vmul.f32 -1.442695, %v1320_v0 }
 0x16a   :  { %v6229_v29 = vpop.eup %6228  ;;  %6254 = vrcp.f32 %v2783_v26  ;;  %v2885_v30 = vadd.f32 1.0, %v6227_v27  ;;  %v1330_v26 = vadd.f32 %v1329_v50, %v274_v8  ;;  %v277_v27 = vld [vmem:[%s10026_s1 + $0x168] sm:$0xff] }
 0x16b   :  { %v6231_v32 = vpop.eup %6230  ;;  %6256 = vrcp.f32 %v2782_v28  ;;  %v2884_v33 = vadd.f32 1.0, %v6229_v29  ;;  %v1849_v28 = vpop.f32.mrf.mxu1  ;;  %v1345_v45 = vadd.f32 %v7966_v60, %v277_v27 }
 0x16c   :  { %v6233_v35 = vpop.eup %6232  ;;  %6258 = vrcp.f32 %v2885_v30  ;;  %v2785_v36 = vadd.f32 1.0, %v6231_v32  ;;  %v5347_v30 = vmul.f32 -1.442695, %v1835_v7  ;;  %v5246_v50 = vmul.f32 -1.442695, %v1330_v26  ;;  %v380_v7 = vld [vmem:[%s10026_s1 + $0x4a0] sm:$0xff] }
 0x16d   :  { %v6235_v38 = vpop.eup %6234  ;;  %6260 = vrcp.f32 %v2884_v33  ;;  %v2784_v39 = vadd.f32 1.0, %v6233_v35  ;;  %4223 = vperm.xlu1 %5965, %v6211_v10   ;;  %4218 = vperm.xlu0 %5964, %v6213_v13   ;;  %v3362_v13 = vld [vmem:[%s10027_s3] sm:$0xff]  ;;  %v1845_v33 = vadd.f32 %v7944_v40, %v377_v14  ;;  %v379_v40 = vld [vmem:[%s10026_s1 + $0x498] sm:$0xff] }
 0x16e   :  { %v6237_v41 = vpop.eup %6236  ;;  %6262 = vrcp.f32 %v2785_v36  ;;  %v2887_v42 = vadd.f32 1.0, %v6235_v38 }
 0x16f   :  { %v6239_v43 = vpop.eup %6238  ;;  %6264 = vrcp.f32 %v2784_v39  ;;  %v2886_v44 = vadd.f32 1.0, %v6237_v41  ;;  %v3464_v39 = vld [vmem:[%s10027_s3 + $0x330] sm:$0xff]  ;;  %v1840_v41 = vadd.f32 %v7958_v54, %v376_v20 }
 0x170   :  { %v6241_v47 = vpop.eup %6240  ;;  %6266 = vrcp.f32 %v2887_v42  ;;  %v2787_v48 = vadd.f32 1.0, %v6239_v43 }
 0x171   :  { %v6243_v51 = vpop.eup %6242  ;;  %6268 = vrcp.f32 %v2886_v44  ;;  %v2786_v52 = vadd.f32 1.0, %v6241_v47  ;;  %3723 = vperm.xlu1 %5965, %v6215_v15   ;;  %3718 = vperm.xlu0 %5964, %v6217_v17   ;;  %v5245_v17 = vmul.f32 -1.442695, %v1325_v57  ;;  %v3467_v44 = vld [vmem:[%s10027_s3 + $0x348] sm:$0xff]  ;;  %v378_v47 = vld [vmem:[%s10026_s1 + $0x490] sm:$0xff]  ;;  %v1855_v57 = vadd.f32 %v7971_v2, %v379_v40 }
 0x172   :  { %v6245_v55 = vpop.eup %6244  ;;  %6270 = vrcp.f32 %v2787_v48  ;;  %v2889_v56 = vadd.f32 1.0, %v6243_v51  ;;  %v5863_v48 = vpop.f32.mrf.mxu1  ;;  %v1850_v0 = vadd.f32 %v1849_v28, %v378_v47 }
 0x173   :  { %v6247_v61 = vpop.eup %6246  ;;  %6272 = vrcp.f32 %v2786_v52  ;;  %v2888_v62 = vadd.f32 1.0, %v6245_v55  ;;  %v3574_v63 = vpop.permute.xlu0 %3573 }
 0x174   :  { %v6249_v3 = vpop.eup %6248  ;;  %6274 = vrcp.f32 %v2889_v56  ;;  %v2789_v4 = vadd.f32 1.0, %v6247_v61  ;;  %v4084_v5 = vpop.permute.xlu1 %4083  ;;  %v4587_v6 = vmul.f32 %v3574_v63, %v3363_v53  ;;  %v279_v53 = vld [vmem:[%s10026_s1 + $0x178] sm:$0xff]  ;;  %v5349_v56 = vmul.f32 -1.442695, %v1845_v33  ;;  %v3466_v63 = vld [vmem:[%s10027_s3 + $0x340] sm:$0xff] }
 0x175   :  { %v6251_v9 = vpop.eup %6250  ;;  %6276 = vrcp.f32 %v2888_v62  ;;  %v2788_v10 = vadd.f32 1.0, %v6249_v3  ;;  %v4689_v11 = vmul.f32 %v4084_v5, %v3465_v58  ;;  %4233 = vperm.xlu1 %5965, %v7936_v19   ;;  %4228 = vperm.xlu0 %5964, %v7938_v21   ;;  %v1335_v19 = vadd.f32 %v7942_v37, %v275_v1  ;;  %v1339_v21 = vpop.f32.mrf.mxu0  ;;  %v381_v1 = vld [vmem:[%s10026_s1 + $0x4a8] sm:$0xff]  ;;  %v3364_v3 = vld [vmem:[%s10027_s3 + $0x10] sm:$0xff] }
 0x176   :  { %v6253_v15 = vpop.eup %6252  ;;  %6278 = vrcp.f32 %v2789_v4  ;;  %v2891_v16 = vadd.f32 1.0, %v6251_v9  ;;  %4792 = vst.msk [vmem:[%s10028_s4 + $0x8] sm:$0xff] %vm4790_vm2, %v4587_v6  ;;  %v5346_v37 = vmul.f32 -1.442695, %v1830_v12  ;;  %v1340_v52 = vadd.f32 %v1339_v21, %v276_v34  ;;  %v1859_v6 = vpop.f32.mrf.mxu1  ;;  %v3468_v34 = vld [vmem:[%s10027_s3 + $0x350] sm:$0xff] }
 0x177   :  { %v6255_v22 = vpop.eup %6254  ;;  %6280 = vrcp.f32 %v2788_v10  ;;  %v2890_v23 = vadd.f32 1.0, %v6253_v15  ;;  %4894 = vst.msk [vmem:[%s10028_s4 + $0x338] sm:$0xff] %vm4790_vm2, %v4689_v11  ;;  %v3569_v25 = vpop.permute.xlu0 %3568  ;;  %v5247_v43 = vmul.f32 -1.442695, %v1335_v19  ;;  %v5348_v62 = vmul.f32 -1.442695, %v1840_v41 }
 0x178   :  { %v6257_v29 = vpop.eup %6256  ;;  %6282 = vrcp.f32 %v2891_v16  ;;  %v3584_v31 = vpop.permute.xlu1 %3583  ;;  %v4586_v32 = vmul.f32 %v3569_v25, %v3362_v13  ;;  %v5249_v4 = vmul.f32 -1.442695, %v1345_v45  ;;  %v5248_v10 = vmul.f32 -1.442695, %v1340_v52  ;;  %v3366_v19 = vld [vmem:[%s10027_s3 + $0x20] sm:$0xff] }
 0x179   :  { %v5710_v35 = vpop.f32.mrf.mxu0  ;;  %v6259_v36 = vpop.eup %6258  ;;  %6284 = vrcp.f32 %v2890_v23  ;;  %v4589_v38 = vmul.f32 %v3584_v31, %v3365_v18  ;;  %3733 = vperm.xlu1 %5965, %v6255_v22   ;;  %3728 = vperm.xlu0 %5964, %v6257_v29   ;;  %v5351_v15 = vmul.f32 -1.442695, %v1855_v57  ;;  %v1865_v16 = vadd.f32 %v5863_v48, %v381_v1  ;;  %v3367_v23 = vld [vmem:[%s10027_s3 + $0x28] sm:$0xff] }
 0x17a   :  { %v6261_v42 = vpop.eup %6260  ;;  %6286 = vpow2.f32 %v5245_v17  ;;  %4791 = vst.msk [vmem:[%s10028_s4] sm:$0xff] %vm4790_vm2, %v4586_v32  ;;  %v1355_v5 = vadd.f32 %v5710_v35, %v279_v53  ;;  %v5350_v20 = vmul.f32 -1.442695, %v1850_v0  ;;  %v1860_v21 = vadd.f32 %v1859_v6, %v380_v7  ;;  %v3471_v6 = vld [vmem:[%s10027_s3 + $0x368] sm:$0xff] }
 0x17b   :  { %v6263_v49 = vpop.eup %6262  ;;  %6288 = vpow2.f32 %v5244_v24  ;;  %4794 = vst.msk [vmem:[%s10028_s4 + $0x18] sm:$0xff] %vm4790_vm2, %v4589_v38  ;;  %v4079_v51 = vpop.permute.xlu0 %4078  ;;  %v5353_v31 = vmul.f32 -1.442695, %v1865_v16  ;;  %v3469_v38 = vld [vmem:[%s10027_s3 + $0x358] sm:$0xff]  ;;  %v280_v16 = vld [vmem:[%s10026_s1 + $0x180] sm:$0xff] }
 0x17c   :  { %v6265_v46 = vpop.eup %6264  ;;  %6290 = vpow2.f32 %v5347_v30  ;;  %v4094_v54 = vpop.permute.xlu1 %4093  ;;  %v4688_v55 = vmul.f32 %v4079_v51, %v3464_v39  ;;  %v5251_v24 = vmul.f32 -1.442695, %v1355_v5  ;;  %v5352_v35 = vmul.f32 -1.442695, %v1860_v21  ;;  %v382_v21 = vld [vmem:[%s10026_s1 + $0x4b0] sm:$0xff] }
 0x17d   :  { %v1349_v58 = vpop.f32.mrf.mxu0  ;;  %v6267_v60 = vpop.eup %6266  ;;  %6292 = vpow2.f32 %v5346_v37  ;;  %v4691_v61 = vmul.f32 %v4094_v54, %v3467_v44  ;;  %4243 = vperm.xlu1 %5965, %v6259_v36   ;;  %4238 = vperm.xlu0 %5964, %v6261_v42  }
 0x17e   :  { %v6269_v2 = vpop.eup %6268  ;;  %6294 = vpow2.f32 %v5247_v43  ;;  %4893 = vst.msk [vmem:[%s10028_s4 + $0x330] sm:$0xff] %vm4790_vm2, %v4688_v55  ;;  %v1350_v11 = vadd.f32 %v1349_v58, %v278_v59  ;;  %v8094_v39 = vpop.f32.mrf.mxu1 }
 0x17f   :  { %v6271_v8 = vpop.eup %6270  ;;  %4896 = vst.msk [vmem:[%s10028_s4 + $0x348] sm:$0xff] %vm4790_vm2, %v4691_v61  ;;  %6296 = vpow2.f32 %v5246_v50  ;;  %v4089_v9 = vpop.permute.xlu0 %4088  ;;  %v3368_v50 = vld [vmem:[%s10027_s3 + $0x30] sm:$0xff] }
 0x180   :  { %v6273_v12 = vpop.eup %6272  ;;  %6298 = vpow2.f32 %v5349_v56  ;;  %v3579_v13 = vpop.permute.xlu1 %3578  ;;  %v4690_v14 = vmul.f32 %v4089_v9, %v3466_v63  ;;  %v5250_v27 = vmul.f32 -1.442695, %v1350_v11 }
 0x181   :  { %v8056_v17 = vpop.eup %6274  ;;  %6300 = vpow2.f32 %v5348_v62  ;;  %v4588_v18 = vmul.f32 %v3579_v13, %v3364_v3  ;;  %3743 = vperm.xlu1 %5965, %v6263_v49   ;;  %3738 = vperm.xlu0 %5964, %v6265_v46   ;;  %v8083_v36 = vpop.f32.mrf.mxu0  ;;  %v3369_v46 = vld [vmem:[%s10027_s3 + $0x38] sm:$0xff] }
 0x182   :  { %v8061_v22 = vpop.eup %6276  ;;  %4895 = vst.msk [vmem:[%s10028_s4 + $0x340] sm:$0xff] %vm4790_vm2, %v4690_v14  ;;  %6302 = vpow2.f32 %v5249_v4  ;;  %v8112_v54 = vpop.f32.mrf.mxu1 }
 0x183   :  { %v8070_v25 = vpop.eup %6278  ;;  %4793 = vst.msk [vmem:[%s10028_s4 + $0x10] sm:$0xff] %vm4790_vm2, %v4588_v18  ;;  %6304 = vpow2.f32 %v5248_v10  ;;  %v3589_v26 = vpop.permute.xlu0 %3588  ;;  %v281_v10 = vld [vmem:[%s10026_s1 + $0x188] sm:$0xff] }
 0x184   :  { %v8076_v28 = vpop.eup %6280  ;;  %v3594_v29 = vpop.permute.xlu1 %3593  ;;  %v4590_v30 = vmul.f32 %v3589_v26, %v3366_v19  ;;  %6306 = vpow2.f32 %v5351_v15 }
 0x185   :  { %v8078_v32 = vpop.eup %6282  ;;  %v4591_v33 = vmul.f32 %v3594_v29, %v3367_v23  ;;  %4253 = vperm.xlu1 %5965, %v6267_v60   ;;  %4248 = vperm.xlu0 %5964, %v6269_v2   ;;  %6308 = vpow2.f32 %v5350_v20  ;;  %v8103_v51 = vpop.f32.mrf.mxu0  ;;  %v3470_v2 = vld [vmem:[%s10027_s3 + $0x360] sm:$0xff]  ;;  %v383_v20 = vld [vmem:[%s10026_s1 + $0x4b8] sm:$0xff] }
 0x186   :  { %v8085_v37 = vpop.eup %6284  ;;  %4795 = vst.msk [vmem:[%s10028_s4 + $0x20] sm:$0xff] %vm4790_vm2, %v4590_v30  ;;  %6310 = vpow2.f32 %v5251_v24  ;;  %v8125_v3 = vpop.f32.mrf.mxu1 }
 0x187   :  { %v6287_v41 = vpop.eup %6286  ;;  %4796 = vst.msk [vmem:[%s10028_s4 + $0x28] sm:$0xff] %vm4790_vm2, %v4591_v33  ;;  %v4099_v40 = vpop.permute.xlu0 %4098  ;;  %6312 = vpow2.f32 %v5250_v27  ;;  %v3371_v27 = vld [vmem:[%s10027_s3 + $0x48] sm:$0xff]  ;;  %v283_v33 = vld [vmem:[%s10026_s1 + $0x198] sm:$0xff] }
 0x188   :  { %v6289_v42 = vpop.eup %6288  ;;  %v2791_v43 = vadd.f32 1.0, %v6287_v41  ;;  %v4104_v44 = vpop.permute.xlu1 %4103  ;;  %v4692_v45 = vmul.f32 %v4099_v40, %v3468_v34  ;;  %6314 = vpow2.f32 %v5353_v31  ;;  %v1360_v31 = vadd.f32 %v8103_v51, %v280_v16 }
 0x189   :  { %v6291_v47 = vpop.eup %6290  ;;  %v2790_v48 = vadd.f32 1.0, %v6289_v42  ;;  %v4693_v49 = vmul.f32 %v4104_v44, %v3469_v38  ;;  %3753 = vperm.xlu1 %5965, %v6271_v8   ;;  %3748 = vperm.xlu0 %5964, %v6273_v12   ;;  %6316 = vpow2.f32 %v5352_v35  ;;  %v8118_v58 = vpop.f32.mrf.mxu0  ;;  %v1875_v40 = vadd.f32 %v8094_v39, %v383_v20 }
 0x18a   :  { %v6293_v52 = vpop.eup %6292  ;;  %6318 = vrcp.f32 %v2791_v43  ;;  %v2893_v53 = vadd.f32 1.0, %v6291_v47  ;;  %4897 = vst.msk [vmem:[%s10028_s4 + $0x350] sm:$0xff] %vm4790_vm2, %v4692_v45  ;;  %v1870_v42 = vadd.f32 %v8112_v54, %v382_v21  ;;  %v282_v43 = vld [vmem:[%s10026_s1 + $0x190] sm:$0xff] }
 0x18b   :  { %v6295_v55 = vpop.eup %6294  ;;  %6320 = vrcp.f32 %v2790_v48  ;;  %v2892_v56 = vadd.f32 1.0, %v6293_v52  ;;  %4898 = vst.msk [vmem:[%s10028_s4 + $0x358] sm:$0xff] %vm4790_vm2, %v4693_v49  ;;  %v3599_v57 = vpop.permute.xlu0 %3598  ;;  %v385_v49 = vld [vmem:[%s10026_s1 + $0x4c8] sm:$0xff] }
 0x18c   :  { %v6297_v59 = vpop.eup %6296  ;;  %6322 = vrcp.f32 %v2893_v53  ;;  %v2793_v60 = vadd.f32 1.0, %v6295_v55  ;;  %v3604_v61 = vpop.permute.xlu1 %3603  ;;  %v4592_v62 = vmul.f32 %v3599_v57, %v3368_v50  ;;  %v3473_v53 = vld [vmem:[%s10027_s3 + $0x378] sm:$0xff] }
 0x18d   :  { %v6299_v63 = vpop.eup %6298  ;;  %6324 = vrcp.f32 %v2892_v56  ;;  %v2792_v0 = vadd.f32 1.0, %v6297_v59  ;;  %v4593_v1 = vmul.f32 %v3604_v61, %v3369_v46  ;;  %4263 = vperm.xlu1 %5965, %v8056_v17   ;;  %4258 = vperm.xlu0 %5964, %v8061_v22   ;;  %v1369_v11 = vpop.f32.mrf.mxu0  ;;  %v3472_v46 = vld [vmem:[%s10027_s3 + $0x370] sm:$0xff]  ;;  %v5252_v56 = vmul.f32 -1.442695, %v1360_v31 }
 0x18e   :  { %v6301_v4 = vpop.eup %6300  ;;  %6326 = vrcp.f32 %v2793_v60  ;;  %v2895_v5 = vadd.f32 1.0, %v6299_v63  ;;  %4797 = vst.msk [vmem:[%s10028_s4 + $0x30] sm:$0xff] %vm4790_vm2, %v4592_v62  ;;  %v8152_v22 = vpop.f32.mrf.mxu1  ;;  %v1370_v57 = vadd.f32 %v1369_v11, %v282_v43  ;;  %v5355_v62 = vmul.f32 -1.442695, %v1875_v40 }
 0x18f   :  { %v6303_v7 = vpop.eup %6302  ;;  %6328 = vrcp.f32 %v2792_v0  ;;  %v2894_v8 = vadd.f32 1.0, %v6301_v4  ;;  %4798 = vst.msk [vmem:[%s10028_s4 + $0x38] sm:$0xff] %vm4790_vm2, %v4593_v1  ;;  %v4109_v9 = vpop.permute.xlu0 %4108  ;;  %v5354_v63 = vmul.f32 -1.442695, %v1870_v42  ;;  %v284_v4 = vld [vmem:[%s10026_s1 + $0x1a0] sm:$0xff] }
 0x190   :  { %v6305_v12 = vpop.eup %6304  ;;  %6330 = vrcp.f32 %v2895_v5  ;;  %v2795_v13 = vadd.f32 1.0, %v6303_v7  ;;  %v4114_v14 = vpop.permute.xlu1 %4113  ;;  %v4694_v15 = vmul.f32 %v4109_v9, %v3470_v2  ;;  %v1885_v2 = vadd.f32 %v8125_v3, %v385_v49  ;;  %v387_v9 = vld [vmem:[%s10026_s1 + $0x4d8] sm:$0xff]  ;;  %v386_v3 = vld [vmem:[%s10026_s1 + $0x4d0] sm:$0xff]  ;;  %v388_v42 = vld [vmem:[%s10026_s1 + $0x4e0] sm:$0xff] }
 0x191   :  { %v6307_v17 = vpop.eup %6306  ;;  %6332 = vrcp.f32 %v2894_v8  ;;  %v2794_v18 = vadd.f32 1.0, %v6305_v12  ;;  %v4695_v19 = vmul.f32 %v4114_v14, %v3471_v6  ;;  %3763 = vperm.xlu1 %5965, %v8070_v25   ;;  %3758 = vperm.xlu0 %5964, %v8076_v28   ;;  %v8154_v23 = vpop.f32.mrf.mxu0  ;;  %v1365_v25 = vadd.f32 %v8083_v36, %v281_v10  ;;  %v3370_v28 = vld [vmem:[%s10027_s3 + $0x40] sm:$0xff]  ;;  %v3373_v12 = vld [vmem:[%s10027_s3 + $0x58] sm:$0xff] }
 0x192   :  { %v6309_v24 = vpop.eup %6308  ;;  %6334 = vrcp.f32 %v2795_v13  ;;  %v2897_v26 = vadd.f32 1.0, %v6307_v17  ;;  %4899 = vst.msk [vmem:[%s10028_s4 + $0x360] sm:$0xff] %vm4790_vm2, %v4694_v15  ;;  %v8175_v34 = vpop.f32.mrf.mxu1  ;;  %v3372_v13 = vld [vmem:[%s10027_s3 + $0x50] sm:$0xff]  ;;  %v5254_v17 = vmul.f32 -1.442695, %v1370_v57 }
 0x193   :  { %v6311_v29 = vpop.eup %6310  ;;  %6336 = vrcp.f32 %v2794_v18  ;;  %v2896_v30 = vadd.f32 1.0, %v6309_v24  ;;  %4900 = vst.msk [vmem:[%s10028_s4 + $0x368] sm:$0xff] %vm4790_vm2, %v4695_v19  ;;  %v1379_v39 = vpop.f32.mrf.mxu0  ;;  %v5253_v52 = vmul.f32 -1.442695, %v1365_v25  ;;  %v287_v19 = vld [vmem:[%s10026_s1 + $0x1b8] sm:$0xff] }
 0x194   :  { %v6313_v35 = vpop.eup %6312  ;;  %6338 = vrcp.f32 %v2897_v26  ;;  %v2797_v36 = vadd.f32 1.0, %v6311_v29  ;;  %v3614_v38 = vpop.permute.xlu1 %3613  ;;  %v1380_v18 = vadd.f32 %v1379_v39, %v284_v4  ;;  %v5357_v24 = vmul.f32 -1.442695, %v1885_v2 }
 0x195   :  { %v3609_v41 = vpop.permute.xlu0 %3608  ;;  %v6315_v44 = vpop.eup %6314  ;;  %6340 = vrcp.f32 %v2896_v30  ;;  %v2796_v45 = vadd.f32 1.0, %v6313_v35  ;;  %v4595_v47 = vmul.f32 %v3614_v38, %v3371_v27  ;;  %4273 = vperm.xlu1 %5965, %v8078_v32   ;;  %4268 = vperm.xlu0 %5964, %v8085_v37   ;;  %v1375_v32 = vadd.f32 %v8118_v58, %v283_v33  ;;  %v384_v37 = vld [vmem:[%s10026_s1 + $0x4c0] sm:$0xff]  ;;  %v285_v58 = vld [vmem:[%s10026_s1 + $0x1a8] sm:$0xff]  ;;  %v286_v27 = vld [vmem:[%s10026_s1 + $0x1b0] sm:$0xff] }
 0x196   :  { %v4594_v48 = vmul.f32 %v3609_v41, %v3370_v28  ;;  %v6317_v50 = vpop.eup %6316  ;;  %6342 = vrcp.f32 %v2797_v36  ;;  %v2899_v51 = vadd.f32 1.0, %v6315_v44  ;;  %v1889_v59 = vpop.f32.mrf.mxu1  ;;  %v1880_v8 = vadd.f32 %v8152_v22, %v384_v37  ;;  %v389_v33 = vld [vmem:[%s10026_s1 + $0x4e8] sm:$0xff]  ;;  %v3474_v36 = vld [vmem:[%s10027_s3 + $0x380] sm:$0xff] }
 0x197   :  { %v6319_v54 = vpop.eup %6318  ;;  %6344 = vrcp.f32 %v2796_v45  ;;  %v2898_v55 = vadd.f32 1.0, %v6317_v50  ;;  %4800 = vst.msk [vmem:[%s10028_s4 + $0x48] sm:$0xff] %vm4790_vm2, %v4595_v47  ;;  %v5722_v60 = vpop.f32.mrf.mxu0  ;;  %v5255_v11 = vmul.f32 -1.442695, %v1375_v32  ;;  %v1385_v14 = vadd.f32 %v8154_v23, %v285_v58 }
 0x198   :  { %4799 = vst.msk [vmem:[%s10028_s4 + $0x40] sm:$0xff] %vm4790_vm2, %v4594_v48  ;;  %v6321_v61 = vpop.eup %6320  ;;  %6346 = vrcp.f32 %v2899_v51  ;;  %v4124_v0 = vpop.permute.xlu1 %4123  ;;  %v1895_v26 = vadd.f32 %v8175_v34, %v387_v9  ;;  %v1890_v25 = vadd.f32 %v1889_v59, %v386_v3  ;;  %v5356_v31 = vmul.f32 -1.442695, %v1880_v8  ;;  %v3475_v34 = vld [vmem:[%s10027_s3 + $0x388] sm:$0xff] }
 0x199   :  { %v4119_v1 = vpop.permute.xlu0 %4118  ;;  %v6323_v5 = vpop.eup %6322  ;;  %6348 = vrcp.f32 %v2898_v55  ;;  %v4697_v6 = vmul.f32 %v4124_v0, %v3473_v53  ;;  %3773 = vperm.xlu1 %5965, %v6319_v54   ;;  %3768 = vperm.xlu0 %5964, %v6321_v61   ;;  %v5257_v38 = vmul.f32 -1.442695, %v1385_v14  ;;  %v1395_v41 = vadd.f32 %v5722_v60, %v287_v19  ;;  %v3375_v54 = vld [vmem:[%s10027_s3 + $0x68] sm:$0xff]  ;;  %v3374_v55 = vld [vmem:[%s10027_s3 + $0x60] sm:$0xff] }
 0x19a   :  { %v4696_v7 = vmul.f32 %v4119_v1, %v3472_v46  ;;  %v6325_v10 = vpop.eup %6324  ;;  %6350 = vpow2.f32 %v5253_v52  ;;  %v5875_v15 = vpop.f32.mrf.mxu1  ;;  %v5256_v44 = vmul.f32 -1.442695, %v1380_v18  ;;  %v5359_v39 = vmul.f32 -1.442695, %v1895_v26 }
 0x19b   :  { %v6327_v16 = vpop.eup %6326  ;;  %6352 = vpow2.f32 %v5252_v56  ;;  %4902 = vst.msk [vmem:[%s10028_s4 + $0x378] sm:$0xff] %vm4790_vm2, %v4697_v6  ;;  %v1389_v20 = vpop.f32.mrf.mxu0  ;;  %v5358_v50 = vmul.f32 -1.442695, %v1890_v25  ;;  %v1905_v51 = vadd.f32 %v5875_v15, %v389_v33  ;;  %v5259_v56 = vmul.f32 -1.442695, %v1395_v41  ;;  %v3477_v6 = vld [vmem:[%s10027_s3 + $0x398] sm:$0xff] }
 0x19c   :  { %4901 = vst.msk [vmem:[%s10028_s4 + $0x370] sm:$0xff] %vm4790_vm2, %v4696_v7  ;;  %v6329_v21 = vpop.eup %6328  ;;  %6354 = vpow2.f32 %v5355_v62  ;;  %v3624_v22 = vpop.permute.xlu1 %3623  ;;  %v1390_v45 = vadd.f32 %v1389_v20, %v286_v27  ;;  %v3476_v7 = vld [vmem:[%s10027_s3 + $0x390] sm:$0xff]  ;;  %v3377_v20 = vld [vmem:[%s10027_s3 + $0x78] sm:$0xff]  ;;  %v3479_v41 = vld [vmem:[%s10027_s3 + $0x3a8] sm:$0xff] }
 0x19d   :  { %v3619_v23 = vpop.permute.xlu0 %3618  ;;  %v6331_v28 = vpop.eup %6330  ;;  %6356 = vpow2.f32 %v5354_v63  ;;  %v4597_v29 = vmul.f32 %v3624_v22, %v3373_v12  ;;  %4283 = vperm.xlu1 %5965, %v6323_v5   ;;  %4278 = vperm.xlu0 %5964, %v6325_v10   ;;  %v5361_v62 = vmul.f32 -1.442695, %v1905_v51 }
 0x19e   :  { %v4596_v30 = vmul.f32 %v3619_v23, %v3372_v13  ;;  %v6333_v35 = vpop.eup %6332  ;;  %6358 = vpow2.f32 %v5255_v11  ;;  %v1899_v40 = vpop.f32.mrf.mxu1  ;;  %v5258_v58 = vmul.f32 -1.442695, %v1390_v45 }
 0x19f   :  { %v6335_v43 = vpop.eup %6334  ;;  %6360 = vpow2.f32 %v5254_v17  ;;  %4802 = vst.msk [vmem:[%s10028_s4 + $0x58] sm:$0xff] %vm4790_vm2, %v4597_v29  ;;  %v1900_v32 = vadd.f32 %v1899_v40, %v388_v42  ;;  %v8285_v4 = vpop.f32.mrf.mxu0  ;;  %v3478_v40 = vld [vmem:[%s10027_s3 + $0x3a0] sm:$0xff] }
 0x1a0   :  { %4801 = vst.msk [vmem:[%s10028_s4 + $0x50] sm:$0xff] %vm4790_vm2, %v4596_v30  ;;  %v6337_v47 = vpop.eup %6336  ;;  %6362 = vpow2.f32 %v5357_v24  ;;  %v4134_v48 = vpop.permute.xlu1 %4133 }
 0x1a1   :  { %v4129_v49 = vpop.permute.xlu0 %4128  ;;  %v8261_v52 = vpop.eup %6338  ;;  %6364 = vpow2.f32 %v5356_v31  ;;  %v4699_v53 = vmul.f32 %v4134_v48, %v3475_v34  ;;  %3783 = vperm.xlu1 %5965, %v6327_v16   ;;  %3778 = vperm.xlu0 %5964, %v6329_v21   ;;  %v5360_v2 = vmul.f32 -1.442695, %v1900_v32  ;;  %v3376_v21 = vld [vmem:[%s10027_s3 + $0x70] sm:$0xff]  ;;  %v391_v32 = vld [vmem:[%s10026_s1 + $0x4f8] sm:$0xff] }
 0x1a2   :  { %v4698_v46 = vmul.f32 %v4129_v49, %v3474_v36  ;;  %v8263_v37 = vpop.eup %6340  ;;  %6366 = vpow2.f32 %v5257_v38  ;;  %v8303_v9 = vpop.f32.mrf.mxu1 }
 0x1a3   :  { %v8271_v57 = vpop.eup %6342  ;;  %4904 = vst.msk [vmem:[%s10028_s4 + $0x388] sm:$0xff] %vm4790_vm2, %v4699_v53  ;;  %6368 = vpow2.f32 %v5256_v44  ;;  %v8305_v17 = vpop.f32.mrf.mxu0  ;;  %v289_v44 = vld [vmem:[%s10026_s1 + $0x1c8] sm:$0xff] }
 0x1a4   :  { %4903 = vst.msk [vmem:[%s10028_s4 + $0x380] sm:$0xff] %vm4790_vm2, %v4698_v46  ;;  %v8281_v59 = vpop.eup %6344  ;;  %v3634_v60 = vpop.permute.xlu1 %3633  ;;  %6370 = vpow2.f32 %v5359_v39 }
 0x1a5   :  { %v3629_v61 = vpop.permute.xlu0 %3628  ;;  %v8283_v63 = vpop.eup %6346  ;;  %v4599_v0 = vmul.f32 %v3634_v60, %v3375_v54  ;;  %4293 = vperm.xlu1 %5965, %v6331_v28   ;;  %4288 = vperm.xlu0 %5964, %v6333_v35   ;;  %6372 = vpow2.f32 %v5358_v50  ;;  %v288_v50 = vld [vmem:[%s10026_s1 + $0x1c0] sm:$0xff]  ;;  %v1405_v60 = vadd.f32 %v8285_v4, %v289_v44  ;;  %v395_v44 = vld [vmem:[%s10026_s1 + $0x518] sm:$0xff] }
 0x1a6   :  { %v4598_v1 = vmul.f32 %v3629_v61, %v3374_v55  ;;  %v8287_v5 = vpop.eup %6348  ;;  %6374 = vpow2.f32 %v5259_v56  ;;  %v8321_v24 = vpop.f32.mrf.mxu1 }
 0x1a7   :  { %v6351_v8 = vpop.eup %6350  ;;  %4804 = vst.msk [vmem:[%s10028_s4 + $0x68] sm:$0xff] %vm4790_vm2, %v4599_v0  ;;  %6376 = vpow2.f32 %v5258_v58  ;;  %v8323_v26 = vpop.f32.mrf.mxu0  ;;  %v1400_v0 = vadd.f32 %v8305_v17, %v288_v50 }
 0x1a8   :  { %4803 = vst.msk [vmem:[%s10028_s4 + $0x60] sm:$0xff] %vm4790_vm2, %v4598_v1  ;;  %v6353_v3 = vpop.eup %6352  ;;  %v2799_v10 = vadd.f32 1.0, %v6351_v8  ;;  %v4144_v11 = vpop.permute.xlu1 %4143  ;;  %6378 = vpow2.f32 %v5361_v62  ;;  %v291_v1 = vld [vmem:[%s10026_s1 + $0x1d8] sm:$0xff] }
 0x1a9   :  { %v4139_v12 = vpop.permute.xlu0 %4138  ;;  %v6355_v13 = vpop.eup %6354  ;;  %v2798_v14 = vadd.f32 1.0, %v6353_v3  ;;  %v4701_v15 = vmul.f32 %v4144_v11, %v3477_v6  ;;  %3793 = vperm.xlu1 %5965, %v6335_v43   ;;  %3788 = vperm.xlu0 %5964, %v6337_v47   ;;  %6380 = vpow2.f32 %v5360_v2  ;;  %v1915_v3 = vadd.f32 %v8303_v9, %v391_v32  ;;  %v290_v11 = vld [vmem:[%s10026_s1 + $0x1d0] sm:$0xff] }
 0x1aa   :  { %v4700_v16 = vmul.f32 %v4139_v12, %v3476_v7  ;;  %v6357_v18 = vpop.eup %6356  ;;  %6382 = vrcp.f32 %v2799_v10  ;;  %v2901_v19 = vadd.f32 1.0, %v6355_v13  ;;  %v8327_v34 = vpop.f32.mrf.mxu1 }
 0x1ab   :  { %v6359_v22 = vpop.eup %6358  ;;  %6384 = vrcp.f32 %v2798_v14  ;;  %v2900_v23 = vadd.f32 1.0, %v6357_v18  ;;  %4906 = vst.msk [vmem:[%s10028_s4 + $0x398] sm:$0xff] %vm4790_vm2, %v4701_v15  ;;  %v8346_v45 = vpop.f32.mrf.mxu0 }
 0x1ac   :  { %4905 = vst.msk [vmem:[%s10028_s4 + $0x390] sm:$0xff] %vm4790_vm2, %v4700_v16  ;;  %v6361_v25 = vpop.eup %6360  ;;  %6386 = vrcp.f32 %v2901_v19  ;;  %v2801_v27 = vadd.f32 1.0, %v6359_v22  ;;  %v3644_v28 = vpop.permute.xlu1 %3643  ;;  %v393_v16 = vld [vmem:[%s10026_s1 + $0x508] sm:$0xff]  ;;  %v5261_v19 = vmul.f32 -1.442695, %v1405_v60 }
 0x1ad   :  { %v3639_v29 = vpop.permute.xlu0 %3638  ;;  %v6363_v30 = vpop.eup %6362  ;;  %6388 = vrcp.f32 %v2900_v23  ;;  %v2800_v31 = vadd.f32 1.0, %v6361_v25  ;;  %v4601_v33 = vmul.f32 %v3644_v28, %v3377_v20  ;;  %4303 = vperm.xlu1 %5965, %v8261_v52   ;;  %4298 = vperm.xlu0 %5964, %v8263_v37   ;;  %v390_v37 = vld [vmem:[%s10026_s1 + $0x4f0] sm:$0xff]  ;;  %v3481_v20 = vld [vmem:[%s10027_s3 + $0x3b8] sm:$0xff]  ;;  %v293_v25 = vld [vmem:[%s10026_s1 + $0x1e8] sm:$0xff] }
 0x1ae   :  { %v4600_v35 = vmul.f32 %v3639_v29, %v3376_v21  ;;  %v6365_v36 = vpop.eup %6364  ;;  %6390 = vrcp.f32 %v2801_v27  ;;  %v2903_v38 = vadd.f32 1.0, %v6363_v30  ;;  %v8359_v54 = vpop.f32.mrf.mxu1  ;;  %v1910_v10 = vadd.f32 %v8321_v24, %v390_v37  ;;  %v3480_v21 = vld [vmem:[%s10027_s3 + $0x3b0] sm:$0xff] }
 0x1af   :  { %v6367_v42 = vpop.eup %6366  ;;  %6392 = vrcp.f32 %v2800_v31  ;;  %v2902_v43 = vadd.f32 1.0, %v6365_v36  ;;  %4806 = vst.msk [vmem:[%s10028_s4 + $0x78] sm:$0xff] %vm4790_vm2, %v4601_v33  ;;  %v8361_v55 = vpop.f32.mrf.mxu0  ;;  %v5260_v24 = vmul.f32 -1.442695, %v1400_v0  ;;  %v5363_v30 = vmul.f32 -1.442695, %v1915_v3 }
 0x1b0   :  { %4805 = vst.msk [vmem:[%s10028_s4 + $0x70] sm:$0xff] %vm4790_vm2, %v4600_v35  ;;  %v6369_v47 = vpop.eup %6368  ;;  %6394 = vrcp.f32 %v2903_v38  ;;  %v2803_v48 = vadd.f32 1.0, %v6367_v42  ;;  %v4154_v49 = vpop.permute.xlu1 %4153  ;;  %v5362_v31 = vmul.f32 -1.442695, %v1910_v10  ;;  %v1925_v36 = vadd.f32 %v8327_v34, %v393_v16  ;;  %v292_v38 = vld [vmem:[%s10026_s1 + $0x1e0] sm:$0xff]  ;;  %v394_v34 = vld [vmem:[%s10026_s1 + $0x510] sm:$0xff] }
 0x1b1   :  { %v4149_v39 = vpop.permute.xlu0 %4148  ;;  %v6371_v51 = vpop.eup %6370  ;;  %6396 = vrcp.f32 %v2902_v43  ;;  %v2802_v52 = vadd.f32 1.0, %v6369_v47  ;;  %v4703_v53 = vmul.f32 %v4154_v49, %v3479_v41  ;;  %3803 = vperm.xlu1 %5965, %v8271_v57   ;;  %3798 = vperm.xlu0 %5964, %v8281_v59   ;;  %v3379_v57 = vld [vmem:[%s10027_s3 + $0x88] sm:$0xff]  ;;  %v3378_v59 = vld [vmem:[%s10027_s3 + $0x80] sm:$0xff]  ;;  %v3380_v49 = vld [vmem:[%s10027_s3 + $0x90] sm:$0xff] }
 0x1b2   :  { %v4702_v46 = vmul.f32 %v4149_v39, %v3478_v40  ;;  %v6373_v56 = vpop.eup %6372  ;;  %6398 = vrcp.f32 %v2803_v48  ;;  %v2905_v58 = vadd.f32 1.0, %v6371_v51  ;;  %v8382_v2 = vpop.f32.mrf.mxu1  ;;  %v3381_v48 = vld [vmem:[%s10027_s3 + $0x98] sm:$0xff]  ;;  %v1425_v39 = vadd.f32 %v8361_v55, %v293_v25  ;;  %v396_v10 = vld [vmem:[%s10026_s1 + $0x520] sm:$0xff] }
 0x1b3   :  { %v6375_v61 = vpop.eup %6374  ;;  %6400 = vrcp.f32 %v2802_v52  ;;  %v2904_v62 = vadd.f32 1.0, %v6373_v56  ;;  %4908 = vst.msk [vmem:[%s10028_s4 + $0x3a8] sm:$0xff] %vm4790_vm2, %v4703_v53  ;;  %v1419_v9 = vpop.f32.mrf.mxu0  ;;  %v5365_v56 = vmul.f32 -1.442695, %v1925_v36 }
 0x1b4   :  { %4907 = vst.msk [vmem:[%s10028_s4 + $0x3a0] sm:$0xff] %vm4790_vm2, %v4702_v46  ;;  %v6377_v4 = vpop.eup %6376  ;;  %6402 = vrcp.f32 %v2905_v58  ;;  %v2805_v6 = vadd.f32 1.0, %v6375_v61  ;;  %v3654_v7 = vpop.permute.xlu1 %3653  ;;  %v1420_v53 = vadd.f32 %v1419_v9, %v292_v38  ;;  %v295_v46 = vld [vmem:[%s10026_s1 + $0x1f8] sm:$0xff]  ;;  %v1935_v58 = vadd.f32 %v8382_v2, %v395_v44  ;;  %v3483_v2 = vld [vmem:[%s10027_s3 + $0x3c8] sm:$0xff] }
 0x1b5   :  { %v3649_v8 = vpop.permute.xlu0 %3648  ;;  %v6379_v12 = vpop.eup %6378  ;;  %6404 = vrcp.f32 %v2904_v62  ;;  %v2804_v13 = vadd.f32 1.0, %v6377_v4  ;;  %v4603_v14 = vmul.f32 %v3654_v7, %v3379_v57  ;;  %4313 = vperm.xlu1 %5965, %v8283_v63   ;;  %4308 = vperm.xlu0 %5964, %v8287_v5   ;;  %v1415_v63 = vadd.f32 %v8323_v26, %v291_v1  ;;  %v392_v5 = vld [vmem:[%s10026_s1 + $0x500] sm:$0xff]  ;;  %v294_v57 = vld [vmem:[%s10026_s1 + $0x1f0] sm:$0xff]  ;;  %v397_v1 = vld [vmem:[%s10026_s1 + $0x528] sm:$0xff] }
 0x1b6   :  { %v4602_v15 = vmul.f32 %v3649_v8, %v3378_v59  ;;  %v6381_v17 = vpop.eup %6380  ;;  %6406 = vrcp.f32 %v2805_v6  ;;  %v2907_v18 = vadd.f32 1.0, %v6379_v12  ;;  %v1410_v26 = vadd.f32 %v8346_v45, %v290_v11  ;;  %v1929_v27 = vpop.f32.mrf.mxu1  ;;  %v3482_v6 = vld [vmem:[%s10027_s3 + $0x3c0] sm:$0xff] }
 0x1b7   :  { %v6383_v22 = vpop.eup %6382  ;;  %6408 = vrcp.f32 %v2804_v13  ;;  %v2906_v23 = vadd.f32 1.0, %v6381_v17  ;;  %4808 = vst.msk [vmem:[%s10028_s4 + $0x88] sm:$0xff] %vm4790_vm2, %v4603_v14  ;;  %v5734_v28 = vpop.f32.mrf.mxu0  ;;  %v1920_v43 = vadd.f32 %v8359_v54, %v392_v5  ;;  %v5263_v47 = vmul.f32 -1.442695, %v1415_v63 }
 0x1b8   :  { %4807 = vst.msk [vmem:[%s10028_s4 + $0x80] sm:$0xff] %vm4790_vm2, %v4602_v15  ;;  %v6385_v29 = vpop.eup %6384  ;;  %6410 = vrcp.f32 %v2907_v18  ;;  %v4164_v33 = vpop.permute.xlu1 %4163  ;;  %v5262_v52 = vmul.f32 -1.442695, %v1410_v26  ;;  %v1930_v60 = vadd.f32 %v1929_v27, %v394_v34  ;;  %v5265_v7 = vmul.f32 -1.442695, %v1425_v39 }
 0x1b9   :  { %v4159_v35 = vpop.permute.xlu0 %4158  ;;  %v6387_v41 = vpop.eup %6386  ;;  %6412 = vrcp.f32 %v2906_v23  ;;  %v4705_v40 = vmul.f32 %v4164_v33, %v3481_v20  ;;  %3813 = vperm.xlu1 %5965, %v6383_v22   ;;  %3808 = vperm.xlu0 %5964, %v6385_v29   ;;  %v5364_v0 = vmul.f32 -1.442695, %v1920_v43  ;;  %v1435_v8 = vadd.f32 %v5734_v28, %v295_v46  ;;  %v3383_v22 = vld [vmem:[%s10027_s3 + $0xa8] sm:$0xff]  ;;  %v3382_v23 = vld [vmem:[%s10027_s3 + $0xa0] sm:$0xff] }
 0x1ba   :  { %v4704_v42 = vmul.f32 %v4159_v35, %v3480_v21  ;;  %v6389_v45 = vpop.eup %6388  ;;  %6414 = vpow2.f32 %v5261_v19  ;;  %v5887_v50 = vpop.f32.mrf.mxu1  ;;  %v5264_v12 = vmul.f32 -1.442695, %v1420_v53  ;;  %v5367_v9 = vmul.f32 -1.442695, %v1935_v58 }
 0x1bb   :  { %v6391_v51 = vpop.eup %6390  ;;  %6416 = vpow2.f32 %v5260_v24  ;;  %4910 = vst.msk [vmem:[%s10028_s4 + $0x3b8] sm:$0xff] %vm4790_vm2, %v4705_v40  ;;  %v1429_v32 = vpop.f32.mrf.mxu0  ;;  %v5366_v17 = vmul.f32 -1.442695, %v1930_v60  ;;  %v1945_v18 = vadd.f32 %v5887_v50, %v397_v1  ;;  %v5267_v24 = vmul.f32 -1.442695, %v1435_v8  ;;  %v3485_v40 = vld [vmem:[%s10027_s3 + $0x3d8] sm:$0xff] }
 0x1bc   :  { %4909 = vst.msk [vmem:[%s10028_s4 + $0x3b0] sm:$0xff] %vm4790_vm2, %v4704_v42  ;;  %v6393_v37 = vpop.eup %6392  ;;  %6418 = vpow2.f32 %v5363_v30  ;;  %v3664_v54 = vpop.permute.xlu1 %3663  ;;  %v1430_v13 = vadd.f32 %v1429_v32, %v294_v57  ;;  %v3484_v42 = vld [vmem:[%s10027_s3 + $0x3d0] sm:$0xff]  ;;  %v3385_v32 = vld [vmem:[%s10027_s3 + $0xb8] sm:$0xff]  ;;  %v3487_v8 = vld [vmem:[%s10027_s3 + $0x3e8] sm:$0xff] }
 0x1bd   :  { %v3659_v55 = vpop.permute.xlu0 %3658  ;;  %v6395_v59 = vpop.eup %6394  ;;  %6420 = vpow2.f32 %v5362_v31  ;;  %v4605_v61 = vmul.f32 %v3664_v54, %v3381_v48  ;;  %4323 = vperm.xlu1 %5965, %v6387_v41   ;;  %4318 = vperm.xlu0 %5964, %v6389_v45   ;;  %v5369_v30 = vmul.f32 -1.442695, %v1945_v18 }
 0x1be   :  { %v4604_v62 = vmul.f32 %v3659_v55, %v3380_v49  ;;  %v6397_v4 = vpop.eup %6396  ;;  %6422 = vpow2.f32 %v5263_v47  ;;  %v1939_v3 = vpop.f32.mrf.mxu1  ;;  %v5266_v25 = vmul.f32 -1.442695, %v1430_v13 }
 0x1bf   :  { %v6399_v11 = vpop.eup %6398  ;;  %6424 = vpow2.f32 %v5262_v52  ;;  %4810 = vst.msk [vmem:[%s10028_s4 + $0x98] sm:$0xff] %vm4790_vm2, %v4605_v61  ;;  %v1940_v63 = vadd.f32 %v1939_v3, %v396_v10  ;;  %v8493_v38 = vpop.f32.mrf.mxu0  ;;  %v3486_v3 = vld [vmem:[%s10027_s3 + $0x3e0] sm:$0xff] }
 0x1c0   :  { %4809 = vst.msk [vmem:[%s10028_s4 + $0x90] sm:$0xff] %vm4790_vm2, %v4604_v62  ;;  %v6401_v14 = vpop.eup %6400  ;;  %6426 = vpow2.f32 %v5365_v56  ;;  %v4174_v15 = vpop.permute.xlu1 %4173 }
 0x1c1   :  { %v4169_v16 = vpop.permute.xlu0 %4168  ;;  %v8469_v19 = vpop.eup %6402  ;;  %6428 = vpow2.f32 %v5364_v0  ;;  %v4707_v20 = vmul.f32 %v4174_v15, %v3483_v2  ;;  %3823 = vperm.xlu1 %5965, %v6391_v51   ;;  %3818 = vperm.xlu0 %5964, %v6393_v37   ;;  %v5368_v36 = vmul.f32 -1.442695, %v1940_v63  ;;  %v3384_v37 = vld [vmem:[%s10027_s3 + $0xb0] sm:$0xff]  ;;  %v399_v63 = vld [vmem:[%s10026_s1 + $0x538] sm:$0xff] }
 0x1c2   :  { %v4706_v21 = vmul.f32 %v4169_v16, %v3482_v6  ;;  %v8471_v5 = vpop.eup %6404  ;;  %6430 = vpow2.f32 %v5265_v7  ;;  %v8511_v44 = vpop.f32.mrf.mxu1 }
 0x1c3   :  { %v8479_v26 = vpop.eup %6406  ;;  %4912 = vst.msk [vmem:[%s10028_s4 + $0x3c8] sm:$0xff] %vm4790_vm2, %v4707_v20  ;;  %6432 = vpow2.f32 %v5264_v12  ;;  %v8513_v52 = vpop.f32.mrf.mxu0  ;;  %v297_v12 = vld [vmem:[%s10026_s1 + $0x208] sm:$0xff] }
 0x1c4   :  { %4911 = vst.msk [vmem:[%s10028_s4 + $0x3c0] sm:$0xff] %vm4790_vm2, %v4706_v21  ;;  %v8489_v27 = vpop.eup %6408  ;;  %v3674_v28 = vpop.permute.xlu1 %3673  ;;  %6434 = vpow2.f32 %v5367_v9 }
 0x1c5   :  { %v3669_v29 = vpop.permute.xlu0 %3668  ;;  %v8491_v31 = vpop.eup %6410  ;;  %v4607_v33 = vmul.f32 %v3674_v28, %v3383_v22  ;;  %4333 = vperm.xlu1 %5965, %v6395_v59   ;;  %4328 = vperm.xlu0 %5964, %v6397_v4   ;;  %6436 = vpow2.f32 %v5366_v17  ;;  %v296_v17 = vld [vmem:[%s10026_s1 + $0x200] sm:$0xff]  ;;  %v1445_v28 = vadd.f32 %v8493_v38, %v297_v12  ;;  %v403_v12 = vld [vmem:[%s10026_s1 + $0x558] sm:$0xff] }
 0x1c6   :  { %v4606_v35 = vmul.f32 %v3669_v29, %v3382_v23  ;;  %v8495_v41 = vpop.eup %6412  ;;  %6438 = vpow2.f32 %v5267_v24  ;;  %v8529_v56 = vpop.f32.mrf.mxu1 }
 0x1c7   :  { %v6415_v43 = vpop.eup %6414  ;;  %4812 = vst.msk [vmem:[%s10028_s4 + $0xa8] sm:$0xff] %vm4790_vm2, %v4607_v33  ;;  %6440 = vpow2.f32 %v5266_v25  ;;  %v8531_v58 = vpop.f32.mrf.mxu0  ;;  %v1440_v33 = vadd.f32 %v8513_v52, %v296_v17 }
 0x1c8   :  { %4811 = vst.msk [vmem:[%s10028_s4 + $0xa0] sm:$0xff] %vm4790_vm2, %v4606_v35  ;;  %v6417_v34 = vpop.eup %6416  ;;  %v2807_v45 = vadd.f32 1.0, %v6415_v43  ;;  %v4184_v47 = vpop.permute.xlu1 %4183  ;;  %6442 = vpow2.f32 %v5369_v30  ;;  %v299_v35 = vld [vmem:[%s10026_s1 + $0x218] sm:$0xff] }
 0x1c9   :  { %v4179_v48 = vpop.permute.xlu0 %4178  ;;  %v6419_v49 = vpop.eup %6418  ;;  %v2806_v39 = vadd.f32 1.0, %v6417_v34  ;;  %v4709_v50 = vmul.f32 %v4184_v47, %v3485_v40  ;;  %3833 = vperm.xlu1 %5965, %v6399_v11   ;;  %3828 = vperm.xlu0 %5964, %v6401_v14   ;;  %6444 = vpow2.f32 %v5368_v36  ;;  %v1955_v34 = vadd.f32 %v8511_v44, %v399_v63  ;;  %v298_v47 = vld [vmem:[%s10026_s1 + $0x210] sm:$0xff] }
 0x1ca   :  { %v4708_v51 = vmul.f32 %v4179_v48, %v3484_v42  ;;  %v6421_v53 = vpop.eup %6420  ;;  %6446 = vrcp.f32 %v2807_v45  ;;  %v2909_v46 = vadd.f32 1.0, %v6419_v49  ;;  %v8535_v2 = vpop.f32.mrf.mxu1 }
 0x1cb   :  { %v6423_v54 = vpop.eup %6422  ;;  %6448 = vrcp.f32 %v2806_v39  ;;  %v2908_v55 = vadd.f32 1.0, %v6421_v53  ;;  %4914 = vst.msk [vmem:[%s10028_s4 + $0x3d8] sm:$0xff] %vm4790_vm2, %v4709_v50  ;;  %v8554_v13 = vpop.f32.mrf.mxu0 }
 0x1cc   :  { %4913 = vst.msk [vmem:[%s10028_s4 + $0x3d0] sm:$0xff] %vm4790_vm2, %v4708_v51  ;;  %v6425_v60 = vpop.eup %6424  ;;  %6450 = vrcp.f32 %v2909_v46  ;;  %v2809_v57 = vadd.f32 1.0, %v6423_v54  ;;  %v3684_v59 = vpop.permute.xlu1 %3683  ;;  %v401_v51 = vld [vmem:[%s10026_s1 + $0x548] sm:$0xff]  ;;  %v5269_v46 = vmul.f32 -1.442695, %v1445_v28 }
 0x1cd   :  { %v3679_v61 = vpop.permute.xlu0 %3678  ;;  %v6427_v62 = vpop.eup %6426  ;;  %6452 = vrcp.f32 %v2908_v55  ;;  %v2808_v0 = vadd.f32 1.0, %v6425_v60  ;;  %v4609_v1 = vmul.f32 %v3684_v59, %v3385_v32  ;;  %4343 = vperm.xlu1 %5965, %v8469_v19   ;;  %4338 = vperm.xlu0 %5964, %v8471_v5   ;;  %v398_v5 = vld [vmem:[%s10026_s1 + $0x530] sm:$0xff]  ;;  %v3489_v32 = vld [vmem:[%s10027_s3 + $0x3f8] sm:$0xff]  ;;  %v301_v60 = vld [vmem:[%s10026_s1 + $0x228] sm:$0xff] }
 0x1ce   :  { %v4608_v4 = vmul.f32 %v3679_v61, %v3384_v37  ;;  %v6429_v6 = vpop.eup %6428  ;;  %6454 = vrcp.f32 %v2809_v57  ;;  %v2911_v7 = vadd.f32 1.0, %v6427_v62  ;;  %v8567_v22 = vpop.f32.mrf.mxu1  ;;  %v1950_v45 = vadd.f32 %v8529_v56, %v398_v5  ;;  %v3488_v37 = vld [vmem:[%s10027_s3 + $0x3f0] sm:$0xff] }
 0x1cf   :  { %v6431_v10 = vpop.eup %6430  ;;  %6456 = vrcp.f32 %v2808_v0  ;;  %v2910_v11 = vadd.f32 1.0, %v6429_v6  ;;  %4814 = vst.msk [vmem:[%s10028_s4 + $0xb8] sm:$0xff] %vm4790_vm2, %v4609_v1  ;;  %v8569_v23 = vpop.f32.mrf.mxu0  ;;  %v5268_v56 = vmul.f32 -1.442695, %v1440_v33  ;;  %v5371_v62 = vmul.f32 -1.442695, %v1955_v34 }
 0x1d0   :  { %4813 = vst.msk [vmem:[%s10028_s4 + $0xb0] sm:$0xff] %vm4790_vm2, %v4608_v4  ;;  %v6433_v14 = vpop.eup %6432  ;;  %6458 = vrcp.f32 %v2911_v7  ;;  %v2811_v15 = vadd.f32 1.0, %v6431_v10  ;;  %v4194_v16 = vpop.permute.xlu1 %4193  ;;  %v5370_v0 = vmul.f32 -1.442695, %v1950_v45  ;;  %v1965_v6 = vadd.f32 %v8535_v2, %v401_v51  ;;  %v300_v7 = vld [vmem:[%s10026_s1 + $0x220] sm:$0xff]  ;;  %v402_v2 = vld [vmem:[%s10026_s1 + $0x550] sm:$0xff] }
 0x1d1   :  { %v4189_v9 = vpop.permute.xlu0 %4188  ;;  %v6435_v18 = vpop.eup %6434  ;;  %6460 = vrcp.f32 %v2910_v11  ;;  %v2810_v19 = vadd.f32 1.0, %v6433_v14  ;;  %v4711_v20 = vmul.f32 %v4194_v16, %v3487_v8  ;;  %3843 = vperm.xlu1 %5965, %v8479_v26   ;;  %3838 = vperm.xlu0 %5964, %v8489_v27   ;;  %v3387_v26 = vld [vmem:[%s10027_s3 + $0xc8] sm:$0xff]  ;;  %v3386_v27 = vld [vmem:[%s10027_s3 + $0xc0] sm:$0xff]  ;;  %v3388_v16 = vld [vmem:[%s10027_s3 + $0xd0] sm:$0xff] }
 0x1d2   :  { %v4710_v21 = vmul.f32 %v4189_v9, %v3486_v3  ;;  %v6437_v24 = vpop.eup %6436  ;;  %6462 = vrcp.f32 %v2811_v15  ;;  %v2913_v25 = vadd.f32 1.0, %v6435_v18  ;;  %v8590_v36 = vpop.f32.mrf.mxu1  ;;  %v3389_v15 = vld [vmem:[%s10027_s3 + $0xd8] sm:$0xff]  ;;  %v1465_v9 = vadd.f32 %v8569_v23, %v301_v60  ;;  %v404_v45 = vld [vmem:[%s10026_s1 + $0x560] sm:$0xff] }
 0x1d3   :  { %v6439_v29 = vpop.eup %6438  ;;  %6464 = vrcp.f32 %v2810_v19  ;;  %v2912_v30 = vadd.f32 1.0, %v6437_v24  ;;  %4916 = vst.msk [vmem:[%s10028_s4 + $0x3e8] sm:$0xff] %vm4790_vm2, %v4711_v20  ;;  %v1459_v44 = vpop.f32.mrf.mxu0  ;;  %v5373_v24 = vmul.f32 -1.442695, %v1965_v6 }
 0x1d4   :  { %4915 = vst.msk [vmem:[%s10028_s4 + $0x3e0] sm:$0xff] %vm4790_vm2, %v4710_v21  ;;  %v6441_v38 = vpop.eup %6440  ;;  %6466 = vrcp.f32 %v2913_v25  ;;  %v2813_v40 = vadd.f32 1.0, %v6439_v29  ;;  %v3694_v42 = vpop.permute.xlu1 %3693  ;;  %v1460_v20 = vadd.f32 %v1459_v44, %v300_v7  ;;  %v303_v21 = vld [vmem:[%s10026_s1 + $0x238] sm:$0xff]  ;;  %v1975_v25 = vadd.f32 %v8590_v36, %v403_v12  ;;  %v3491_v36 = vld [vmem:[%s10027_s3 + $0x408] sm:$0xff] }
 0x1d5   :  { %v3689_v43 = vpop.permute.xlu0 %3688  ;;  %v6443_v48 = vpop.eup %6442  ;;  %6468 = vrcp.f32 %v2912_v30  ;;  %v2812_v49 = vadd.f32 1.0, %v6441_v38  ;;  %v4611_v39 = vmul.f32 %v3694_v42, %v3387_v26  ;;  %4353 = vperm.xlu1 %5965, %v8491_v31   ;;  %4348 = vperm.xlu0 %5964, %v8495_v41   ;;  %v1455_v31 = vadd.f32 %v8531_v58, %v299_v35  ;;  %v400_v41 = vld [vmem:[%s10026_s1 + $0x540] sm:$0xff]  ;;  %v302_v26 = vld [vmem:[%s10026_s1 + $0x230] sm:$0xff]  ;;  %v405_v35 = vld [vmem:[%s10026_s1 + $0x568] sm:$0xff] }
 0x1d6   :  { %v4610_v50 = vmul.f32 %v3689_v43, %v3386_v27  ;;  %v6445_v52 = vpop.eup %6444  ;;  %6470 = vrcp.f32 %v2813_v40  ;;  %v2915_v53 = vadd.f32 1.0, %v6443_v48  ;;  %v1450_v58 = vadd.f32 %v8554_v13, %v298_v47  ;;  %v1969_v57 = vpop.f32.mrf.mxu1  ;;  %v3490_v40 = vld [vmem:[%s10027_s3 + $0x400] sm:$0xff] }
 0x1d7   :  { %v6447_v54 = vpop.eup %6446  ;;  %6472 = vrcp.f32 %v2812_v49  ;;  %v2914_v55 = vadd.f32 1.0, %v6445_v52  ;;  %4816 = vst.msk [vmem:[%s10028_s4 + $0xc8] sm:$0xff] %vm4790_vm2, %v4611_v39  ;;  %v5746_v59 = vpop.f32.mrf.mxu0  ;;  %v1960_v11 = vadd.f32 %v8567_v22, %v400_v41  ;;  %v5271_v14 = vmul.f32 -1.442695, %v1455_v31 }
 0x1d8   :  { %4815 = vst.msk [vmem:[%s10028_s4 + $0xc0] sm:$0xff] %vm4790_vm2, %v4610_v50  ;;  %v6449_v61 = vpop.eup %6448  ;;  %6474 = vrcp.f32 %v2915_v53  ;;  %v4204_v1 = vpop.permute.xlu1 %4203  ;;  %v5270_v19 = vmul.f32 -1.442695, %v1450_v58  ;;  %v1970_v28 = vadd.f32 %v1969_v57, %v402_v2  ;;  %v5273_v42 = vmul.f32 -1.442695, %v1465_v9 }
 0x1d9   :  { %v4199_v4 = vpop.permute.xlu0 %4198  ;;  %v6451_v8 = vpop.eup %6450  ;;  %6476 = vrcp.f32 %v2914_v55  ;;  %v4713_v3 = vmul.f32 %v4204_v1, %v3489_v32  ;;  %3853 = vperm.xlu1 %5965, %v6447_v54   ;;  %3848 = vperm.xlu0 %5964, %v6449_v61   ;;  %v5372_v33 = vmul.f32 -1.442695, %v1960_v11  ;;  %v1475_v43 = vadd.f32 %v5746_v59, %v303_v21  ;;  %v3391_v54 = vld [vmem:[%s10027_s3 + $0xe8] sm:$0xff]  ;;  %v3390_v55 = vld [vmem:[%s10027_s3 + $0xe0] sm:$0xff] }
 0x1da   :  { %v4712_v10 = vmul.f32 %v4199_v4, %v3488_v37  ;;  %v6453_v13 = vpop.eup %6452  ;;  %6478 = vpow2.f32 %v5269_v46  ;;  %v5899_v17 = vpop.f32.mrf.mxu1  ;;  %v5272_v48 = vmul.f32 -1.442695, %v1460_v20  ;;  %v5375_v44 = vmul.f32 -1.442695, %v1975_v25 }
 0x1db   :  { %v6455_v18 = vpop.eup %6454  ;;  %6480 = vpow2.f32 %v5268_v56  ;;  %4918 = vst.msk [vmem:[%s10028_s4 + $0x3f8] sm:$0xff] %vm4790_vm2, %v4713_v3  ;;  %v1469_v63 = vpop.f32.mrf.mxu0  ;;  %v5374_v52 = vmul.f32 -1.442695, %v1970_v28  ;;  %v1985_v53 = vadd.f32 %v5899_v17, %v405_v35  ;;  %v5275_v56 = vmul.f32 -1.442695, %v1475_v43  ;;  %v3493_v3 = vld [vmem:[%s10027_s3 + $0x418] sm:$0xff] }
 0x1dc   :  { %4917 = vst.msk [vmem:[%s10028_s4 + $0x3f0] sm:$0xff] %vm4790_vm2, %v4712_v10  ;;  %v6457_v5 = vpop.eup %6456  ;;  %6482 = vpow2.f32 %v5371_v62  ;;  %v3704_v22 = vpop.permute.xlu1 %3703  ;;  %v1470_v49 = vadd.f32 %v1469_v63, %v302_v26  ;;  %v3492_v10 = vld [vmem:[%s10027_s3 + $0x410] sm:$0xff]  ;;  %v3393_v63 = vld [vmem:[%s10027_s3 + $0xf8] sm:$0xff]  ;;  %v3495_v43 = vld [vmem:[%s10027_s3 + $0x428] sm:$0xff] }
 0x1dd   :  { %v3699_v23 = vpop.permute.xlu0 %3698  ;;  %v6459_v27 = vpop.eup %6458  ;;  %6484 = vpow2.f32 %v5370_v0  ;;  %v4613_v29 = vmul.f32 %v3704_v22, %v3389_v15  ;;  %4363 = vperm.xlu1 %5965, %v6451_v8   ;;  %4358 = vperm.xlu0 %5964, %v6453_v13   ;;  %v5377_v62 = vmul.f32 -1.442695, %v1985_v53 }
 0x1de   :  { %v4612_v30 = vmul.f32 %v3699_v23, %v3388_v16  ;;  %v6461_v38 = vpop.eup %6460  ;;  %6486 = vpow2.f32 %v5271_v14  ;;  %v1979_v34 = vpop.f32.mrf.mxu1  ;;  %v5274_v60 = vmul.f32 -1.442695, %v1470_v49 }
 0x1df   :  { %v6463_v47 = vpop.eup %6462  ;;  %6488 = vpow2.f32 %v5270_v19  ;;  %4818 = vst.msk [vmem:[%s10028_s4 + $0xd8] sm:$0xff] %vm4790_vm2, %v4613_v29  ;;  %v1980_v31 = vadd.f32 %v1979_v34, %v404_v45  ;;  %v8701_v7 = vpop.f32.mrf.mxu0  ;;  %v3494_v34 = vld [vmem:[%s10027_s3 + $0x420] sm:$0xff] }
 0x1e0   :  { %4817 = vst.msk [vmem:[%s10028_s4 + $0xd0] sm:$0xff] %vm4790_vm2, %v4612_v30  ;;  %v6465_v39 = vpop.eup %6464  ;;  %6490 = vpow2.f32 %v5373_v24  ;;  %v4214_v50 = vpop.permute.xlu1 %4213 }
 0x1e1   :  { %v4209_v51 = vpop.permute.xlu0 %4208  ;;  %v8677_v46 = vpop.eup %6466  ;;  %6492 = vpow2.f32 %v5372_v33  ;;  %v4715_v32 = vmul.f32 %v4214_v50, %v3491_v36  ;;  %3863 = vperm.xlu1 %5965, %v6455_v18   ;;  %3858 = vperm.xlu0 %5964, %v6457_v5   ;;  %v5376_v6 = vmul.f32 -1.442695, %v1980_v31  ;;  %v3392_v5 = vld [vmem:[%s10027_s3 + $0xf0] sm:$0xff]  ;;  %v407_v31 = vld [vmem:[%s10026_s1 + $0x578] sm:$0xff] }
 0x1e2   :  { %v4714_v37 = vmul.f32 %v4209_v51, %v3490_v40  ;;  %v8679_v41 = vpop.eup %6468  ;;  %6494 = vpow2.f32 %v5273_v42  ;;  %v8719_v12 = vpop.f32.mrf.mxu1 }
 0x1e3   :  { %v8687_v58 = vpop.eup %6470  ;;  %4920 = vst.msk [vmem:[%s10028_s4 + $0x408] sm:$0xff] %vm4790_vm2, %v4715_v32  ;;  %6496 = vpow2.f32 %v5272_v48  ;;  %v8721_v19 = vpop.f32.mrf.mxu0  ;;  %v305_v48 = vld [vmem:[%s10026_s1 + $0x248] sm:$0xff] }
 0x1e4   :  { %4919 = vst.msk [vmem:[%s10028_s4 + $0x400] sm:$0xff] %vm4790_vm2, %v4714_v37  ;;  %v8697_v57 = vpop.eup %6472  ;;  %v3714_v59 = vpop.permute.xlu1 %3713  ;;  %6498 = vpow2.f32 %v5375_v44 }
 0x1e5   :  { %v3709_v61 = vpop.permute.xlu0 %3708  ;;  %v8699_v0 = vpop.eup %6474  ;;  %v4615_v1 = vmul.f32 %v3714_v59, %v3391_v54  ;;  %4373 = vperm.xlu1 %5965, %v6459_v27   ;;  %4368 = vperm.xlu0 %5964, %v6461_v38   ;;  %6500 = vpow2.f32 %v5374_v52  ;;  %v304_v52 = vld [vmem:[%s10026_s1 + $0x240] sm:$0xff]  ;;  %v1485_v59 = vadd.f32 %v8701_v7, %v305_v48  ;;  %v411_v48 = vld [vmem:[%s10026_s1 + $0x598] sm:$0xff] }
 0x1e6   :  { %v4614_v4 = vmul.f32 %v3709_v61, %v3390_v55  ;;  %v8703_v8 = vpop.eup %6476  ;;  %6502 = vpow2.f32 %v5275_v56  ;;  %v8737_v24 = vpop.f32.mrf.mxu1 }
 0x1e7   :  { %v6479_v11 = vpop.eup %6478  ;;  %4820 = vst.msk [vmem:[%s10028_s4 + $0xe8] sm:$0xff] %vm4790_vm2, %v4615_v1  ;;  %6504 = vpow2.f32 %v5274_v60  ;;  %v8739_v25 = vpop.f32.mrf.mxu0  ;;  %v1480_v1 = vadd.f32 %v8721_v19, %v304_v52 }
 0x1e8   :  { %4819 = vst.msk [vmem:[%s10028_s4 + $0xe0] sm:$0xff] %vm4790_vm2, %v4614_v4  ;;  %v6481_v2 = vpop.eup %6480  ;;  %v2815_v13 = vadd.f32 1.0, %v6479_v11  ;;  %v4224_v14 = vpop.permute.xlu1 %4223  ;;  %6506 = vpow2.f32 %v5377_v62  ;;  %v307_v4 = vld [vmem:[%s10026_s1 + $0x258] sm:$0xff] }
 0x1e9   :  { %v4219_v15 = vpop.permute.xlu0 %4218  ;;  %v6483_v16 = vpop.eup %6482  ;;  %v2814_v9 = vadd.f32 1.0, %v6481_v2  ;;  %v4717_v17 = vmul.f32 %v4224_v14, %v3493_v3  ;;  %3873 = vperm.xlu1 %5965, %v6463_v47   ;;  %3868 = vperm.xlu0 %5964, %v6465_v39   ;;  %6508 = vpow2.f32 %v5376_v6  ;;  %v1995_v2 = vadd.f32 %v8719_v12, %v407_v31  ;;  %v306_v14 = vld [vmem:[%s10026_s1 + $0x250] sm:$0xff] }
 0x1ea   :  { %v4716_v18 = vmul.f32 %v4219_v15, %v3492_v10  ;;  %v6485_v20 = vpop.eup %6484  ;;  %6510 = vrcp.f32 %v2815_v13  ;;  %v2917_v21 = vadd.f32 1.0, %v6483_v16  ;;  %v8743_v36 = vpop.f32.mrf.mxu1 }
 0x1eb   :  { %v6487_v22 = vpop.eup %6486  ;;  %6512 = vrcp.f32 %v2814_v9  ;;  %v2916_v23 = vadd.f32 1.0, %v6485_v20  ;;  %4922 = vst.msk [vmem:[%s10028_s4 + $0x418] sm:$0xff] %vm4790_vm2, %v4717_v17  ;;  %v8762_v49 = vpop.f32.mrf.mxu0 }
 0x1ec   :  { %4921 = vst.msk [vmem:[%s10028_s4 + $0x410] sm:$0xff] %vm4790_vm2, %v4716_v18  ;;  %v6489_v28 = vpop.eup %6488  ;;  %6514 = vrcp.f32 %v2917_v21  ;;  %v2817_v26 = vadd.f32 1.0, %v6487_v22  ;;  %v3724_v27 = vpop.permute.xlu1 %3723  ;;  %v409_v18 = vld [vmem:[%s10026_s1 + $0x588] sm:$0xff]  ;;  %v5277_v21 = vmul.f32 -1.442695, %v1485_v59 }
 0x1ed   :  { %v3719_v29 = vpop.permute.xlu0 %3718  ;;  %v6491_v30 = vpop.eup %6490  ;;  %6516 = vrcp.f32 %v2916_v23  ;;  %v2816_v33 = vadd.f32 1.0, %v6489_v28  ;;  %v4617_v35 = vmul.f32 %v3724_v27, %v3393_v63  ;;  %4383 = vperm.xlu1 %5965, %v8677_v46   ;;  %4378 = vperm.xlu0 %5964, %v8679_v41   ;;  %v406_v41 = vld [vmem:[%s10026_s1 + $0x570] sm:$0xff]  ;;  %v3497_v63 = vld [vmem:[%s10027_s3 + $0x438] sm:$0xff]  ;;  %v309_v28 = vld [vmem:[%s10026_s1 + $0x268] sm:$0xff] }
 0x1ee   :  { %v4616_v38 = vmul.f32 %v3719_v29, %v3392_v5  ;;  %v6493_v40 = vpop.eup %6492  ;;  %6518 = vrcp.f32 %v2817_v26  ;;  %v2919_v42 = vadd.f32 1.0, %v6491_v30  ;;  %v8775_v54 = vpop.f32.mrf.mxu1  ;;  %v1990_v13 = vadd.f32 %v8737_v24, %v406_v41  ;;  %v3496_v5 = vld [vmem:[%s10027_s3 + $0x430] sm:$0xff] }
 0x1ef   :  { %v6495_v45 = vpop.eup %6494  ;;  %6520 = vrcp.f32 %v2816_v33  ;;  %v2918_v47 = vadd.f32 1.0, %v6493_v40  ;;  %4822 = vst.msk [vmem:[%s10028_s4 + $0xf8] sm:$0xff] %vm4790_vm2, %v4617_v35  ;;  %v8777_v55 = vpop.f32.mrf.mxu0  ;;  %v5276_v24 = vmul.f32 -1.442695, %v1480_v1  ;;  %v5379_v30 = vmul.f32 -1.442695, %v1995_v2 }
 0x1f0   :  { %4821 = vst.msk [vmem:[%s10028_s4 + $0xf0] sm:$0xff] %vm4790_vm2, %v4616_v38  ;;  %v6497_v39 = vpop.eup %6496  ;;  %6522 = vrcp.f32 %v2919_v42  ;;  %v2819_v50 = vadd.f32 1.0, %v6495_v45  ;;  %v4234_v51 = vpop.permute.xlu1 %4233  ;;  %v5378_v33 = vmul.f32 -1.442695, %v1990_v13  ;;  %v2005_v40 = vadd.f32 %v8743_v36, %v409_v18  ;;  %v308_v42 = vld [vmem:[%s10026_s1 + $0x260] sm:$0xff]  ;;  %v410_v36 = vld [vmem:[%s10026_s1 + $0x590] sm:$0xff] }
 0x1f1   :  { %v4229_v44 = vpop.permute.xlu0 %4228  ;;  %v6499_v53 = vpop.eup %6498  ;;  %6524 = vrcp.f32 %v2918_v47  ;;  %v2818_v46 = vadd.f32 1.0, %v6497_v39  ;;  %v4719_v32 = vmul.f32 %v4234_v51, %v3495_v43  ;;  %3883 = vperm.xlu1 %5965, %v8687_v58   ;;  %3878 = vperm.xlu0 %5964, %v8697_v57   ;;  %v3395_v58 = vld [vmem:[%s10027_s3 + $0x108] sm:$0xff]  ;;  %v3394_v57 = vld [vmem:[%s10027_s3 + $0x100] sm:$0xff]  ;;  %v3396_v51 = vld [vmem:[%s10027_s3 + $0x110] sm:$0xff] }
 0x1f2   :  { %v4718_v37 = vmul.f32 %v4229_v44, %v3494_v34  ;;  %v6501_v56 = vpop.eup %6500  ;;  %6526 = vrcp.f32 %v2819_v50  ;;  %v2921_v60 = vadd.f32 1.0, %v6499_v53  ;;  %v8798_v6 = vpop.f32.mrf.mxu1  ;;  %v3397_v50 = vld [vmem:[%s10027_s3 + $0x118] sm:$0xff]  ;;  %v1505_v44 = vadd.f32 %v8777_v55, %v309_v28  ;;  %v412_v13 = vld [vmem:[%s10026_s1 + $0x5a0] sm:$0xff] }
 0x1f3   :  { %v6503_v61 = vpop.eup %6502  ;;  %6528 = vrcp.f32 %v2818_v46  ;;  %v2920_v62 = vadd.f32 1.0, %v6501_v56  ;;  %4924 = vst.msk [vmem:[%s10028_s4 + $0x428] sm:$0xff] %vm4790_vm2, %v4719_v32  ;;  %v1499_v12 = vpop.f32.mrf.mxu0  ;;  %v5381_v56 = vmul.f32 -1.442695, %v2005_v40 }
 0x1f4   :  { %4923 = vst.msk [vmem:[%s10028_s4 + $0x420] sm:$0xff] %vm4790_vm2, %v4718_v37  ;;  %v6505_v7 = vpop.eup %6504  ;;  %6530 = vrcp.f32 %v2921_v60  ;;  %v2821_v3 = vadd.f32 1.0, %v6503_v61  ;;  %v3734_v10 = vpop.permute.xlu1 %3733  ;;  %v1500_v32 = vadd.f32 %v1499_v12, %v308_v42  ;;  %v311_v37 = vld [vmem:[%s10026_s1 + $0x278] sm:$0xff]  ;;  %v2015_v60 = vadd.f32 %v8798_v6, %v411_v48  ;;  %v3499_v6 = vld [vmem:[%s10027_s3 + $0x448] sm:$0xff] }
 0x1f5   :  { %v3729_v11 = vpop.permute.xlu0 %3728  ;;  %v6507_v15 = vpop.eup %6506  ;;  %6532 = vrcp.f32 %v2920_v62  ;;  %v2820_v16 = vadd.f32 1.0, %v6505_v7  ;;  %v4619_v9 = vmul.f32 %v3734_v10, %v3395_v58  ;;  %4393 = vperm.xlu1 %5965, %v8699_v0   ;;  %4388 = vperm.xlu0 %5964, %v8703_v8   ;;  %v1495_v0 = vadd.f32 %v8739_v25, %v307_v4  ;;  %v408_v8 = vld [vmem:[%s10026_s1 + $0x580] sm:$0xff]  ;;  %v310_v58 = vld [vmem:[%s10026_s1 + $0x270] sm:$0xff]  ;;  %v413_v4 = vld [vmem:[%s10026_s1 + $0x5a8] sm:$0xff] }
 0x1f6   :  { %v4618_v17 = vmul.f32 %v3729_v11, %v3394_v57  ;;  %v6509_v19 = vpop.eup %6508  ;;  %6534 = vrcp.f32 %v2821_v3  ;;  %v2923_v20 = vadd.f32 1.0, %v6507_v15  ;;  %v1490_v25 = vadd.f32 %v8762_v49, %v306_v14  ;;  %v2009_v26 = vpop.f32.mrf.mxu1  ;;  %v3498_v3 = vld [vmem:[%s10027_s3 + $0x440] sm:$0xff] }
 0x1f7   :  { %v6511_v22 = vpop.eup %6510  ;;  %6536 = vrcp.f32 %v2820_v16  ;;  %v2922_v23 = vadd.f32 1.0, %v6509_v19  ;;  %4824 = vst.msk [vmem:[%s10028_s4 + $0x108] sm:$0xff] %vm4790_vm2, %v4619_v9  ;;  %v5758_v27 = vpop.f32.mrf.mxu0  ;;  %v2000_v47 = vadd.f32 %v8775_v54, %v408_v8  ;;  %v5279_v39 = vmul.f32 -1.442695, %v1495_v0 }
 0x1f8   :  { %4823 = vst.msk [vmem:[%s10028_s4 + $0x100] sm:$0xff] %vm4790_vm2, %v4618_v17  ;;  %v6513_v29 = vpop.eup %6512  ;;  %6538 = vrcp.f32 %v2923_v20  ;;  %v4244_v35 = vpop.permute.xlu1 %4243  ;;  %v5278_v46 = vmul.f32 -1.442695, %v1490_v25  ;;  %v2010_v59 = vadd.f32 %v2009_v26, %v410_v36  ;;  %v5281_v10 = vmul.f32 -1.442695, %v1505_v44 }
 0x1f9   :  { %v4239_v38 = vpop.permute.xlu0 %4238  ;;  %v6515_v43 = vpop.eup %6514  ;;  %6540 = vrcp.f32 %v2922_v23  ;;  %v4721_v34 = vmul.f32 %v4244_v35, %v3497_v63  ;;  %3893 = vperm.xlu1 %5965, %v6511_v22   ;;  %3888 = vperm.xlu0 %5964, %v6513_v29   ;;  %v5380_v1 = vmul.f32 -1.442695, %v2000_v47  ;;  %v1515_v11 = vadd.f32 %v5758_v27, %v311_v37  ;;  %v3399_v22 = vld [vmem:[%s10027_s3 + $0x128] sm:$0xff]  ;;  %v3398_v23 = vld [vmem:[%s10027_s3 + $0x120] sm:$0xff] }
 0x1fa   :  { %v4720_v45 = vmul.f32 %v4239_v38, %v3496_v5  ;;  %v6517_v49 = vpop.eup %6516  ;;  %6542 = vpow2.f32 %v5277_v21  ;;  %v5911_v52 = vpop.f32.mrf.mxu1  ;;  %v5280_v15 = vmul.f32 -1.442695, %v1500_v32  ;;  %v5383_v12 = vmul.f32 -1.442695, %v2015_v60 }
 0x1fb   :  { %v6519_v53 = vpop.eup %6518  ;;  %6544 = vpow2.f32 %v5276_v24  ;;  %4926 = vst.msk [vmem:[%s10028_s4 + $0x438] sm:$0xff] %vm4790_vm2, %v4721_v34  ;;  %v1509_v31 = vpop.f32.mrf.mxu0  ;;  %v5382_v19 = vmul.f32 -1.442695, %v2010_v59  ;;  %v2025_v20 = vadd.f32 %v5911_v52, %v413_v4  ;;  %v5283_v24 = vmul.f32 -1.442695, %v1515_v11  ;;  %v3501_v34 = vld [vmem:[%s10027_s3 + $0x458] sm:$0xff] }
 0x1fc   :  { %4925 = vst.msk [vmem:[%s10028_s4 + $0x430] sm:$0xff] %vm4790_vm2, %v4720_v45  ;;  %v6521_v41 = vpop.eup %6520  ;;  %6546 = vpow2.f32 %v5379_v30  ;;  %v3744_v54 = vpop.permute.xlu1 %3743  ;;  %v1510_v16 = vadd.f32 %v1509_v31, %v310_v58  ;;  %v3500_v45 = vld [vmem:[%s10027_s3 + $0x450] sm:$0xff]  ;;  %v3401_v31 = vld [vmem:[%s10027_s3 + $0x138] sm:$0xff]  ;;  %v3502_v11 = vld [vmem:[%s10027_s3 + $0x460] sm:$0xff] }
 0x1fd   :  { %v3739_v55 = vpop.permute.xlu0 %3738  ;;  %v6523_v57 = vpop.eup %6522  ;;  %6548 = vpow2.f32 %v5378_v33  ;;  %v4621_v61 = vmul.f32 %v3744_v54, %v3397_v50  ;;  %4403 = vperm.xlu1 %5965, %v6515_v43   ;;  %4398 = vperm.xlu0 %5964, %v6517_v49   ;;  %v5385_v30 = vmul.f32 -1.442695, %v2025_v20 }
 0x1fe   :  { %v4620_v62 = vmul.f32 %v3739_v55, %v3396_v51  ;;  %v6525_v7 = vpop.eup %6524  ;;  %6550 = vpow2.f32 %v5279_v39  ;;  %v2019_v2 = vpop.f32.mrf.mxu1  ;;  %v5282_v28 = vmul.f32 -1.442695, %v1510_v16 }
 0x1ff   :  { %v6527_v14 = vpop.eup %6526  ;;  %6552 = vpow2.f32 %v5278_v46  ;;  %4826 = vst.msk [vmem:[%s10028_s4 + $0x118] sm:$0xff] %vm4790_vm2, %v4621_v61  ;;  %v2020_v0 = vadd.f32 %v2019_v2, %v412_v13  ;;  %v8909_v42 = vpop.f32.mrf.mxu0 }
 0x200   :  { %4825 = vst.msk [vmem:[%s10028_s4 + $0x110] sm:$0xff] %vm4790_vm2, %v4620_v62  ;;  %v6529_v9 = vpop.eup %6528  ;;  %6554 = vpow2.f32 %v5381_v56  ;;  %v4254_v17 = vpop.permute.xlu1 %4253 }
 0x201   :  { %v4249_v18 = vpop.permute.xlu0 %4248  ;;  %v8885_v21 = vpop.eup %6530  ;;  %6556 = vpow2.f32 %v5380_v1  ;;  %v4723_v63 = vmul.f32 %v4254_v17, %v3499_v6  ;;  %3903 = vperm.xlu1 %5965, %v6519_v53   ;;  %3898 = vperm.xlu0 %5964, %v6521_v41   ;;  %v5384_v40 = vmul.f32 -1.442695, %v2020_v0  ;;  %v3400_v41 = vld [vmem:[%s10027_s3 + $0x130] sm:$0xff]  ;;  %v415_v0 = vld [vmem:[%s10026_s1 + $0x5b8] sm:$0xff] }
 0x202   :  { %v4722_v5 = vmul.f32 %v4249_v18, %v3498_v3  ;;  %v8887_v8 = vpop.eup %6532  ;;  %6558 = vpow2.f32 %v5281_v10  ;;  %v8927_v53 = vpop.f32.mrf.mxu0  ;;  %v3503_v10 = vld [vmem:[%s10027_s3 + $0x468] sm:$0xff] }
 0x203   :  { %v8895_v25 = vpop.eup %6534  ;;  %4928 = vst.msk [vmem:[%s10028_s4 + $0x448] sm:$0xff] %vm4790_vm2, %v4723_v63  ;;  %6560 = vpow2.f32 %v5280_v15  ;;  %v8929_v46 = vpop.f32.mrf.mxu1 }
 0x204   :  { %4927 = vst.msk [vmem:[%s10028_s4 + $0x440] sm:$0xff] %vm4790_vm2, %v4722_v5  ;;  %v8905_v26 = vpop.eup %6536  ;;  %v3754_v27 = vpop.permute.xlu1 %3753  ;;  %6562 = vpow2.f32 %v5383_v12 }
 0x205   :  { %v3749_v29 = vpop.permute.xlu0 %3748  ;;  %v8907_v33 = vpop.eup %6538  ;;  %v4623_v35 = vmul.f32 %v3754_v27, %v3399_v22  ;;  %4413 = vperm.xlu1 %5965, %v6523_v57   ;;  %4408 = vperm.xlu0 %5964, %v6525_v7   ;;  %6564 = vpow2.f32 %v5382_v19  ;;  %v312_v19 = vld [vmem:[%s10026_s1 + $0x280] sm:$0xff] }
 0x206   :  { %v4622_v38 = vmul.f32 %v3749_v29, %v3398_v23  ;;  %v8911_v43 = vpop.eup %6540  ;;  %6566 = vpow2.f32 %v5283_v24  ;;  %v8945_v56 = vpop.f32.mrf.mxu0 }
 0x207   :  { %v6543_v47 = vpop.eup %6542  ;;  %4828 = vst.msk [vmem:[%s10028_s4 + $0x128] sm:$0xff] %vm4790_vm2, %v4623_v35  ;;  %6568 = vpow2.f32 %v5282_v28  ;;  %v2029_v7 = vpop.f32.mrf.mxu1  ;;  %v315_v35 = vld [vmem:[%s10026_s1 + $0x298] sm:$0xff] }
 0x208   :  { %4827 = vst.msk [vmem:[%s10028_s4 + $0x120] sm:$0xff] %vm4790_vm2, %v4622_v38  ;;  %v6545_v48 = vpop.eup %6544  ;;  %v2823_v36 = vadd.f32 1.0, %v6543_v47  ;;  %v4264_v49 = vpop.permute.xlu1 %4263  ;;  %6570 = vpow2.f32 %v5385_v30  ;;  %v1520_v30 = vadd.f32 %v8927_v53, %v312_v19  ;;  %v2035_v47 = vadd.f32 %v8929_v46, %v415_v0 }
 0x209   :  { %v4259_v39 = vpop.permute.xlu0 %4258  ;;  %v6547_v50 = vpop.eup %6546  ;;  %v2822_v51 = vadd.f32 1.0, %v6545_v48  ;;  %v4725_v44 = vmul.f32 %v4264_v49, %v3501_v34  ;;  %3913 = vperm.xlu1 %5965, %v6527_v14   ;;  %3908 = vperm.xlu0 %5964, %v6529_v9   ;;  %6572 = vpow2.f32 %v5384_v40  ;;  %v313_v14 = vld [vmem:[%s10026_s1 + $0x288] sm:$0xff] }
 0x20a   :  { %v4724_v52 = vmul.f32 %v4259_v39, %v3500_v45  ;;  %v6549_v32 = vpop.eup %6548  ;;  %6574 = vrcp.f32 %v2823_v36  ;;  %v2925_v37 = vadd.f32 1.0, %v6547_v50  ;;  %v8966_v15 = vpop.f32.mrf.mxu0  ;;  %v1525_v28 = vadd.f32 %v8909_v42, %v313_v14  ;;  %v314_v36 = vld [vmem:[%s10026_s1 + $0x290] sm:$0xff] }
 0x20b   :  { %v6551_v54 = vpop.eup %6550  ;;  %6576 = vrcp.f32 %v2822_v51  ;;  %v2924_v55 = vadd.f32 1.0, %v6549_v32  ;;  %4930 = vst.msk [vmem:[%s10028_s4 + $0x458] sm:$0xff] %vm4790_vm2, %v4725_v44  ;;  %v8968_v16 = vpop.f32.mrf.mxu1  ;;  %v417_v44 = vld [vmem:[%s10026_s1 + $0x5c8] sm:$0xff] }
 0x20c   :  { %4929 = vst.msk [vmem:[%s10028_s4 + $0x450] sm:$0xff] %vm4790_vm2, %v4724_v52  ;;  %v6553_v60 = vpop.eup %6552  ;;  %6578 = vrcp.f32 %v2925_v37  ;;  %v2825_v59 = vadd.f32 1.0, %v6551_v54  ;;  %v3764_v58 = vpop.permute.xlu1 %3763  ;;  %v416_v52 = vld [vmem:[%s10026_s1 + $0x5c0] sm:$0xff]  ;;  %v5285_v37 = vmul.f32 -1.442695, %v1525_v28 }
 0x20d   :  { %v3759_v57 = vpop.permute.xlu0 %3758  ;;  %v6555_v61 = vpop.eup %6554  ;;  %6580 = vrcp.f32 %v2924_v55  ;;  %v2824_v62 = vadd.f32 1.0, %v6553_v60  ;;  %v4625_v1 = vmul.f32 %v3764_v58, %v3401_v31  ;;  %4423 = vperm.xlu1 %5965, %v8885_v21   ;;  %4418 = vperm.xlu0 %5964, %v8887_v8   ;;  %v414_v8 = vld [vmem:[%s10026_s1 + $0x5b0] sm:$0xff]  ;;  %v3505_v31 = vld [vmem:[%s10027_s3 + $0x478] sm:$0xff]  ;;  %v5284_v60 = vmul.f32 -1.442695, %v1520_v30 }
 0x20e   :  { %v4624_v4 = vmul.f32 %v3759_v57, %v3400_v41  ;;  %v6557_v6 = vpop.eup %6556  ;;  %6582 = vrcp.f32 %v2825_v59  ;;  %v2927_v3 = vadd.f32 1.0, %v6555_v61  ;;  %v8981_v22 = vpop.f32.mrf.mxu0  ;;  %v2030_v48 = vadd.f32 %v2029_v7, %v414_v8 }
 0x20f   :  { %v6559_v2 = vpop.eup %6558  ;;  %6584 = vrcp.f32 %v2824_v62  ;;  %v2926_v13 = vadd.f32 1.0, %v6557_v6  ;;  %4830 = vst.msk [vmem:[%s10028_s4 + $0x138] sm:$0xff] %vm4790_vm2, %v4625_v1  ;;  %v2039_v38 = vpop.f32.mrf.mxu1  ;;  %v1530_v59 = vadd.f32 %v8966_v15, %v314_v36  ;;  %v5387_v61 = vmul.f32 -1.442695, %v2035_v47  ;;  %v316_v6 = vld [vmem:[%s10026_s1 + $0x2a0] sm:$0xff] }
 0x210   :  { %4829 = vst.msk [vmem:[%s10028_s4 + $0x130] sm:$0xff] %vm4790_vm2, %v4624_v4  ;;  %v6561_v9 = vpop.eup %6560  ;;  %6586 = vrcp.f32 %v2927_v3  ;;  %v2827_v17 = vadd.f32 1.0, %v6559_v2  ;;  %v4274_v18 = vpop.permute.xlu1 %4273  ;;  %v2045_v4 = vadd.f32 %v8968_v16, %v417_v44  ;;  %v2040_v7 = vadd.f32 %v2039_v38, %v416_v52  ;;  %v3405_v16 = vld [vmem:[%s10027_s3 + $0x158] sm:$0xff]  ;;  %v3507_v38 = vld [vmem:[%s10027_s3 + $0x488] sm:$0xff] }
 0x211   :  { %v4269_v12 = vpop.permute.xlu0 %4268  ;;  %v6563_v20 = vpop.eup %6562  ;;  %6588 = vrcp.f32 %v2926_v13  ;;  %v2826_v21 = vadd.f32 1.0, %v6561_v9  ;;  %v4727_v63 = vmul.f32 %v4274_v18, %v3503_v10  ;;  %3923 = vperm.xlu1 %5965, %v8895_v25   ;;  %3918 = vperm.xlu0 %5964, %v8905_v26   ;;  %v3403_v25 = vld [vmem:[%s10027_s3 + $0x148] sm:$0xff]  ;;  %v3402_v26 = vld [vmem:[%s10027_s3 + $0x140] sm:$0xff]  ;;  %v5386_v10 = vmul.f32 -1.442695, %v2030_v48  ;;  %v419_v13 = vld [vmem:[%s10026_s1 + $0x5d8] sm:$0xff] }
 0x212   :  { %v4726_v5 = vmul.f32 %v4269_v12, %v3502_v11  ;;  %v6565_v23 = vpop.eup %6564  ;;  %6590 = vrcp.f32 %v2827_v17  ;;  %v2929_v24 = vadd.f32 1.0, %v6563_v20  ;;  %v1539_v53 = vpop.f32.mrf.mxu0  ;;  %v3404_v9 = vld [vmem:[%s10027_s3 + $0x150] sm:$0xff]  ;;  %v5286_v20 = vmul.f32 -1.442695, %v1530_v59 }
 0x213   :  { %v6567_v27 = vpop.eup %6566  ;;  %6592 = vrcp.f32 %v2826_v21  ;;  %v2928_v29 = vadd.f32 1.0, %v6565_v23  ;;  %4932 = vst.msk [vmem:[%s10028_s4 + $0x468] sm:$0xff] %vm4790_vm2, %v4727_v63  ;;  %v5920_v41 = vpop.f32.mrf.mxu1  ;;  %v418_v12 = vld [vmem:[%s10026_s1 + $0x5d0] sm:$0xff]  ;;  %v1540_v21 = vadd.f32 %v1539_v53, %v316_v6  ;;  %v319_v63 = vld [vmem:[%s10026_s1 + $0x2b8] sm:$0xff]  ;;  %v5389_v23 = vmul.f32 -1.442695, %v2045_v4 }
 0x214   :  { %4931 = vst.msk [vmem:[%s10028_s4 + $0x460] sm:$0xff] %vm4790_vm2, %v4726_v5  ;;  %v6569_v40 = vpop.eup %6568  ;;  %6594 = vrcp.f32 %v2929_v24  ;;  %v2829_v42 = vadd.f32 1.0, %v6567_v27  ;;  %v3774_v34 = vpop.permute.xlu1 %3773  ;;  %v5388_v24 = vmul.f32 -1.442695, %v2040_v7  ;;  %v2055_v28 = vadd.f32 %v5920_v41, %v419_v13  ;;  %v3509_v6 = vld [vmem:[%s10027_s3 + $0x498] sm:$0xff] }
 0x215   :  { %v3769_v45 = vpop.permute.xlu0 %3768  ;;  %v6571_v49 = vpop.eup %6570  ;;  %6596 = vrcp.f32 %v2928_v29  ;;  %v2828_v39 = vadd.f32 1.0, %v6569_v40  ;;  %v4627_v50 = vmul.f32 %v3774_v34, %v3403_v25  ;;  %4433 = vperm.xlu1 %5965, %v8907_v33   ;;  %4428 = vperm.xlu0 %5964, %v8911_v43   ;;  %v3504_v33 = vld [vmem:[%s10027_s3 + $0x470] sm:$0xff]  ;;  %v1535_v43 = vadd.f32 %v8945_v56, %v315_v35  ;;  %v317_v56 = vld [vmem:[%s10026_s1 + $0x2a8] sm:$0xff]  ;;  %v3506_v40 = vld [vmem:[%s10027_s3 + $0x480] sm:$0xff] }
 0x216   :  { %v4626_v51 = vmul.f32 %v3769_v45, %v3402_v26  ;;  %v6573_v46 = vpop.eup %6572  ;;  %6598 = vrcp.f32 %v2829_v42  ;;  %v2931_v32 = vadd.f32 1.0, %v6571_v49  ;;  %v5770_v58 = vpop.f32.mrf.mxu0  ;;  %v1545_v17 = vadd.f32 %v8981_v22, %v317_v56  ;;  %v318_v25 = vld [vmem:[%s10026_s1 + $0x2b0] sm:$0xff] }
 0x217   :  { %v6575_v54 = vpop.eup %6574  ;;  %6600 = vrcp.f32 %v2828_v39  ;;  %v2930_v55 = vadd.f32 1.0, %v6573_v46  ;;  %4832 = vst.msk [vmem:[%s10028_s4 + $0x148] sm:$0xff] %vm4790_vm2, %v4627_v50  ;;  %v5287_v15 = vmul.f32 -1.442695, %v1535_v43  ;;  %v2049_v18 = vpop.f32.mrf.mxu1  ;;  %v1555_v34 = vadd.f32 %v5770_v58, %v319_v63 }
 0x218   :  { %4831 = vst.msk [vmem:[%s10028_s4 + $0x140] sm:$0xff] %vm4790_vm2, %v4626_v51  ;;  %v6577_v57 = vpop.eup %6576  ;;  %6602 = vrcp.f32 %v2931_v32  ;;  %v4284_v62 = vpop.permute.xlu1 %4283  ;;  %v2050_v30 = vadd.f32 %v2049_v18, %v418_v12  ;;  %v5289_v42 = vmul.f32 -1.442695, %v1545_v17  ;;  %v5288_v48 = vmul.f32 -1.442695, %v1540_v21  ;;  %v421_v32 = vld [vmem:[%s10026_s1 + $0x5e8] sm:$0xff] }
 0x219   :  { %v4279_v1 = vpop.permute.xlu0 %4278  ;;  %v6579_v3 = vpop.eup %6578  ;;  %6604 = vrcp.f32 %v2930_v55  ;;  %v4729_v11 = vmul.f32 %v4284_v62, %v3505_v31  ;;  %3933 = vperm.xlu1 %5965, %v6575_v54   ;;  %3928 = vperm.xlu0 %5964, %v6577_v57   ;;  %v5391_v51 = vmul.f32 -1.442695, %v2055_v28  ;;  %v3407_v31 = vld [vmem:[%s10027_s3 + $0x168] sm:$0xff]  ;;  %v5291_v43 = vmul.f32 -1.442695, %v1555_v34  ;;  %v420_v54 = vld [vmem:[%s10026_s1 + $0x5e0] sm:$0xff] }
 0x21a   :  { %v4728_v2 = vmul.f32 %v4279_v1, %v3504_v33  ;;  %v6581_v14 = vpop.eup %6580  ;;  %6606 = vpow2.f32 %v5285_v37  ;;  %v1549_v5 = vpop.f32.mrf.mxu0  ;;  %v5390_v46 = vmul.f32 -1.442695, %v2050_v30  ;;  %v3406_v33 = vld [vmem:[%s10027_s3 + $0x160] sm:$0xff] }
 0x21b   :  { %v6583_v19 = vpop.eup %6582  ;;  %6608 = vpow2.f32 %v5284_v60  ;;  %4934 = vst.msk [vmem:[%s10028_s4 + $0x478] sm:$0xff] %vm4790_vm2, %v4729_v11  ;;  %v5923_v45 = vpop.f32.mrf.mxu1  ;;  %v1550_v36 = vadd.f32 %v1549_v5, %v318_v25  ;;  %v3409_v5 = vld [vmem:[%s10027_s3 + $0x178] sm:$0xff] }
 0x21c   :  { %4933 = vst.msk [vmem:[%s10028_s4 + $0x470] sm:$0xff] %vm4790_vm2, %v4728_v2  ;;  %v6585_v0 = vpop.eup %6584  ;;  %6610 = vpow2.f32 %v5387_v61  ;;  %v3784_v8 = vpop.permute.xlu1 %3783  ;;  %v2065_v57 = vadd.f32 %v5923_v45, %v421_v32  ;;  %v3511_v45 = vld [vmem:[%s10027_s3 + $0x4a8] sm:$0xff] }
 0x21d   :  { %v3779_v22 = vpop.permute.xlu0 %3778  ;;  %v6587_v26 = vpop.eup %6586  ;;  %6612 = vpow2.f32 %v5386_v10  ;;  %v4629_v27 = vmul.f32 %v3784_v8, %v3405_v16  ;;  %4443 = vperm.xlu1 %5965, %v6579_v3   ;;  %4438 = vperm.xlu0 %5964, %v6581_v14   ;;  %v5290_v60 = vmul.f32 -1.442695, %v1550_v36  ;;  %v3508_v3 = vld [vmem:[%s10027_s3 + $0x490] sm:$0xff] }
 0x21e   :  { %v4628_v29 = vmul.f32 %v3779_v22, %v3404_v9  ;;  %v6589_v35 = vpop.eup %6588  ;;  %6614 = vpow2.f32 %v5287_v15  ;;  %v2059_v41 = vpop.f32.mrf.mxu1  ;;  %v5393_v16 = vmul.f32 -1.442695, %v2065_v57 }
 0x21f   :  { %v6591_v47 = vpop.eup %6590  ;;  %6616 = vpow2.f32 %v5286_v20  ;;  %4834 = vst.msk [vmem:[%s10028_s4 + $0x158] sm:$0xff] %vm4790_vm2, %v4629_v27  ;;  %v2060_v4 = vadd.f32 %v2059_v41, %v420_v54  ;;  %v9124_v11 = vpop.f32.mrf.mxu0 }
 0x220   :  { %4833 = vst.msk [vmem:[%s10028_s4 + $0x150] sm:$0xff] %vm4790_vm2, %v4628_v29  ;;  %v6593_v49 = vpop.eup %6592  ;;  %6618 = vpow2.f32 %v5389_v23  ;;  %v4294_v39 = vpop.permute.xlu1 %4293 }
 0x221   :  { %v4289_v50 = vpop.permute.xlu0 %4288  ;;  %v9078_v44 = vpop.eup %6594  ;;  %6620 = vpow2.f32 %v5388_v24  ;;  %v4731_v52 = vmul.f32 %v4294_v39, %v3507_v38  ;;  %3943 = vperm.xlu1 %5965, %v6583_v19   ;;  %3938 = vperm.xlu0 %5964, %v6585_v0   ;;  %v5392_v19 = vmul.f32 -1.442695, %v2060_v4  ;;  %v3408_v0 = vld [vmem:[%s10027_s3 + $0x170] sm:$0xff] }
 0x222   :  { %v4730_v53 = vmul.f32 %v4289_v50, %v3506_v40  ;;  %v9083_v37 = vpop.eup %6596  ;;  %6622 = vpow2.f32 %v5289_v42  ;;  %v9126_v20 = vpop.f32.mrf.mxu1 }
 0x223   :  { %v9094_v55 = vpop.eup %6598  ;;  %4936 = vst.msk [vmem:[%s10028_s4 + $0x488] sm:$0xff] %vm4790_vm2, %v4731_v52  ;;  %6624 = vpow2.f32 %v5288_v48  ;;  %v1559_v23 = vpop.f32.mrf.mxu0 }
 0x224   :  { %4935 = vst.msk [vmem:[%s10028_s4 + $0x480] sm:$0xff] %vm4790_vm2, %v4730_v53  ;;  %v9104_v59 = vpop.eup %6600  ;;  %v3794_v56 = vpop.permute.xlu1 %3793  ;;  %6626 = vpow2.f32 %v5391_v51  ;;  %v320_v53 = vld [vmem:[%s10026_s1 + $0x2c0] sm:$0xff] }
 0x225   :  { %v3789_v58 = vpop.permute.xlu0 %3788  ;;  %v9106_v61 = vpop.eup %6602  ;;  %v4631_v62 = vmul.f32 %v3794_v56, %v3407_v31  ;;  %4453 = vperm.xlu1 %5965, %v6587_v26   ;;  %4448 = vperm.xlu0 %5964, %v6589_v35   ;;  %6628 = vpow2.f32 %v5390_v46 }
 0x226   :  { %v4630_v1 = vmul.f32 %v3789_v58, %v3406_v33  ;;  %v9108_v7 = vpop.eup %6604  ;;  %6630 = vpow2.f32 %v5291_v43  ;;  %v2069_v38 = vpop.f32.mrf.mxu1  ;;  %v423_v33 = vld [vmem:[%s10026_s1 + $0x5f8] sm:$0xff]  ;;  %v422_v43 = vld [vmem:[%s10026_s1 + $0x5f0] sm:$0xff] }
 0x227   :  { %v6607_v10 = vpop.eup %6606  ;;  %4836 = vst.msk [vmem:[%s10028_s4 + $0x168] sm:$0xff] %vm4790_vm2, %v4631_v62  ;;  %6632 = vpow2.f32 %v5290_v60  ;;  %v9144_v40 = vpop.f32.mrf.mxu0  ;;  %v1560_v62 = vadd.f32 %v1559_v23, %v320_v53 }
 0x228   :  { %4835 = vst.msk [vmem:[%s10028_s4 + $0x160] sm:$0xff] %vm4790_vm2, %v4630_v1  ;;  %v6609_v2 = vpop.eup %6608  ;;  %v2831_v13 = vadd.f32 1.0, %v6607_v10  ;;  %v4304_v14 = vpop.permute.xlu1 %4303  ;;  %v323_v1 = vld [vmem:[%s10026_s1 + $0x2d8] sm:$0xff] }
 0x229   :  { %v4299_v15 = vpop.permute.xlu0 %4298  ;;  %v6611_v9 = vpop.eup %6610  ;;  %v2830_v17 = vadd.f32 1.0, %v6609_v2  ;;  %v4733_v18 = vmul.f32 %v4304_v14, %v3509_v6  ;;  %3953 = vperm.xlu1 %5965, %v6591_v47   ;;  %3948 = vperm.xlu0 %5964, %v6593_v49   ;;  %v3510_v47 = vld [vmem:[%s10027_s3 + $0x4a0] sm:$0xff]  ;;  %v321_v49 = vld [vmem:[%s10026_s1 + $0x2c8] sm:$0xff]  ;;  %v2070_v14 = vadd.f32 %v2069_v38, %v422_v43 }
 0x22a   :  { %v4732_v12 = vmul.f32 %v4299_v15, %v3508_v3  ;;  %v6613_v21 = vpop.eup %6612  ;;  %6634 = vrcp.f32 %v2831_v13  ;;  %v2933_v63 = vadd.f32 1.0, %v6611_v9  ;;  %v9163_v39 = vpop.f32.mrf.mxu1  ;;  %v1565_v56 = vadd.f32 %v9124_v11, %v321_v49  ;;  %v322_v15 = vld [vmem:[%s10026_s1 + $0x2d0] sm:$0xff] }
 0x22b   :  { %v6615_v8 = vpop.eup %6614  ;;  %6636 = vrcp.f32 %v2830_v17  ;;  %v2932_v22 = vadd.f32 1.0, %v6613_v21  ;;  %4938 = vst.msk [vmem:[%s10028_s4 + $0x498] sm:$0xff] %vm4790_vm2, %v4733_v18  ;;  %v1569_v41 = vpop.f32.mrf.mxu0  ;;  %v2075_v13 = vadd.f32 %v9126_v20, %v423_v33  ;;  %v425_v18 = vld [vmem:[%s10026_s1 + $0x608] sm:$0xff]  ;;  %v3513_v20 = vld [vmem:[%s10027_s3 + $0x4b8] sm:$0xff] }
 0x22c   :  { %4937 = vst.msk [vmem:[%s10028_s4 + $0x490] sm:$0xff] %vm4790_vm2, %v4732_v12  ;;  %v6617_v24 = vpop.eup %6616  ;;  %v2833_v28 = vadd.f32 1.0, %v6615_v8  ;;  %v3804_v25 = vpop.permute.xlu1 %3803  ;;  %6638 = vpow2.f32 %v5393_v16  ;;  %v424_v12 = vld [vmem:[%s10026_s1 + $0x600] sm:$0xff]  ;;  %v325_v8 = vld [vmem:[%s10026_s1 + $0x2e8] sm:$0xff] }
 0x22d   :  { %v3799_v26 = vpop.permute.xlu0 %3798  ;;  %v6619_v27 = vpop.eup %6618  ;;  %v2832_v29 = vadd.f32 1.0, %v6617_v24  ;;  %v4633_v30 = vmul.f32 %v3804_v25, %v3409_v5  ;;  %4463 = vperm.xlu1 %5965, %v9078_v44   ;;  %4458 = vperm.xlu0 %5964, %v9083_v37   ;;  %6640 = vpow2.f32 %v5392_v19  ;;  %v5293_v19 = vmul.f32 -1.442695, %v1565_v56 }
 0x22e   :  { %v4632_v35 = vmul.f32 %v3799_v26, %v3408_v0  ;;  %v6621_v42 = vpop.eup %6620  ;;  %6642 = vrcp.f32 %v2933_v63  ;;  %v2935_v34 = vadd.f32 1.0, %v6619_v27  ;;  %v2079_v4 = vpop.f32.mrf.mxu1  ;;  %v5292_v5 = vmul.f32 -1.442695, %v1560_v62 }
 0x22f   :  { %v6623_v48 = vpop.eup %6622  ;;  %6644 = vrcp.f32 %v2932_v22  ;;  %v2934_v36 = vadd.f32 1.0, %v6621_v42  ;;  %4838 = vst.msk [vmem:[%s10028_s4 + $0x178] sm:$0xff] %vm4790_vm2, %v4633_v30  ;;  %v5779_v6 = vpop.f32.mrf.mxu0  ;;  %v1570_v0 = vadd.f32 %v1569_v41, %v322_v15  ;;  %v5395_v24 = vmul.f32 -1.442695, %v2075_v13  ;;  %v427_v42 = vld [vmem:[%s10026_s1 + $0x618] sm:$0xff] }
 0x230   :  { %4837 = vst.msk [vmem:[%s10028_s4 + $0x170] sm:$0xff] %vm4790_vm2, %v4632_v35  ;;  %v6625_v50 = vpop.eup %6624  ;;  %6646 = vrcp.f32 %v2833_v28  ;;  %v2835_v51 = vadd.f32 1.0, %v6623_v48  ;;  %v4314_v44 = vpop.permute.xlu1 %4313  ;;  %v2085_v26 = vadd.f32 %v9163_v39, %v425_v18  ;;  %v2080_v27 = vadd.f32 %v2079_v4, %v424_v12  ;;  %v3412_v48 = vld [vmem:[%s10027_s3 + $0x190] sm:$0xff]  ;;  %v3415_v18 = vld [vmem:[%s10027_s3 + $0x1a8] sm:$0xff]  ;;  %v3414_v12 = vld [vmem:[%s10027_s3 + $0x1a0] sm:$0xff] }
 0x231   :  { %v4309_v52 = vpop.permute.xlu0 %4308  ;;  %v6627_v46 = vpop.eup %6626  ;;  %6648 = vrcp.f32 %v2832_v29  ;;  %v2834_v32 = vadd.f32 1.0, %v6625_v50  ;;  %v4735_v37 = vmul.f32 %v4314_v44, %v3511_v45  ;;  %3963 = vperm.xlu1 %5965, %v9094_v55   ;;  %3958 = vperm.xlu0 %5964, %v9104_v59   ;;  %v3411_v55 = vld [vmem:[%s10027_s3 + $0x188] sm:$0xff]  ;;  %v3410_v59 = vld [vmem:[%s10027_s3 + $0x180] sm:$0xff]  ;;  %v5394_v35 = vmul.f32 -1.442695, %v2070_v14  ;;  %v426_v39 = vld [vmem:[%s10026_s1 + $0x610] sm:$0xff] }
 0x232   :  { %v4734_v31 = vmul.f32 %v4309_v52, %v3510_v47  ;;  %v6629_v54 = vpop.eup %6628  ;;  %6650 = vrcp.f32 %v2935_v34  ;;  %v2937_v60 = vadd.f32 1.0, %v6627_v46  ;;  %v5932_v21 = vpop.f32.mrf.mxu1  ;;  %v324_v29 = vld [vmem:[%s10026_s1 + $0x2e0] sm:$0xff]  ;;  %v3413_v47 = vld [vmem:[%s10027_s3 + $0x198] sm:$0xff] }
 0x233   :  { %v6631_v58 = vpop.eup %6630  ;;  %6652 = vrcp.f32 %v2934_v36  ;;  %v2936_v57 = vadd.f32 1.0, %v6629_v54  ;;  %4940 = vst.msk [vmem:[%s10028_s4 + $0x4a8] sm:$0xff] %vm4790_vm2, %v4735_v37  ;;  %v1579_v22 = vpop.f32.mrf.mxu0  ;;  %v1585_v36 = vadd.f32 %v5779_v6, %v325_v8  ;;  %v5396_v37 = vmul.f32 -1.442695, %v2080_v27  ;;  %v327_v14 = vld [vmem:[%s10026_s1 + $0x2f8] sm:$0xff] }
 0x234   :  { %4939 = vst.msk [vmem:[%s10028_s4 + $0x4a0] sm:$0xff] %vm4790_vm2, %v4734_v31  ;;  %v6633_v3 = vpop.eup %6632  ;;  %6654 = vrcp.f32 %v2835_v51  ;;  %v2837_v10 = vadd.f32 1.0, %v6631_v58  ;;  %v3814_v11 = vpop.permute.xlu1 %3813  ;;  %v5294_v51 = vmul.f32 -1.442695, %v1570_v0  ;;  %v1580_v44 = vadd.f32 %v1579_v22, %v324_v29  ;;  %v428_v29 = vld [vmem:[%s10026_s1 + $0x620] sm:$0xff] }
 0x235   :  { %v3809_v2 = vpop.permute.xlu0 %3808  ;;  %6656 = vrcp.f32 %v2834_v32  ;;  %v2836_v16 = vadd.f32 1.0, %v6633_v3  ;;  %v4635_v9 = vmul.f32 %v3814_v11, %v3411_v55  ;;  %4473 = vperm.xlu1 %5965, %v9106_v61   ;;  %4468 = vperm.xlu0 %5964, %v9108_v7   ;;  %v3512_v61 = vld [vmem:[%s10027_s3 + $0x4b0] sm:$0xff]  ;;  %v1575_v7 = vadd.f32 %v9144_v40, %v323_v1  ;;  %v2089_v49 = vpop.f32.mrf.mxu1  ;;  %v3515_v55 = vld [vmem:[%s10027_s3 + $0x4c8] sm:$0xff] }
 0x236   :  { %v4634_v17 = vmul.f32 %v3809_v2, %v3410_v59  ;;  %6658 = vrcp.f32 %v2937_v60  ;;  %v5397_v32 = vmul.f32 -1.442695, %v2085_v26  ;;  %v2095_v31 = vadd.f32 %v5932_v21, %v427_v42  ;;  %v5782_v60 = vpop.f32.mrf.mxu0  ;;  %v3514_v59 = vld [vmem:[%s10027_s3 + $0x4c0] sm:$0xff]  ;;  %v3516_v26 = vld [vmem:[%s10027_s3 + $0x4d0] sm:$0xff] }
 0x237   :  { %v6635_v63 = vpop.eup %6634  ;;  %6660 = vrcp.f32 %v2936_v57  ;;  %4840 = vst.msk [vmem:[%s10028_s4 + $0x188] sm:$0xff] %vm4790_vm2, %v4635_v9  ;;  %v5295_v45 = vmul.f32 -1.442695, %v1575_v7  ;;  %v2090_v54 = vadd.f32 %v2089_v49, %v426_v39  ;;  %v5297_v58 = vmul.f32 -1.442695, %v1585_v36 }
 0x238   :  { %4839 = vst.msk [vmem:[%s10028_s4 + $0x180] sm:$0xff] %vm4790_vm2, %v4634_v17  ;;  %v6637_v23 = vpop.eup %6636  ;;  %6662 = vrcp.f32 %v2837_v10  ;;  %v4324_v28 = vpop.permute.xlu1 %4323  ;;  %v5296_v62 = vmul.f32 -1.442695, %v1580_v44  ;;  %v5399_v3 = vmul.f32 -1.442695, %v2095_v31 }
 0x239   :  { %v4319_v25 = vpop.permute.xlu0 %4318  ;;  %v6639_v30 = vpop.eup %6638  ;;  %6664 = vrcp.f32 %v2836_v16  ;;  %v4737_v38 = vmul.f32 %v4324_v28, %v3513_v20  ;;  %3973 = vperm.xlu1 %5965, %v6635_v63   ;;  %3968 = vperm.xlu0 %5964, %v6637_v23   ;;  %v5398_v13 = vmul.f32 -1.442695, %v2090_v54  ;;  %v326_v16 = vld [vmem:[%s10026_s1 + $0x2f0] sm:$0xff] }
 0x23a   :  { %v4736_v40 = vmul.f32 %v4319_v25, %v3512_v61  ;;  %v6641_v34 = vpop.eup %6640  ;;  %6666 = vpow2.f32 %v5293_v19  ;;  %v1589_v15 = vpop.f32.mrf.mxu0  ;;  %v2939_v17 = vadd.f32 1.0, %v6639_v30  ;;  %v3517_v25 = vld [vmem:[%s10027_s3 + $0x4d8] sm:$0xff] }
 0x23b   :  { %v6643_v50 = vpop.eup %6642  ;;  %6668 = vpow2.f32 %v5292_v5  ;;  %4942 = vst.msk [vmem:[%s10028_s4 + $0x4b8] sm:$0xff] %vm4790_vm2, %v4737_v38  ;;  %v5935_v19 = vpop.f32.mrf.mxu1  ;;  %v2938_v61 = vadd.f32 1.0, %v6641_v34  ;;  %v1595_v5 = vadd.f32 %v5782_v60, %v327_v14  ;;  %v1590_v0 = vadd.f32 %v1589_v15, %v326_v16  ;;  %v328_v16 = vld [vmem:[%s10026_s1 + $0x300] sm:$0xff] }
 0x23c   :  { %4941 = vst.msk [vmem:[%s10028_s4 + $0x4b0] sm:$0xff] %vm4790_vm2, %v4736_v40  ;;  %v6645_v52 = vpop.eup %6644  ;;  %6670 = vpow2.f32 %v5395_v24  ;;  %v3824_v53 = vpop.permute.xlu1 %3823  ;;  %v429_v24 = vld [vmem:[%s10026_s1 + $0x628] sm:$0xff] }
 0x23d   :  { %v3819_v46 = vpop.permute.xlu0 %3818  ;;  %v6647_v33 = vpop.eup %6646  ;;  %6672 = vpow2.f32 %v5394_v35  ;;  %v4637_v43 = vmul.f32 %v3824_v53, %v3413_v47  ;;  %4483 = vperm.xlu1 %5965, %v6643_v50   ;;  %4478 = vperm.xlu0 %5964, %v6645_v52   ;;  %v5299_v34 = vmul.f32 -1.442695, %v1595_v5  ;;  %v2105_v47 = vadd.f32 %v5935_v19, %v429_v24  ;;  %v3417_v53 = vld [vmem:[%s10027_s3 + $0x1b8] sm:$0xff]  ;;  %v3419_v5 = vld [vmem:[%s10027_s3 + $0x1c8] sm:$0xff] }
 0x23e   :  { %v4636_v41 = vmul.f32 %v3819_v46, %v3412_v48  ;;  %v6649_v56 = vpop.eup %6648  ;;  %6674 = vpow2.f32 %v5295_v45  ;;  %v2099_v27 = vpop.f32.mrf.mxu1  ;;  %v5298_v45 = vmul.f32 -1.442695, %v1590_v0  ;;  %v3416_v46 = vld [vmem:[%s10027_s3 + $0x1b0] sm:$0xff]  ;;  %v431_v19 = vld [vmem:[%s10026_s1 + $0x638] sm:$0xff]  ;;  %v3418_v0 = vld [vmem:[%s10027_s3 + $0x1c0] sm:$0xff] }
 0x23f   :  { %v6651_v57 = vpop.eup %6650  ;;  %6676 = vpow2.f32 %v5294_v51  ;;  %4842 = vst.msk [vmem:[%s10028_s4 + $0x198] sm:$0xff] %vm4790_vm2, %v4637_v43  ;;  %v2100_v50 = vadd.f32 %v2099_v27, %v428_v29  ;;  %v5785_v51 = vpop.f32.mrf.mxu0  ;;  %v331_v24 = vld [vmem:[%s10026_s1 + $0x318] sm:$0xff] }
 0x240   :  { %4841 = vst.msk [vmem:[%s10028_s4 + $0x190] sm:$0xff] %vm4790_vm2, %v4636_v41  ;;  %v6653_v1 = vpop.eup %6652  ;;  %6678 = vpow2.f32 %v5397_v32  ;;  %v4334_v4 = vpop.permute.xlu1 %4333  ;;  %v5401_v41 = vmul.f32 -1.442695, %v2105_v47 }
 0x241   :  { %v4329_v6 = vpop.permute.xlu0 %4328  ;;  %v6655_v10 = vpop.eup %6654  ;;  %6680 = vpow2.f32 %v5396_v37  ;;  %v4739_v11 = vmul.f32 %v4334_v4, %v3515_v55  ;;  %3983 = vperm.xlu1 %5965, %v6647_v33   ;;  %3978 = vperm.xlu0 %5964, %v6649_v56   ;;  %v5400_v55 = vmul.f32 -1.442695, %v2100_v50  ;;  %v3518_v4 = vld [vmem:[%s10027_s3 + $0x4e0] sm:$0xff] }
 0x242   :  { %v4738_v2 = vmul.f32 %v4329_v6, %v3514_v59  ;;  %v6657_v9 = vpop.eup %6656  ;;  %6682 = vpow2.f32 %v5297_v58  ;;  %v1599_v59 = vpop.f32.mrf.mxu0 }
 0x243   :  { %v6659_v20 = vpop.eup %6658  ;;  %4944 = vst.msk [vmem:[%s10028_s4 + $0x4c8] sm:$0xff] %vm4790_vm2, %v4739_v11  ;;  %6684 = vpow2.f32 %v5296_v62  ;;  %v5938_v58 = vpop.f32.mrf.mxu1 }
 0x244   :  { %4943 = vst.msk [vmem:[%s10028_s4 + $0x4c0] sm:$0xff] %vm4790_vm2, %v4738_v2  ;;  %v6661_v7 = vpop.eup %6660  ;;  %v3834_v21 = vpop.permute.xlu1 %3833  ;;  %6686 = vpow2.f32 %v5399_v3 }
 0x245   :  { %v3829_v63 = vpop.permute.xlu0 %3828  ;;  %v9282_v8 = vpop.eup %6662  ;;  %v4639_v22 = vmul.f32 %v3834_v21, %v3415_v18  ;;  %4493 = vperm.xlu1 %5965, %v6651_v57   ;;  %4488 = vperm.xlu0 %5964, %v6653_v1   ;;  %6688 = vpow2.f32 %v5398_v13  ;;  %v3519_v1 = vld [vmem:[%s10027_s3 + $0x4e8] sm:$0xff] }
 0x246   :  { %v4638_v23 = vmul.f32 %v3829_v63, %v3414_v12  ;;  %v9287_v28 = vpop.eup %6664  ;;  %6690 = vrcp.f32 %v2939_v17  ;;  %v5788_v11 = vpop.f32.mrf.mxu0 }
 0x247   :  { %v6667_v30 = vpop.eup %6666  ;;  %6692 = vrcp.f32 %v2938_v61  ;;  %4844 = vst.msk [vmem:[%s10028_s4 + $0x1a8] sm:$0xff] %vm4790_vm2, %v4639_v22  ;;  %v430_v61 = vld [vmem:[%s10026_s1 + $0x630] sm:$0xff] }
 0x248   :  { %4843 = vst.msk [vmem:[%s10028_s4 + $0x1a0] sm:$0xff] %vm4790_vm2, %v4638_v23  ;;  %v6669_v35 = vpop.eup %6668  ;;  %v2839_v38 = vadd.f32 1.0, %v6667_v30  ;;  %v4344_v40 = vpop.permute.xlu1 %4343  ;;  %v1600_v23 = vadd.f32 %v1599_v59, %v328_v16 }
 0x249   :  { %v4339_v42 = vpop.permute.xlu0 %4338  ;;  %v6671_v48 = vpop.eup %6670  ;;  %v2838_v36 = vadd.f32 1.0, %v6669_v35  ;;  %v4741_v49 = vmul.f32 %v4344_v40, %v3517_v25  ;;  %3993 = vperm.xlu1 %5965, %v6655_v10   ;;  %3988 = vperm.xlu0 %5964, %v6657_v9   ;;  %v329_v10 = vld [vmem:[%s10026_s1 + $0x308] sm:$0xff]  ;;  %v2115_v35 = vadd.f32 %v5938_v58, %v431_v19  ;;  %v330_v40 = vld [vmem:[%s10026_s1 + $0x310] sm:$0xff]  ;;  %v3421_v58 = vld [vmem:[%s10027_s3 + $0x1d8] sm:$0xff] }
 0x24a   :  { %v4740_v39 = vmul.f32 %v4339_v42, %v3516_v26  ;;  %v6673_v44 = vpop.eup %6672  ;;  %6694 = vrcp.f32 %v2839_v38  ;;  %v2941_v52 = vadd.f32 1.0, %v6671_v48  ;;  %v1605_v63 = vadd.f32 %v5785_v51, %v329_v10  ;;  %v3521_v48 = vld [vmem:[%s10027_s3 + $0x4f8] sm:$0xff] }
 0x24b   :  { %v6675_v32 = vpop.eup %6674  ;;  %6696 = vrcp.f32 %v2838_v36  ;;  %v2940_v37 = vadd.f32 1.0, %v6673_v44  ;;  %4946 = vst.msk [vmem:[%s10028_s4 + $0x4d8] sm:$0xff] %vm4790_vm2, %v4741_v49  ;;  %v3520_v36 = vld [vmem:[%s10027_s3 + $0x4f0] sm:$0xff]  ;;  %v1615_v49 = vadd.f32 %v5788_v11, %v331_v24  ;;  %v5300_v50 = vmul.f32 -1.442695, %v1600_v23  ;;  %v433_v44 = vld [vmem:[%s10026_s1 + $0x648] sm:$0xff] }
 0x24c   :  { %4945 = vst.msk [vmem:[%s10028_s4 + $0x4d0] sm:$0xff] %vm4790_vm2, %v4740_v39  ;;  %v6677_v31 = vpop.eup %6676  ;;  %6698 = vpow2.f32 %v5299_v34  ;;  %v3844_v33 = vpop.permute.xlu1 %3843  ;;  %v2841_v62 = vadd.f32 1.0, %v6675_v32  ;;  %v5301_v47 = vmul.f32 -1.442695, %v1605_v63  ;;  %v5403_v32 = vmul.f32 -1.442695, %v2115_v35 }
 0x24d   :  { %v3839_v43 = vpop.permute.xlu0 %3838  ;;  %v6679_v54 = vpop.eup %6678  ;;  %6700 = vpow2.f32 %v5298_v45  ;;  %v4641_v60 = vmul.f32 %v3844_v33, %v3417_v53  ;;  %4503 = vperm.xlu1 %5965, %v6659_v20   ;;  %4498 = vperm.xlu0 %5964, %v6661_v7   ;;  %v2840_v3 = vadd.f32 1.0, %v6677_v31  ;;  %v432_v33 = vld [vmem:[%s10026_s1 + $0x640] sm:$0xff]  ;;  %v5303_v59 = vmul.f32 -1.442695, %v1615_v49 }
 0x24e   :  { %v4640_v56 = vmul.f32 %v3839_v43, %v3416_v46  ;;  %v6681_v57 = vpop.eup %6680  ;;  %6702 = vrcp.f32 %v2941_v52  ;;  %v2943_v13 = vadd.f32 1.0, %v6679_v54  ;;  %v2109_v20 = vpop.f32.mrf.mxu1  ;;  %v3522_v63 = vld [vmem:[%s10027_s3 + $0x500] sm:$0xff] }
 0x24f   :  { %v6683_v6 = vpop.eup %6682  ;;  %6704 = vrcp.f32 %v2940_v37  ;;  %4846 = vst.msk [vmem:[%s10028_s4 + $0x1b8] sm:$0xff] %vm4790_vm2, %v4641_v60  ;;  %v2942_v17 = vadd.f32 1.0, %v6681_v57  ;;  %v2110_v38 = vadd.f32 %v2109_v20, %v430_v61  ;;  %v3420_v57 = vld [vmem:[%s10027_s3 + $0x1d0] sm:$0xff] }
 0x250   :  { %4845 = vst.msk [vmem:[%s10028_s4 + $0x1b0] sm:$0xff] %vm4790_vm2, %v4640_v56  ;;  %v6685_v2 = vpop.eup %6684  ;;  %6706 = vpow2.f32 %v5401_v41  ;;  %v4354_v14 = vpop.permute.xlu1 %4353  ;;  %v2843_v21 = vadd.f32 1.0, %v6683_v6  ;;  %v434_v20 = vld [vmem:[%s10026_s1 + $0x650] sm:$0xff] }
 0x251   :  { %v4349_v15 = vpop.permute.xlu0 %4348  ;;  %v6687_v9 = vpop.eup %6686  ;;  %6708 = vpow2.f32 %v5400_v55  ;;  %v4743_v18 = vmul.f32 %v4354_v14, %v3519_v1  ;;  %4003 = vperm.xlu1 %5965, %v9282_v8   ;;  %3998 = vperm.xlu0 %5964, %v9287_v28   ;;  %v2842_v22 = vadd.f32 1.0, %v6685_v2  ;;  %v5402_v41 = vmul.f32 -1.442695, %v2110_v38 }
 0x252   :  { %v4742_v12 = vmul.f32 %v4349_v15, %v3518_v4  ;;  %v6689_v7 = vpop.eup %6688  ;;  %6710 = vrcp.f32 %v2841_v62  ;;  %v1609_v28 = vpop.f32.mrf.mxu0  ;;  %v2945_v27 = vadd.f32 1.0, %v6687_v9  ;;  %v332_v15 = vld [vmem:[%s10026_s1 + $0x320] sm:$0xff] }
 0x253   :  { %v6691_v8 = vpop.eup %6690  ;;  %6712 = vrcp.f32 %v2840_v3  ;;  %4948 = vst.msk [vmem:[%s10028_s4 + $0x4e8] sm:$0xff] %vm4790_vm2, %v4743_v18  ;;  %v5941_v25 = vpop.f32.mrf.mxu1  ;;  %v2944_v42 = vadd.f32 1.0, %v6689_v7  ;;  %v1610_v51 = vadd.f32 %v1609_v28, %v330_v40  ;;  %v333_v3 = vld [vmem:[%s10026_s1 + $0x328] sm:$0xff] }
 0x254   :  { %4947 = vst.msk [vmem:[%s10028_s4 + $0x4e0] sm:$0xff] %vm4790_vm2, %v4742_v12  ;;  %v6693_v26 = vpop.eup %6692  ;;  %6714 = vrcp.f32 %v2943_v13  ;;  %v3854_v29 = vpop.permute.xlu1 %3853  ;;  %v2125_v62 = vadd.f32 %v5941_v25, %v433_v44  ;;  %v435_v12 = vld [vmem:[%s10026_s1 + $0x658] sm:$0xff] }
 0x255   :  { %v3849_v30 = vpop.permute.xlu0 %3848  ;;  %6716 = vrcp.f32 %v2942_v17  ;;  %v4643_v34 = vmul.f32 %v3854_v29, %v3419_v5  ;;  %4513 = vperm.xlu1 %5965, %v6691_v8   ;;  %4508 = vperm.xlu0 %5964, %v6693_v26   ;;  %v2119_v52 = vpop.f32.mrf.mxu1  ;;  %v5302_v4 = vmul.f32 -1.442695, %v1610_v51 }
 0x256   :  { %v4642_v45 = vmul.f32 %v3849_v30, %v3418_v0  ;;  %6718 = vrcp.f32 %v2843_v21  ;;  %v5791_v53 = vpop.f32.mrf.mxu0  ;;  %v2120_v6 = vadd.f32 %v2119_v52, %v432_v33  ;;  %v5405_v7 = vmul.f32 -1.442695, %v2125_v62  ;;  %v3523_v21 = vld [vmem:[%s10027_s3 + $0x508] sm:$0xff]  ;;  %v3425_v62 = vld [vmem:[%s10027_s3 + $0x1f8] sm:$0xff] }
 0x257   :  { %v6695_v39 = vpop.eup %6694  ;;  %6720 = vrcp.f32 %v2842_v22  ;;  %4848 = vst.msk [vmem:[%s10028_s4 + $0x1c8] sm:$0xff] %vm4790_vm2, %v4643_v34  ;;  %v5944_v56 = vpop.f32.mrf.mxu1  ;;  %v1625_v5 = vadd.f32 %v5791_v53, %v333_v3  ;;  %v3423_v34 = vld [vmem:[%s10027_s3 + $0x1e8] sm:$0xff] }
 0x258   :  { %4847 = vst.msk [vmem:[%s10028_s4 + $0x1c0] sm:$0xff] %vm4790_vm2, %v4642_v45  ;;  %v6697_v46 = vpop.eup %6696  ;;  %6722 = vrcp.f32 %v2945_v27  ;;  %v4364_v37 = vpop.permute.xlu1 %4363  ;;  %v5404_v8 = vmul.f32 -1.442695, %v2120_v6  ;;  %v2135_v26 = vadd.f32 %v5944_v56, %v435_v12  ;;  %v3422_v45 = vld [vmem:[%s10027_s3 + $0x1e0] sm:$0xff] }
 0x259   :  { %v4359_v31 = vpop.permute.xlu0 %4358  ;;  %v6699_v43 = vpop.eup %6698  ;;  %6724 = vrcp.f32 %v2944_v42  ;;  %v4745_v54 = vmul.f32 %v4364_v37, %v3521_v48  ;;  %4013 = vperm.xlu1 %5965, %v6695_v39   ;;  %4008 = vperm.xlu0 %5964, %v6697_v46   ;;  %v5305_v42 = vmul.f32 -1.442695, %v1625_v5  ;;  %v3524_v37 = vld [vmem:[%s10027_s3 + $0x510] sm:$0xff] }
 0x25a   :  { %v4744_v60 = vmul.f32 %v4359_v31, %v3520_v36  ;;  %v6701_v55 = vpop.eup %6700  ;;  %6726 = vpow2.f32 %v5301_v47  ;;  %v1619_v10 = vpop.f32.mrf.mxu0  ;;  %v2845_v2 = vadd.f32 1.0, %v6699_v43 }
 0x25b   :  { %v6703_v1 = vpop.eup %6702  ;;  %6728 = vpow2.f32 %v5300_v50  ;;  %4950 = vst.msk [vmem:[%s10028_s4 + $0x4f8] sm:$0xff] %vm4790_vm2, %v4745_v54  ;;  %v2844_v9 = vadd.f32 1.0, %v6701_v55  ;;  %v2129_v19 = vpop.f32.mrf.mxu1  ;;  %v1620_v22 = vadd.f32 %v1619_v10, %v332_v15  ;;  %v5407_v50 = vmul.f32 -1.442695, %v2135_v26 }
 0x25c   :  { %4949 = vst.msk [vmem:[%s10028_s4 + $0x4f0] sm:$0xff] %vm4790_vm2, %v4744_v60  ;;  %v6705_v11 = vpop.eup %6704  ;;  %6730 = vpow2.f32 %v5403_v32  ;;  %v3864_v13 = vpop.permute.xlu1 %3863  ;;  %v2130_v27 = vadd.f32 %v2129_v19, %v434_v20  ;;  %v3525_v32 = vld [vmem:[%s10027_s3 + $0x518] sm:$0xff] }
 0x25d   :  { %v3859_v14 = vpop.permute.xlu0 %3858  ;;  %v6707_v16 = vpop.eup %6706  ;;  %6732 = vpow2.f32 %v5402_v41  ;;  %v4645_v17 = vmul.f32 %v3864_v13, %v3421_v58  ;;  %4523 = vperm.xlu1 %5965, %v6703_v1   ;;  %4518 = vperm.xlu0 %5964, %v6705_v11   ;;  %v5304_v48 = vmul.f32 -1.442695, %v1620_v22  ;;  %v3424_v1 = vld [vmem:[%s10027_s3 + $0x1f0] sm:$0xff]  ;;  %v3426_v22 = vld [vmem:[%s10027_s3 + $0x200] sm:$0xff] }
 0x25e   :  { %v4644_v18 = vmul.f32 %v3859_v14, %v3420_v57  ;;  %v6709_v61 = vpop.eup %6708  ;;  %6734 = vpow2.f32 %v5303_v59  ;;  %v2947_v24 = vadd.f32 1.0, %v6707_v16  ;;  %v5406_v53 = vmul.f32 -1.442695, %v2130_v27 }
 0x25f   :  { %v6711_v0 = vpop.eup %6710  ;;  %6736 = vpow2.f32 %v5302_v4  ;;  %4850 = vst.msk [vmem:[%s10028_s4 + $0x1d8] sm:$0xff] %vm4790_vm2, %v4645_v17  ;;  %v2946_v30 = vadd.f32 1.0, %v6709_v61  ;;  %v3526_v17 = vld [vmem:[%s10027_s3 + $0x520] sm:$0xff] }
 0x260   :  { %4849 = vst.msk [vmem:[%s10028_s4 + $0x1d0] sm:$0xff] %vm4790_vm2, %v4644_v18  ;;  %v6713_v23 = vpop.eup %6712  ;;  %6738 = vrcp.f32 %v2845_v2  ;;  %v4374_v28 = vpop.permute.xlu1 %4373 }
 0x261   :  { %v4369_v25 = vpop.permute.xlu0 %4368  ;;  %v6715_v29 = vpop.eup %6714  ;;  %6740 = vrcp.f32 %v2844_v9  ;;  %v4747_v35 = vmul.f32 %v4374_v28, %v3523_v21  ;;  %4023 = vperm.xlu1 %5965, %v6711_v0   ;;  %4018 = vperm.xlu0 %5964, %v6713_v23   ;;  %v3527_v9 = vld [vmem:[%s10027_s3 + $0x528] sm:$0xff] }
 0x262   :  { %v4746_v38 = vmul.f32 %v4369_v25, %v3522_v63  ;;  %v6717_v40 = vpop.eup %6716  ;;  %6742 = vpow2.f32 %v5405_v7 }
 0x263   :  { %v6719_v47 = vpop.eup %6718  ;;  %6744 = vpow2.f32 %v5404_v8  ;;  %4952 = vst.msk [vmem:[%s10028_s4 + $0x508] sm:$0xff] %vm4790_vm2, %v4747_v35  ;;  %v3427_v8 = vld [vmem:[%s10027_s3 + $0x208] sm:$0xff] }
 0x264   :  { %4951 = vst.msk [vmem:[%s10028_s4 + $0x500] sm:$0xff] %vm4790_vm2, %v4746_v38  ;;  %v6721_v36 = vpop.eup %6720  ;;  %6746 = vrcp.f32 %v2947_v24  ;;  %v3874_v49 = vpop.permute.xlu1 %3873 }
 0x265   :  { %v3869_v39 = vpop.permute.xlu0 %3868  ;;  %v6723_v51 = vpop.eup %6722  ;;  %6748 = vrcp.f32 %v2946_v30  ;;  %v4647_v44 = vmul.f32 %v3874_v49, %v3423_v34  ;;  %4533 = vperm.xlu1 %5965, %v6715_v29   ;;  %4528 = vperm.xlu0 %5964, %v6717_v40   ;;  %v3529_v40 = vld [vmem:[%s10027_s3 + $0x538] sm:$0xff] }
 0x266   :  { %v4646_v52 = vmul.f32 %v3869_v39, %v3422_v45  ;;  %v6725_v46 = vpop.eup %6724  ;;  %6750 = vpow2.f32 %v5305_v42  ;;  %v3528_v42 = vld [vmem:[%s10027_s3 + $0x530] sm:$0xff] }
 0x267   :  { %v6727_v31 = vpop.eup %6726  ;;  %6752 = vpow2.f32 %v5304_v48  ;;  %4852 = vst.msk [vmem:[%s10028_s4 + $0x1e8] sm:$0xff] %vm4790_vm2, %v4647_v44  ;;  %v3428_v44 = vld [vmem:[%s10027_s3 + $0x210] sm:$0xff] }
 0x268   :  { %4851 = vst.msk [vmem:[%s10028_s4 + $0x1e0] sm:$0xff] %vm4790_vm2, %v4646_v52  ;;  %v6729_v33 = vpop.eup %6728  ;;  %v2847_v43 = vadd.f32 1.0, %v6727_v31  ;;  %6754 = vpow2.f32 %v5407_v50  ;;  %v4384_v41 = vpop.permute.xlu1 %4383 }
 0x269   :  { %v4379_v54 = vpop.permute.xlu0 %4378  ;;  %v6731_v60 = vpop.eup %6730  ;;  %v2846_v56 = vadd.f32 1.0, %v6729_v33  ;;  %6756 = vpow2.f32 %v5406_v53  ;;  %v4749_v55 = vmul.f32 %v4384_v41, %v3525_v32  ;;  %4033 = vperm.xlu1 %5965, %v6719_v47   ;;  %4028 = vperm.xlu0 %5964, %v6721_v36   ;;  %v3530_v41 = vld [vmem:[%s10027_s3 + $0x540] sm:$0xff] }
 0x26a   :  { %v4748_v59 = vmul.f32 %v4379_v54, %v3524_v37  ;;  %v6733_v58 = vpop.eup %6732  ;;  %6758 = vrcp.f32 %v2847_v43  ;;  %v2949_v57 = vadd.f32 1.0, %v6731_v60  ;;  %v3531_v43 = vld [vmem:[%s10027_s3 + $0x548] sm:$0xff] }
 0x26b   :  { %v6735_v4 = vpop.eup %6734  ;;  %6760 = vrcp.f32 %v2846_v56  ;;  %v2948_v6 = vadd.f32 1.0, %v6733_v58  ;;  %4954 = vst.msk [vmem:[%s10028_s4 + $0x518] sm:$0xff] %vm4790_vm2, %v4749_v55 }
 0x26c   :  { %4953 = vst.msk [vmem:[%s10028_s4 + $0x510] sm:$0xff] %vm4790_vm2, %v4748_v59  ;;  %v6737_v3 = vpop.eup %6736  ;;  %v3884_v10 = vpop.permute.xlu1 %3883  ;;  %6762 = vrcp.f32 %v2949_v57  ;;  %v2849_v16 = vadd.f32 1.0, %v6735_v4  ;;  %v3431_v57 = vld [vmem:[%s10027_s3 + $0x228] sm:$0xff] }
 0x26d   :  { %v3879_v11 = vpop.permute.xlu0 %3878  ;;  %v6739_v2 = vpop.eup %6738  ;;  %v4649_v13 = vmul.f32 %v3884_v10, %v3425_v62  ;;  %4543 = vperm.xlu1 %5965, %v6723_v51   ;;  %4538 = vperm.xlu0 %5964, %v6725_v46   ;;  %6764 = vrcp.f32 %v2948_v6  ;;  %v2848_v12 = vadd.f32 1.0, %v6737_v3  ;;  %v3429_v51 = vld [vmem:[%s10027_s3 + $0x218] sm:$0xff]  ;;  %v3430_v62 = vld [vmem:[%s10027_s3 + $0x220] sm:$0xff] }
 0x26e   :  { %v4648_v14 = vmul.f32 %v3879_v11, %v3424_v1  ;;  %v6741_v15 = vpop.eup %6740  ;;  %6766 = vrcp.f32 %v2849_v16 }
 0x26f   :  { %v6743_v18 = vpop.eup %6742  ;;  %4854 = vst.msk [vmem:[%s10028_s4 + $0x1f8] sm:$0xff] %vm4790_vm2, %v4649_v13  ;;  %6768 = vrcp.f32 %v2848_v12  ;;  %v3532_v13 = vld [vmem:[%s10027_s3 + $0x550] sm:$0xff]  ;;  %v3433_v12 = vld [vmem:[%s10027_s3 + $0x238] sm:$0xff] }
 0x270   :  { %4853 = vst.msk [vmem:[%s10028_s4 + $0x1f0] sm:$0xff] %vm4790_vm2, %v4648_v14  ;;  %v6745_v19 = vpop.eup %6744  ;;  %v4394_v20 = vpop.permute.xlu1 %4393  ;;  %v2951_v0 = vadd.f32 1.0, %v6743_v18 }
 0x271   :  { %v4389_v61 = vpop.permute.xlu0 %4388  ;;  %v6747_v7 = vpop.eup %6746  ;;  %v4751_v21 = vmul.f32 %v4394_v20, %v3527_v9  ;;  %4043 = vperm.xlu1 %5965, %v6739_v2   ;;  %4038 = vperm.xlu0 %5964, %v6741_v15   ;;  %v2950_v24 = vadd.f32 1.0, %v6745_v19  ;;  %v3533_v2 = vld [vmem:[%s10027_s3 + $0x558] sm:$0xff]  ;;  %v3432_v19 = vld [vmem:[%s10027_s3 + $0x230] sm:$0xff] }
 0x272   :  { %v4750_v63 = vmul.f32 %v4389_v61, %v3526_v17  ;;  %v6749_v5 = vpop.eup %6748  ;;  %6770 = vrcp.f32 %v2951_v0  ;;  %v3535_v0 = vld [vmem:[%s10027_s3 + $0x568] sm:$0xff] }
 0x273   :  { %v6751_v23 = vpop.eup %6750  ;;  %4956 = vst.msk [vmem:[%s10028_s4 + $0x528] sm:$0xff] %vm4790_vm2, %v4751_v21  ;;  %6772 = vrcp.f32 %v2950_v24 }
 0x274   :  { %4955 = vst.msk [vmem:[%s10028_s4 + $0x520] sm:$0xff] %vm4790_vm2, %v4750_v63  ;;  %v6753_v28 = vpop.eup %6752  ;;  %v3894_v25 = vpop.permute.xlu1 %3893  ;;  %v2851_v38 = vadd.f32 1.0, %v6751_v23 }
 0x275   :  { %v3889_v26 = vpop.permute.xlu0 %3888  ;;  %v6755_v27 = vpop.eup %6754  ;;  %v4651_v29 = vmul.f32 %v3894_v25, %v3427_v8  ;;  %4553 = vperm.xlu1 %5965, %v6747_v7   ;;  %4548 = vperm.xlu0 %5964, %v6749_v5   ;;  %v2850_v45 = vadd.f32 1.0, %v6753_v28  ;;  %v3534_v8 = vld [vmem:[%s10027_s3 + $0x560] sm:$0xff]  ;;  %v3435_v25 = vld [vmem:[%s10027_s3 + $0x248] sm:$0xff] }
 0x276   :  { %v4650_v30 = vmul.f32 %v3889_v26, %v3426_v22  ;;  %v6757_v35 = vpop.eup %6756  ;;  %6774 = vrcp.f32 %v2851_v38  ;;  %v2953_v50 = vadd.f32 1.0, %v6755_v27  ;;  %v3434_v26 = vld [vmem:[%s10027_s3 + $0x240] sm:$0xff]  ;;  %v3537_v38 = vld [vmem:[%s10027_s3 + $0x578] sm:$0xff] }
 0x277   :  { %v6759_v34 = vpop.eup %6758  ;;  %4856 = vst.msk [vmem:[%s10028_s4 + $0x208] sm:$0xff] %vm4790_vm2, %v4651_v29  ;;  %6776 = vrcp.f32 %v2850_v45  ;;  %v2952_v53 = vadd.f32 1.0, %v6757_v35 }
 0x278   :  { %4855 = vst.msk [vmem:[%s10028_s4 + $0x200] sm:$0xff] %vm4790_vm2, %v4650_v30  ;;  %v6761_v47 = vpop.eup %6760  ;;  %v4404_v48 = vpop.permute.xlu1 %4403  ;;  %6778 = vrcp.f32 %v2953_v50 }
 0x279   :  { %v4399_v36 = vpop.permute.xlu0 %4398  ;;  %v4753_v49 = vmul.f32 %v4404_v48, %v3529_v40  ;;  %4053 = vperm.xlu1 %5965, %v6759_v34   ;;  %4048 = vperm.xlu0 %5964, %v6761_v47   ;;  %v6763_v52 = vpop.eup %6762  ;;  %6780 = vrcp.f32 %v2952_v53  ;;  %v3536_v40 = vld [vmem:[%s10027_s3 + $0x570] sm:$0xff]  ;;  %v3437_v48 = vld [vmem:[%s10027_s3 + $0x258] sm:$0xff] }
 0x27a   :  { %v4752_v39 = vmul.f32 %v4399_v36, %v3528_v42  ;;  %v6765_v46 = vpop.eup %6764  ;;  %v3436_v36 = vld [vmem:[%s10027_s3 + $0x250] sm:$0xff] }
 0x27b   :  { %4958 = vst.msk [vmem:[%s10028_s4 + $0x538] sm:$0xff] %vm4790_vm2, %v4753_v49  ;;  %v6767_v54 = vpop.eup %6766 }
 0x27c   :  { %4957 = vst.msk [vmem:[%s10028_s4 + $0x530] sm:$0xff] %vm4790_vm2, %v4752_v39  ;;  %v3904_v32 = vpop.permute.xlu1 %3903  ;;  %v6769_v60 = vpop.eup %6768 }
 0x27d   :  { %v3899_v37 = vpop.permute.xlu0 %3898  ;;  %v4653_v31 = vmul.f32 %v3904_v32, %v3429_v51  ;;  %4563 = vperm.xlu1 %5965, %v6763_v52   ;;  %4558 = vperm.xlu0 %5964, %v6765_v46   ;;  %v3538_v52 = vld [vmem:[%s10027_s3 + $0x580] sm:$0xff] }
 0x27e   :  { %v4652_v33 = vmul.f32 %v3899_v37, %v3428_v44  ;;  %v3539_v44 = vld [vmem:[%s10027_s3 + $0x588] sm:$0xff] }
 0x27f   :  { %4858 = vst.msk [vmem:[%s10028_s4 + $0x218] sm:$0xff] %vm4790_vm2, %v4653_v31  ;;  %v6771_v1 = vpop.eup %6770  ;;  %v3439_v31 = vld [vmem:[%s10027_s3 + $0x268] sm:$0xff] }
 0x280   :  { %4857 = vst.msk [vmem:[%s10028_s4 + $0x210] sm:$0xff] %vm4790_vm2, %v4652_v33  ;;  %v4414_v56 = vpop.permute.xlu1 %4413  ;;  %v6773_v4 = vpop.eup %6772  ;;  %v3438_v33 = vld [vmem:[%s10027_s3 + $0x260] sm:$0xff] }
 0x281   :  { %v4409_v55 = vpop.permute.xlu0 %4408  ;;  %v4755_v59 = vmul.f32 %v4414_v56, %v3531_v43  ;;  %4063 = vperm.xlu1 %5965, %v6767_v54   ;;  %4058 = vperm.xlu0 %5964, %v6769_v60   ;;  %v3541_v56 = vld [vmem:[%s10027_s3 + $0x598] sm:$0xff] }
 0x282   :  { %v4754_v58 = vmul.f32 %v4409_v55, %v3530_v41  ;;  %v3540_v55 = vld [vmem:[%s10027_s3 + $0x590] sm:$0xff] }
 0x283   :  { %4960 = vst.msk [vmem:[%s10028_s4 + $0x548] sm:$0xff] %vm4790_vm2, %v4755_v59  ;;  %v6775_v14 = vpop.eup %6774 }
 0x284   :  { %4959 = vst.msk [vmem:[%s10028_s4 + $0x540] sm:$0xff] %vm4790_vm2, %v4754_v58  ;;  %v3914_v6 = vpop.permute.xlu1 %3913  ;;  %v6777_v15 = vpop.eup %6776 }
 0x285   :  { %v3909_v3 = vpop.permute.xlu0 %3908  ;;  %v4655_v10 = vmul.f32 %v3914_v6, %v3431_v57  ;;  %4573 = vperm.xlu1 %5965, %v6771_v1   ;;  %4568 = vperm.xlu0 %5964, %v6773_v4   ;;  %v6779_v20 = vpop.eup %6778  ;;  %v3441_v1 = vld [vmem:[%s10027_s3 + $0x278] sm:$0xff]  ;;  %v3440_v4 = vld [vmem:[%s10027_s3 + $0x270] sm:$0xff] }
 0x286   :  { %v4654_v11 = vmul.f32 %v3909_v3, %v3430_v62  ;;  %v6781_v61 = vpop.eup %6780 }
 0x287   :  { %4860 = vst.msk [vmem:[%s10028_s4 + $0x228] sm:$0xff] %vm4790_vm2, %v4655_v10 }
 0x288   :  { %4859 = vst.msk [vmem:[%s10028_s4 + $0x220] sm:$0xff] %vm4790_vm2, %v4654_v11  ;;  %v4424_v16 = vpop.permute.xlu1 %4423 }
 0x289   :  { %v4419_v9 = vpop.permute.xlu0 %4418  ;;  %v4757_v17 = vmul.f32 %v4424_v16, %v3533_v2  ;;  %4073 = vperm.xlu1 %5965, %v6775_v14   ;;  %4068 = vperm.xlu0 %5964, %v6777_v15   ;;  %v3543_v2 = vld [vmem:[%s10027_s3 + $0x5a8] sm:$0xff] }
 0x28a   :  { %v4756_v18 = vmul.f32 %v4419_v9, %v3532_v13  ;;  %v3542_v13 = vld [vmem:[%s10027_s3 + $0x5a0] sm:$0xff] }
 0x28b   :  { %4962 = vst.msk [vmem:[%s10028_s4 + $0x558] sm:$0xff] %vm4790_vm2, %v4757_v17  ;;  %v3443_v17 = vld [vmem:[%s10027_s3 + $0x288] sm:$0xff] }
 0x28c   :  { %4961 = vst.msk [vmem:[%s10028_s4 + $0x550] sm:$0xff] %vm4790_vm2, %v4756_v18  ;;  %v3924_v7 = vpop.permute.xlu1 %3923  ;;  %v3442_v18 = vld [vmem:[%s10027_s3 + $0x280] sm:$0xff] }
 0x28d   :  { %v3919_v21 = vpop.permute.xlu0 %3918  ;;  %v4657_v63 = vmul.f32 %v3924_v7, %v3433_v12  ;;  %4583 = vperm.xlu1 %5965, %v6779_v20   ;;  %4578 = vperm.xlu0 %5964, %v6781_v61   ;;  %v3545_v7 = vld [vmem:[%s10027_s3 + $0x5b8] sm:$0xff] }
 0x28e   :  { %v4656_v5 = vmul.f32 %v3919_v21, %v3432_v19  ;;  %v3544_v21 = vld [vmem:[%s10027_s3 + $0x5b0] sm:$0xff] }
 0x28f   :  { %4862 = vst.msk [vmem:[%s10028_s4 + $0x238] sm:$0xff] %vm4790_vm2, %v4657_v63 }
 0x290   :  { %4861 = vst.msk [vmem:[%s10028_s4 + $0x230] sm:$0xff] %vm4790_vm2, %v4656_v5  ;;  %v4434_v22 = vpop.permute.xlu1 %4433 }
 0x291   :  { %v4429_v23 = vpop.permute.xlu0 %4428  ;;  %v4759_v24 = vmul.f32 %v4434_v22, %v3535_v0  ;;  %v3445_v22 = vld [vmem:[%s10027_s3 + $0x298] sm:$0xff] }
 0x292   :  { %v4758_v28 = vmul.f32 %v4429_v23, %v3534_v8  ;;  %v3444_v23 = vld [vmem:[%s10027_s3 + $0x290] sm:$0xff] }
 0x293   :  { %4964 = vst.msk [vmem:[%s10028_s4 + $0x568] sm:$0xff] %vm4790_vm2, %v4759_v24 }
 0x294   :  { %4963 = vst.msk [vmem:[%s10028_s4 + $0x560] sm:$0xff] %vm4790_vm2, %v4758_v28  ;;  %v3934_v27 = vpop.permute.xlu1 %3933 }
 0x295   :  { %v3929_v29 = vpop.permute.xlu0 %3928  ;;  %v4659_v30 = vmul.f32 %v3934_v27, %v3435_v25  ;;  %v3547_v27 = vld [vmem:[%s10027_s3 + $0x5c8] sm:$0xff] }
 0x296   :  { %v4658_v35 = vmul.f32 %v3929_v29, %v3434_v26  ;;  %v3546_v29 = vld [vmem:[%s10027_s3 + $0x5c0] sm:$0xff] }
 0x297   :  { %4864 = vst.msk [vmem:[%s10028_s4 + $0x248] sm:$0xff] %vm4790_vm2, %v4659_v30 }
 0x298   :  { %4863 = vst.msk [vmem:[%s10028_s4 + $0x240] sm:$0xff] %vm4790_vm2, %v4658_v35  ;;  %v4444_v42 = vpop.permute.xlu1 %4443 }
 0x299   :  { %v4439_v34 = vpop.permute.xlu0 %4438  ;;  %v4761_v45 = vmul.f32 %v4444_v42, %v3537_v38  ;;  %v3447_v42 = vld [vmem:[%s10027_s3 + $0x2a8] sm:$0xff] }
 0x29a   :  { %v4760_v47 = vmul.f32 %v4439_v34, %v3536_v40  ;;  %v3446_v34 = vld [vmem:[%s10027_s3 + $0x2a0] sm:$0xff] }
 0x29b   :  { %4966 = vst.msk [vmem:[%s10028_s4 + $0x578] sm:$0xff] %vm4790_vm2, %v4761_v45 }
 0x29c   :  { %4965 = vst.msk [vmem:[%s10028_s4 + $0x570] sm:$0xff] %vm4790_vm2, %v4760_v47  ;;  %v3944_v49 = vpop.permute.xlu1 %3943 }
 0x29d   :  { %v3939_v39 = vpop.permute.xlu0 %3938  ;;  %v4661_v50 = vmul.f32 %v3944_v49, %v3437_v48  ;;  %v3549_v49 = vld [vmem:[%s10027_s3 + $0x5d8] sm:$0xff] }
 0x29e   :  { %v4660_v51 = vmul.f32 %v3939_v39, %v3436_v36  ;;  %v3548_v39 = vld [vmem:[%s10027_s3 + $0x5d0] sm:$0xff] }
 0x29f   :  { %4866 = vst.msk [vmem:[%s10028_s4 + $0x258] sm:$0xff] %vm4790_vm2, %v4661_v50 }
 0x2a0   :  { %4865 = vst.msk [vmem:[%s10028_s4 + $0x250] sm:$0xff] %vm4790_vm2, %v4660_v51  ;;  %v4454_v53 = vpop.permute.xlu1 %4453 }
 0x2a1   :  { %v4449_v46 = vpop.permute.xlu0 %4448  ;;  %v4763_v32 = vmul.f32 %v4454_v53, %v3539_v44  ;;  %v3449_v53 = vld [vmem:[%s10027_s3 + $0x2b8] sm:$0xff] }
 0x2a2   :  { %v4762_v37 = vmul.f32 %v4449_v46, %v3538_v52  ;;  %v3448_v46 = vld [vmem:[%s10027_s3 + $0x2b0] sm:$0xff] }
 0x2a3   :  { %4968 = vst.msk [vmem:[%s10028_s4 + $0x588] sm:$0xff] %vm4790_vm2, %v4763_v32 }
 0x2a4   :  { %4967 = vst.msk [vmem:[%s10028_s4 + $0x580] sm:$0xff] %vm4790_vm2, %v4762_v37  ;;  %v3954_v43 = vpop.permute.xlu1 %3953 }
 0x2a5   :  { %v3949_v41 = vpop.permute.xlu0 %3948  ;;  %v4663_v54 = vmul.f32 %v3954_v43, %v3439_v31  ;;  %v3551_v43 = vld [vmem:[%s10027_s3 + $0x5e8] sm:$0xff] }
 0x2a6   :  { %v4662_v60 = vmul.f32 %v3949_v41, %v3438_v33  ;;  %v3550_v41 = vld [vmem:[%s10027_s3 + $0x5e0] sm:$0xff] }
 0x2a7   :  { %4868 = vst.msk [vmem:[%s10028_s4 + $0x268] sm:$0xff] %vm4790_vm2, %v4663_v54 }
 0x2a8   :  { %4867 = vst.msk [vmem:[%s10028_s4 + $0x260] sm:$0xff] %vm4790_vm2, %v4662_v60  ;;  %v4464_v59 = vpop.permute.xlu1 %4463 }
 0x2a9   :  { %v4459_v58 = vpop.permute.xlu0 %4458  ;;  %v4765_v57 = vmul.f32 %v4464_v59, %v3541_v56  ;;  %v3451_v59 = vld [vmem:[%s10027_s3 + $0x2c8] sm:$0xff] }
 0x2aa   :  { %v4764_v62 = vmul.f32 %v4459_v58, %v3540_v55  ;;  %v3450_v58 = vld [vmem:[%s10027_s3 + $0x2c0] sm:$0xff] }
 0x2ab   :  { %4970 = vst.msk [vmem:[%s10028_s4 + $0x598] sm:$0xff] %vm4790_vm2, %v4765_v57 }
 0x2ac   :  { %4969 = vst.msk [vmem:[%s10028_s4 + $0x590] sm:$0xff] %vm4790_vm2, %v4764_v62  ;;  %v3964_v6 = vpop.permute.xlu1 %3963 }
 0x2ad   :  { %v3959_v3 = vpop.permute.xlu0 %3958  ;;  %v4665_v10 = vmul.f32 %v3964_v6, %v3441_v1  ;;  %v3553_v6 = vld [vmem:[%s10027_s3 + $0x5f8] sm:$0xff] }
 0x2ae   :  { %v4664_v11 = vmul.f32 %v3959_v3, %v3440_v4  ;;  %v3552_v3 = vld [vmem:[%s10027_s3 + $0x5f0] sm:$0xff] }
 0x2af   :  { %4870 = vst.msk [vmem:[%s10028_s4 + $0x278] sm:$0xff] %vm4790_vm2, %v4665_v10 }
 0x2b0   :  { %4869 = vst.msk [vmem:[%s10028_s4 + $0x270] sm:$0xff] %vm4790_vm2, %v4664_v11  ;;  %v4474_v14 = vpop.permute.xlu1 %4473 }
 0x2b1   :  { %v4469_v15 = vpop.permute.xlu0 %4468  ;;  %v4767_v16 = vmul.f32 %v4474_v14, %v3543_v2  ;;  %v3453_v14 = vld [vmem:[%s10027_s3 + $0x2d8] sm:$0xff] }
 0x2b2   :  { %v4766_v9 = vmul.f32 %v4469_v15, %v3542_v13  ;;  %v3452_v15 = vld [vmem:[%s10027_s3 + $0x2d0] sm:$0xff] }
 0x2b3   :  { %4972 = vst.msk [vmem:[%s10028_s4 + $0x5a8] sm:$0xff] %vm4790_vm2, %v4767_v16 }
 0x2b4   :  { %4971 = vst.msk [vmem:[%s10028_s4 + $0x5a0] sm:$0xff] %vm4790_vm2, %v4766_v9  ;;  %v3974_v12 = vpop.permute.xlu1 %3973 }
 0x2b5   :  { %v3969_v19 = vpop.permute.xlu0 %3968  ;;  %v4667_v20 = vmul.f32 %v3974_v12, %v3443_v17  ;;  %v3555_v12 = vld [vmem:[%s10027_s3 + $0x608] sm:$0xff] }
 0x2b6   :  { %v4666_v61 = vmul.f32 %v3969_v19, %v3442_v18  ;;  %v3554_v19 = vld [vmem:[%s10027_s3 + $0x600] sm:$0xff] }
 0x2b7   :  { %4872 = vst.msk [vmem:[%s10028_s4 + $0x288] sm:$0xff] %vm4790_vm2, %v4667_v20 }
 0x2b8   :  { %4871 = vst.msk [vmem:[%s10028_s4 + $0x280] sm:$0xff] %vm4790_vm2, %v4666_v61  ;;  %v4484_v63 = vpop.permute.xlu1 %4483 }
 0x2b9   :  { %v4479_v5 = vpop.permute.xlu0 %4478  ;;  %v4769_v0 = vmul.f32 %v4484_v63, %v3545_v7  ;;  %v3455_v63 = vld [vmem:[%s10027_s3 + $0x2e8] sm:$0xff] }
 0x2ba   :  { %v4768_v8 = vmul.f32 %v4479_v5, %v3544_v21  ;;  %v3454_v5 = vld [vmem:[%s10027_s3 + $0x2e0] sm:$0xff] }
 0x2bb   :  { %4974 = vst.msk [vmem:[%s10028_s4 + $0x5b8] sm:$0xff] %vm4790_vm2, %v4769_v0 }
 0x2bc   :  { %4973 = vst.msk [vmem:[%s10028_s4 + $0x5b0] sm:$0xff] %vm4790_vm2, %v4768_v8  ;;  %v3984_v24 = vpop.permute.xlu1 %3983 }
 0x2bd   :  { %v3979_v28 = vpop.permute.xlu0 %3978  ;;  %v4669_v25 = vmul.f32 %v3984_v24, %v3445_v22  ;;  %v3557_v24 = vld [vmem:[%s10027_s3 + $0x618] sm:$0xff] }
 0x2be   :  { %v4668_v26 = vmul.f32 %v3979_v28, %v3444_v23  ;;  %v3556_v28 = vld [vmem:[%s10027_s3 + $0x610] sm:$0xff] }
 0x2bf   :  { %4874 = vst.msk [vmem:[%s10028_s4 + $0x298] sm:$0xff] %vm4790_vm2, %v4669_v25 }
 0x2c0   :  { %4873 = vst.msk [vmem:[%s10028_s4 + $0x290] sm:$0xff] %vm4790_vm2, %v4668_v26  ;;  %v4494_v30 = vpop.permute.xlu1 %4493 }
 0x2c1   :  { %v4489_v35 = vpop.permute.xlu0 %4488  ;;  %v4771_v38 = vmul.f32 %v4494_v30, %v3547_v27  ;;  %v3457_v30 = vld [vmem:[%s10027_s3 + $0x2f8] sm:$0xff] }
 0x2c2   :  { %v4770_v40 = vmul.f32 %v4489_v35, %v3546_v29  ;;  %v3456_v35 = vld [vmem:[%s10027_s3 + $0x2f0] sm:$0xff] }
 0x2c3   :  { %4976 = vst.msk [vmem:[%s10028_s4 + $0x5c8] sm:$0xff] %vm4790_vm2, %v4771_v38 }
 0x2c4   :  { %4975 = vst.msk [vmem:[%s10028_s4 + $0x5c0] sm:$0xff] %vm4790_vm2, %v4770_v40  ;;  %v3994_v45 = vpop.permute.xlu1 %3993 }
 0x2c5   :  { %v3989_v47 = vpop.permute.xlu0 %3988  ;;  %v4671_v48 = vmul.f32 %v3994_v45, %v3447_v42  ;;  %v3559_v45 = vld [vmem:[%s10027_s3 + $0x628] sm:$0xff] }
 0x2c6   :  { %v4670_v36 = vmul.f32 %v3989_v47, %v3446_v34  ;;  %v3558_v47 = vld [vmem:[%s10027_s3 + $0x620] sm:$0xff] }
 0x2c7   :  { %4876 = vst.msk [vmem:[%s10028_s4 + $0x2a8] sm:$0xff] %vm4790_vm2, %v4671_v48 }
 0x2c8   :  { %4875 = vst.msk [vmem:[%s10028_s4 + $0x2a0] sm:$0xff] %vm4790_vm2, %v4670_v36  ;;  %v4504_v50 = vpop.permute.xlu1 %4503 }
 0x2c9   :  { %v4499_v51 = vpop.permute.xlu0 %4498  ;;  %v4773_v44 = vmul.f32 %v4504_v50, %v3549_v49  ;;  %v3459_v50 = vld [vmem:[%s10027_s3 + $0x308] sm:$0xff] }
 0x2ca   :  { %v4772_v52 = vmul.f32 %v4499_v51, %v3548_v39  ;;  %v3458_v51 = vld [vmem:[%s10027_s3 + $0x300] sm:$0xff] }
 0x2cb   :  { %4978 = vst.msk [vmem:[%s10028_s4 + $0x5d8] sm:$0xff] %vm4790_vm2, %v4773_v44 }
 0x2cc   :  { %4977 = vst.msk [vmem:[%s10028_s4 + $0x5d0] sm:$0xff] %vm4790_vm2, %v4772_v52  ;;  %v4004_v32 = vpop.permute.xlu1 %4003 }
 0x2cd   :  { %v3999_v37 = vpop.permute.xlu0 %3998  ;;  %v4673_v31 = vmul.f32 %v4004_v32, %v3449_v53  ;;  %v3561_v32 = vld [vmem:[%s10027_s3 + $0x638] sm:$0xff] }
 0x2ce   :  { %v4672_v33 = vmul.f32 %v3999_v37, %v3448_v46  ;;  %v3560_v37 = vld [vmem:[%s10027_s3 + $0x630] sm:$0xff] }
 0x2cf   :  { %4878 = vst.msk [vmem:[%s10028_s4 + $0x2b8] sm:$0xff] %vm4790_vm2, %v4673_v31 }
 0x2d0   :  { %4877 = vst.msk [vmem:[%s10028_s4 + $0x2b0] sm:$0xff] %vm4790_vm2, %v4672_v33  ;;  %v4514_v54 = vpop.permute.xlu1 %4513 }
 0x2d1   :  { %v4509_v60 = vpop.permute.xlu0 %4508  ;;  %v4775_v56 = vmul.f32 %v4514_v54, %v3551_v43  ;;  %v3461_v54 = vld [vmem:[%s10027_s3 + $0x318] sm:$0xff] }
 0x2d2   :  { %v4774_v55 = vmul.f32 %v4509_v60, %v3550_v41  ;;  %v3460_v60 = vld [vmem:[%s10027_s3 + $0x310] sm:$0xff] }
 0x2d3   :  { %4980 = vst.msk [vmem:[%s10028_s4 + $0x5e8] sm:$0xff] %vm4790_vm2, %v4775_v56 }
 0x2d4   :  { %4979 = vst.msk [vmem:[%s10028_s4 + $0x5e0] sm:$0xff] %vm4790_vm2, %v4774_v55  ;;  %v4014_v57 = vpop.permute.xlu1 %4013 }
 0x2d5   :  { %v4009_v62 = vpop.permute.xlu0 %4008  ;;  %v4675_v1 = vmul.f32 %v4014_v57, %v3451_v59  ;;  %v3563_v57 = vld [vmem:[%s10027_s3 + $0x648] sm:$0xff] }
 0x2d6   :  { %v4674_v4 = vmul.f32 %v4009_v62, %v3450_v58  ;;  %v3562_v62 = vld [vmem:[%s10027_s3 + $0x640] sm:$0xff] }
 0x2d7   :  { %4880 = vst.msk [vmem:[%s10028_s4 + $0x2c8] sm:$0xff] %vm4790_vm2, %v4675_v1 }
 0x2d8   :  { %4879 = vst.msk [vmem:[%s10028_s4 + $0x2c0] sm:$0xff] %vm4790_vm2, %v4674_v4  ;;  %v4524_v10 = vpop.permute.xlu1 %4523 }
 0x2d9   :  { %v4519_v11 = vpop.permute.xlu0 %4518  ;;  %v4777_v2 = vmul.f32 %v4524_v10, %v3553_v6  ;;  %v3463_v10 = vld [vmem:[%s10027_s3 + $0x328] sm:$0xff] }
 0x2da   :  { %v4776_v13 = vmul.f32 %v4519_v11, %v3552_v3  ;;  %v3462_v11 = vld [vmem:[%s10027_s3 + $0x320] sm:$0xff] }
 0x2db   :  { %4982 = vst.msk [vmem:[%s10028_s4 + $0x5f8] sm:$0xff] %vm4790_vm2, %v4777_v2 }
 0x2dc   :  { %4981 = vst.msk [vmem:[%s10028_s4 + $0x5f0] sm:$0xff] %vm4790_vm2, %v4776_v13  ;;  %v4024_v16 = vpop.permute.xlu1 %4023 }
 0x2dd   :  { %v4019_v9 = vpop.permute.xlu0 %4018  ;;  %v4677_v17 = vmul.f32 %v4024_v16, %v3453_v14  ;;  %v3565_v16 = vld [vmem:[%s10027_s3 + $0x658] sm:$0xff] }
 0x2de   :  { %v4676_v18 = vmul.f32 %v4019_v9, %v3452_v15  ;;  %v3564_v9 = vld [vmem:[%s10027_s3 + $0x650] sm:$0xff] }
 0x2df   :  { %4882 = vst.msk [vmem:[%s10028_s4 + $0x2d8] sm:$0xff] %vm4790_vm2, %v4677_v17 }
 0x2e0   :  { %4881 = vst.msk [vmem:[%s10028_s4 + $0x2d0] sm:$0xff] %vm4790_vm2, %v4676_v18  ;;  %v4534_v20 = vpop.permute.xlu1 %4533 }
 0x2e1   :  { %v4529_v61 = vpop.permute.xlu0 %4528  ;;  %v4779_v7 = vmul.f32 %v4534_v20, %v3555_v12 }
 0x2e2   :  { %v4778_v21 = vmul.f32 %v4529_v61, %v3554_v19 }
 0x2e3   :  { %4984 = vst.msk [vmem:[%s10028_s4 + $0x608] sm:$0xff] %vm4790_vm2, %v4779_v7 }
 0x2e4   :  { %4983 = vst.msk [vmem:[%s10028_s4 + $0x600] sm:$0xff] %vm4790_vm2, %v4778_v21  ;;  %v4034_v0 = vpop.permute.xlu1 %4033 }
 0x2e5   :  { %v4029_v8 = vpop.permute.xlu0 %4028  ;;  %v4679_v22 = vmul.f32 %v4034_v0, %v3455_v63 }
 0x2e6   :  { %v4678_v23 = vmul.f32 %v4029_v8, %v3454_v5 }
 0x2e7   :  { %4884 = vst.msk [vmem:[%s10028_s4 + $0x2e8] sm:$0xff] %vm4790_vm2, %v4679_v22 }
 0x2e8   :  { %4883 = vst.msk [vmem:[%s10028_s4 + $0x2e0] sm:$0xff] %vm4790_vm2, %v4678_v23  ;;  %v4544_v25 = vpop.permute.xlu1 %4543 }
 0x2e9   :  { %v4539_v26 = vpop.permute.xlu0 %4538  ;;  %v4781_v27 = vmul.f32 %v4544_v25, %v3557_v24 }
 0x2ea   :  { %v4780_v29 = vmul.f32 %v4539_v26, %v3556_v28 }
 0x2eb   :  { %4986 = vst.msk [vmem:[%s10028_s4 + $0x618] sm:$0xff] %vm4790_vm2, %v4781_v27 }
 0x2ec   :  { %4985 = vst.msk [vmem:[%s10028_s4 + $0x610] sm:$0xff] %vm4790_vm2, %v4780_v29  ;;  %v4044_v38 = vpop.permute.xlu1 %4043 }
 0x2ed   :  { %v4039_v40 = vpop.permute.xlu0 %4038  ;;  %v4681_v42 = vmul.f32 %v4044_v38, %v3457_v30 }
 0x2ee   :  { %v4680_v34 = vmul.f32 %v4039_v40, %v3456_v35 }
 0x2ef   :  { %4886 = vst.msk [vmem:[%s10028_s4 + $0x2f8] sm:$0xff] %vm4790_vm2, %v4681_v42 }
 0x2f0   :  { %4885 = vst.msk [vmem:[%s10028_s4 + $0x2f0] sm:$0xff] %vm4790_vm2, %v4680_v34  ;;  %v4554_v48 = vpop.permute.xlu1 %4553 }
 0x2f1   :  { %v4549_v36 = vpop.permute.xlu0 %4548  ;;  %v4783_v49 = vmul.f32 %v4554_v48, %v3559_v45 }
 0x2f2   :  { %v4782_v39 = vmul.f32 %v4549_v36, %v3558_v47 }
 0x2f3   :  { %4988 = vst.msk [vmem:[%s10028_s4 + $0x628] sm:$0xff] %vm4790_vm2, %v4783_v49 }
 0x2f4   :  { %4987 = vst.msk [vmem:[%s10028_s4 + $0x620] sm:$0xff] %vm4790_vm2, %v4782_v39  ;;  %v4054_v44 = vpop.permute.xlu1 %4053 }
 0x2f5   :  { %v4049_v52 = vpop.permute.xlu0 %4048  ;;  %v4683_v53 = vmul.f32 %v4054_v44, %v3459_v50 }
 0x2f6   :  { %v4682_v46 = vmul.f32 %v4049_v52, %v3458_v51 }
 0x2f7   :  { %4888 = vst.msk [vmem:[%s10028_s4 + $0x308] sm:$0xff] %vm4790_vm2, %v4683_v53 }
 0x2f8   :  { %4887 = vst.msk [vmem:[%s10028_s4 + $0x300] sm:$0xff] %vm4790_vm2, %v4682_v46  ;;  %v4564_v31 = vpop.permute.xlu1 %4563 }
 0x2f9   :  { %v4559_v33 = vpop.permute.xlu0 %4558  ;;  %v4785_v43 = vmul.f32 %v4564_v31, %v3561_v32 }
 0x2fa   :  { %v4784_v41 = vmul.f32 %v4559_v33, %v3560_v37 }
 0x2fb   :  { %4990 = vst.msk [vmem:[%s10028_s4 + $0x638] sm:$0xff] %vm4790_vm2, %v4785_v43 }
 0x2fc   :  { %4989 = vst.msk [vmem:[%s10028_s4 + $0x630] sm:$0xff] %vm4790_vm2, %v4784_v41  ;;  %v4064_v56 = vpop.permute.xlu1 %4063 }
 0x2fd   :  { %v4059_v55 = vpop.permute.xlu0 %4058  ;;  %v4685_v59 = vmul.f32 %v4064_v56, %v3461_v54 }
 0x2fe   :  { %v4684_v58 = vmul.f32 %v4059_v55, %v3460_v60 }
 0x2ff   :  { %4890 = vst.msk [vmem:[%s10028_s4 + $0x318] sm:$0xff] %vm4790_vm2, %v4685_v59 }
 0x300   :  { %4889 = vst.msk [vmem:[%s10028_s4 + $0x310] sm:$0xff] %vm4790_vm2, %v4684_v58  ;;  %v4574_v1 = vpop.permute.xlu1 %4573 }
 0x301   :  { %v4569_v4 = vpop.permute.xlu0 %4568  ;;  %v4787_v6 = vmul.f32 %v4574_v1, %v3563_v57 }
 0x302   :  { %v4786_v3 = vmul.f32 %v4569_v4, %v3562_v62 }
 0x303   :  { %4992 = vst.msk [vmem:[%s10028_s4 + $0x648] sm:$0xff] %vm4790_vm2, %v4787_v6 }
 0x304   :  { %4991 = vst.msk [vmem:[%s10028_s4 + $0x640] sm:$0xff] %vm4790_vm2, %v4786_v3  ;;  %v4074_v2 = vpop.permute.xlu1 %4073 }
 0x305   :  { %v4069_v13 = vpop.permute.xlu0 %4068  ;;  %v4687_v14 = vmul.f32 %v4074_v2, %v3463_v10 }
 0x306   :  { %v4686_v15 = vmul.f32 %v4069_v13, %v3462_v11 }
 0x307   :  { %4892 = vst.msk [vmem:[%s10028_s4 + $0x328] sm:$0xff] %vm4790_vm2, %v4687_v14 }
 0x308   :  { %4891 = vst.msk [vmem:[%s10028_s4 + $0x320] sm:$0xff] %vm4790_vm2, %v4686_v15  ;;  %v4584_v17 = vpop.permute.xlu1 %4583 }
 0x309   :  { %v4579_v18 = vpop.permute.xlu0 %4578  ;;  %v4789_v12 = vmul.f32 %v4584_v17, %v3565_v16 }
 0x30a   :  { %v4788_v19 = vmul.f32 %v4579_v18, %v3564_v9 }
 0x30b   :  { %4994 = vst.msk [vmem:[%s10028_s4 + $0x658] sm:$0xff] %vm4790_vm2, %v4789_v12 }
 0x30c   :  { %4993 = vst.msk [vmem:[%s10028_s4 + $0x650] sm:$0xff] %vm4790_vm2, %v4788_v19 }

</bundles_post_ra>
